<compile_context>
chip_gen: v7x
topology: tpu7x:2x2x1
jax: 0.10.0
libtpu: 0.0.40
codegen_flags: <defaults>
</compile_context>

<pallas_src>
import jax
import jax.numpy as jnp
from jax import lax
from jax.experimental import pallas as pl
from jax.experimental.pallas import tpu as pltpu


# ---------------------------------------------------------------------------
# Fused Conv2d(3x3, valid) + bias + ReLU + MaxPool2d(2): one image per grid step
# ---------------------------------------------------------------------------
def _conv3x3_relu_pool_kernel(x_ref, w_ref, b_ref, o_ref):
    """x_ref: (H, W, Cin) NHWC image; w_ref: (9, Cin, Cout) taps ordered (dy, dx);
    b_ref: (1, Cout); o_ref: (Hp, Wp, Cout) pooled output."""
    Hp, Wp, Cout = o_ref.shape
    W = x_ref.shape[1]
    Wo = W - 2

    # Constant 0/1 selection matrices that compact even / odd conv columns
    # (W-direction pool expressed as MXU matmuls -> no strided access needed).
    wp_idx = lax.broadcasted_iota(jnp.int32, (Wp, Wo), 0)
    wo_idx = lax.broadcasted_iota(jnp.int32, (Wp, Wo), 1)
    sel_even = (wo_idx == 2 * wp_idx).astype(jnp.float32)
    sel_odd = (wo_idx == 2 * wp_idx + 1).astype(jnp.float32)

    bias = b_ref[...]                                   # (1, Cout)

    def conv_row(h):
        """Accumulate the 9 taps for conv output row `h` -> (Wo, Cout) f32."""
        acc = None
        for dy in range(3):
            r = x_ref[h + dy]                           # (W, Cin) input row
            for dx in range(3):
                p = jnp.dot(r[dx:dx + Wo, :], w_ref[dy * 3 + dx],
                            preferred_element_type=jnp.float32)
                acc = p if acc is None else acc + p
        return acc

    def body(hp, carry):
        base = 2 * hp
        r0 = conv_row(base)                             # conv row 2*hp
        r1 = conv_row(base + 1)                         # conv row 2*hp + 1
        # bias + ReLU + H-direction pool (ReLU monotone, bias uniform over window).
        act = jnp.maximum(jnp.maximum(r0, r1) + bias, 0.0)
        # W-direction pool: pick even / odd columns via selection matmuls, then max.
        pooled = jnp.maximum(
            jnp.dot(sel_even, act, preferred_element_type=jnp.float32),
            jnp.dot(sel_odd, act, preferred_element_type=jnp.float32))
        o_ref[hp] = pooled
        return carry

    lax.fori_loop(0, Hp, body, 0)


def conv3x3_relu_maxpool(x, w, b):
    """Fused valid 3x3 conv + bias + ReLU + 2x2 max-pool (floor) on NHWC input.

    x: (N, H, W, Cin) f32; w: (9, Cin, Cout); b: (1, Cout) ->
    (N, (H-2)//2, (W-2)//2, Cout) f32.
    """
    N, H, W, Cin = x.shape
    Cout = w.shape[-1]
    Ho, Wo = H - 2, W - 2
    Hp, Wp = Ho // 2, Wo // 2
    return pl.pallas_call(
        _conv3x3_relu_pool_kernel,
        out_shape=jax.ShapeDtypeStruct((N, Hp, Wp, Cout), jnp.float32),
        grid=(N,),
        in_specs=[
            pl.BlockSpec((None, H, W, Cin), lambda n: (n, 0, 0, 0)),   # one image
            pl.BlockSpec((9, Cin, Cout), lambda n: (0, 0, 0)),         # resident weights
            pl.BlockSpec((1, Cout), lambda n: (0, 0)),                 # resident bias
        ],
        out_specs=pl.BlockSpec((None, Hp, Wp, Cout), lambda n: (n, 0, 0, 0)),
        compiler_params=pltpu.CompilerParams(
            dimension_semantics=("parallel",)),          # v7x: both TCs split the batch
    )(x, w, b)


# ---------------------------------------------------------------------------
# Fused classifier: Linear(feat,128) + ReLU + Linear(128,S) + Sigmoid
# ---------------------------------------------------------------------------
def _classifier_kernel(x_ref, w1_ref, b1_ref, w2_ref, b2_ref, o_ref):
    h = jnp.dot(x_ref[...], w1_ref[...], preferred_element_type=jnp.float32)
    h = jnp.maximum(h + b1_ref[...], 0.0)
    y = jnp.dot(h, w2_ref[...], preferred_element_type=jnp.float32) + b2_ref[...]
    # Exact sigmoid (exp runs on the EUP slot); keeps the output strictly in [0, 1].
    o_ref[...] = 1.0 / (1.0 + jnp.exp(-y))


def classifier(x, w1, b1, w2, b2):
    M = x.shape[0]
    S = w2.shape[-1]
    # No grid: whole-M block, all weights resident in VMEM, no padding / slicing.
    return pl.pallas_call(
        _classifier_kernel,
        out_shape=jax.ShapeDtypeStruct((M, S), jnp.float32),
    )(x, w1, b1, w2, b2)


# ---------------------------------------------------------------------------
# Parameters and forward pass
# ---------------------------------------------------------------------------
def _final_spatial(input_hw):
    h, w = input_hw
    for _ in range(3):
        h, w = (h - 2) // 2, (w - 2) // 2
    return h, w


def init_params(key, num_symbols, input_hw=(38, 78)):
    """Random init mirroring PyTorch defaults U(-1/sqrt(fan_in), +1/sqrt(fan_in)),
    laid out for the kernels.

    Conv weights are stored as (kh*kw, Cin, Cout) with taps ordered (dy, dx); real
    PyTorch weights (Cout, Cin, kh, kw) map via w.transpose(2, 3, 1, 0).reshape(9, Cin, Cout).
    wl1 is generated in PyTorch NCHW-flatten row order and row-permuted once here so the
    forward can flatten the NHWC activation directly (zero runtime cost).
    """
    def uni(k, shape, fan_in):
        bound = 1.0 / jnp.sqrt(jnp.float32(fan_in))
        return jax.random.uniform(k, shape, jnp.float32, -bound, bound)

    keys = jax.random.split(key, 10)
    feat = 144 + 240 * (num_symbols - 1)
    hf, wf = _final_spatial(input_hw)
    cf = 16
    assert cf * hf * wf == feat, (
        f"input H,W={input_hw} gives {cf * hf * wf} features, classifier expects {feat}")

    # Fold the NCHW flatten ordering into wl1's rows (one-time, at init).
    wl1_torch = uni(keys[6], (feat, 128), feat)          # rows in (c, h, w) order
    hh = jnp.arange(hf)[:, None, None]
    ww = jnp.arange(wf)[None, :, None]
    cc = jnp.arange(cf)[None, None, :]
    perm = (cc * (hf * wf) + hh * wf + ww).reshape(-1)   # NHWC row -> NCHW row
    wl1 = wl1_torch[perm]

    return {
        "w1": uni(keys[0], (9, 3, 16), 3 * 9),   "b1": uni(keys[1], (1, 16), 3 * 9),
        "w2": uni(keys[2], (9, 16, 32), 16 * 9), "b2": uni(keys[3], (1, 32), 16 * 9),
        "w3": uni(keys[4], (9, 32, 16), 32 * 9), "b3": uni(keys[5], (1, 16), 32 * 9),
        "wl1": wl1,                               "bl1": uni(keys[7], (1, 128), feat),
        "wl2": uni(keys[8], (128, num_symbols), 128),
        "bl2": uni(keys[9], (1, num_symbols), 128),
    }


@jax.jit
def cnn_symbol_grounder(params, x_nchw):
    """Forward pass; x_nchw: (N, 3, H, W) float32 -> (N, num_symbols) in [0, 1]."""
    x = jnp.transpose(x_nchw, (0, 2, 3, 1))                      # NCHW -> NHWC (tiny, fused)
    x = conv3x3_relu_maxpool(x, params["w1"], params["b1"])
    x = conv3x3_relu_maxpool(x, params["w2"], params["b2"])
    x = conv3x3_relu_maxpool(x, params["w3"], params["b3"])
    flat = x.reshape(x.shape[0], -1)      # NHWC flatten; wl1 rows were permuted at init
    return classifier(flat, params["wl1"], params["bl1"], params["wl2"], params["bl2"])


# ---------------------------------------------------------------------------
if __name__ == "__main__":
    # num_symbols=2 -> classifier input = 144 + 240 = 384 = 16*3*8, which the conv
    # stack produces from a 38x78 input: H 38->36->18->16->8->6->3,
    #                                    W 78->76->38->36->18->16->8.
    NUM_SYMBOLS = 2
    key = jax.random.PRNGKey(0)
    k_x, k_p = jax.random.split(key)
    x = jax.random.normal(k_x, (2, 3, 38, 78), dtype=jnp.float32)
    params = init_params(k_p, NUM_SYMBOLS, input_hw=(38, 78))

    out = jax.block_until_ready(cnn_symbol_grounder(params, x))
    assert out.shape == (2, NUM_SYMBOLS)
    assert bool(jnp.all(jnp.isfinite(out)))
    assert bool(jnp.all((out >= 0.0) & (out <= 1.0)))  # sigmoid range
    print("KERNEL_OK")
</pallas_src>

<mosaic_0001>
module attributes {stable_mosaic.version = 11 : i64} {
  func.func @_conv3x3_relu_pool_kernel(%arg0: i32, %arg1: memref<1x38x78x3xf32, #tpu.memory_space<vmem>>, %arg2: memref<9x3x16xf32, #tpu.memory_space<vmem>>, %arg3: memref<1x16xf32, #tpu.memory_space<vmem>>, %arg4: memref<1x18x38x16xf32, #tpu.memory_space<vmem>>) attributes {dimension_semantics = [#tpu.dimension_semantics<parallel>], iteration_bounds = array<i64: 2>, scalar_prefetch = 0 : i64, scratch_operands = 0 : i64, tpu.core_type = #tpu.core_type<tc>, window_params = [{transform_indices = @transform_0, window_bounds = array<i64: 1, 38, 78, 3>}, {pipeline_mode = #tpu.pipeline_mode<synchronous>, transform_indices = @transform_1, window_bounds = array<i64: 9, 3, 16>}, {pipeline_mode = #tpu.pipeline_mode<synchronous>, transform_indices = @transform_2, window_bounds = array<i64: 1, 16>}, {transform_indices = @transform_3, window_bounds = array<i64: 1, 18, 38, 16>}]} {
    %0 = tpu.iota {dimensions = array<i32: 0>} : vector<38x76xi32>
    %1 = tpu.iota {dimensions = array<i32: 1>} : vector<38x76xi32>
    %c2_i32 = arith.constant 2 : i32
    %2 = vector.broadcast %c2_i32 : i32 to vector<38x76xi32>
    %3 = arith.muli %2, %0 : vector<38x76xi32>
    %4 = arith.cmpi eq, %1, %3 : vector<38x76xi32>
    %5 = arith.extui %4 : vector<38x76xi1> to vector<38x76xi32>
    %6 = arith.sitofp %5 : vector<38x76xi32> to vector<38x76xf32>
    %c2_i32_0 = arith.constant 2 : i32
    %7 = vector.broadcast %c2_i32_0 : i32 to vector<38x76xi32>
    %8 = arith.muli %7, %0 : vector<38x76xi32>
    %c1_i32 = arith.constant 1 : i32
    %9 = vector.broadcast %c1_i32 : i32 to vector<38x76xi32>
    %10 = arith.addi %8, %9 : vector<38x76xi32>
    %11 = arith.cmpi eq, %1, %10 : vector<38x76xi32>
    %12 = arith.extui %11 : vector<38x76xi1> to vector<38x76xi32>
    %13 = arith.sitofp %12 : vector<38x76xi32> to vector<38x76xf32>
    %c0 = arith.constant 0 : index
    %c0_1 = arith.constant 0 : index
    %14 = vector.load %arg3[%c0, %c0_1] : memref<1x16xf32, #tpu.memory_space<vmem>>, vector<1x16xf32>
    %c0_i32 = arith.constant 0 : i32
    %c18_i32 = arith.constant 18 : i32
    %15 = arith.addi %c0_i32, %c18_i32 : i32
    %c1_i32_2 = arith.constant 1 : i32
    scf.for %arg5 = %c0_i32 to %15 step %c1_i32_2  : i32 {
      %c2_i32_4 = arith.constant 2 : i32
      %16 = arith.muli %c2_i32_4, %arg5 : i32
      %c0_i32_5 = arith.constant 0 : i32
      %17 = arith.addi %16, %c0_i32_5 : i32
      %c0_6 = arith.constant 0 : index
      %18 = arith.index_cast %17 : i32 to index
      %c0_7 = arith.constant 0 : index
      %c0_8 = arith.constant 0 : index
      %19 = vector.load %arg1[%c0_6, %18, %c0_7, %c0_8] : memref<1x38x78x3xf32, #tpu.memory_space<vmem>>, vector<1x1x78x3xf32>
      %20 = vector.shape_cast %19 : vector<1x1x78x3xf32> to vector<78x3xf32>
      %21 = vector.extract_strided_slice %20 {offsets = [0, 0], sizes = [76, 3], strides = [1, 1]} : vector<78x3xf32> to vector<76x3xf32>
      %c0_9 = arith.constant 0 : index
      %c0_10 = arith.constant 0 : index
      %c0_11 = arith.constant 0 : index
      %22 = vector.load %arg2[%c0_9, %c0_10, %c0_11] : memref<9x3x16xf32, #tpu.memory_space<vmem>>, vector<1x3x16xf32>
      %23 = vector.shape_cast %22 : vector<1x3x16xf32> to vector<3x16xf32>
      %cst = arith.constant dense<0.000000e+00> : vector<76x16xf32>
      %24 = tpu.matmul %21, %23, %cst {dimension_numbers = #tpu.dot_dimension_numbers<[1], [0], [0], [1], [0, 0, 1, 1], [], []>} : vector<76x3xf32>, vector<3x16xf32>, vector<76x16xf32> -> vector<76x16xf32>
      %25 = vector.extract_strided_slice %20 {offsets = [1, 0], sizes = [76, 3], strides = [1, 1]} : vector<78x3xf32> to vector<76x3xf32>
      %c1 = arith.constant 1 : index
      %c0_12 = arith.constant 0 : index
      %c0_13 = arith.constant 0 : index
      %26 = vector.load %arg2[%c1, %c0_12, %c0_13] : memref<9x3x16xf32, #tpu.memory_space<vmem>>, vector<1x3x16xf32>
      %27 = vector.shape_cast %26 : vector<1x3x16xf32> to vector<3x16xf32>
      %cst_14 = arith.constant dense<0.000000e+00> : vector<76x16xf32>
      %28 = tpu.matmul %25, %27, %cst_14 {dimension_numbers = #tpu.dot_dimension_numbers<[1], [0], [0], [1], [0, 0, 1, 1], [], []>} : vector<76x3xf32>, vector<3x16xf32>, vector<76x16xf32> -> vector<76x16xf32>
      %29 = arith.addf %24, %28 : vector<76x16xf32>
      %30 = vector.extract_strided_slice %20 {offsets = [2, 0], sizes = [76, 3], strides = [1, 1]} : vector<78x3xf32> to vector<76x3xf32>
      %c2 = arith.constant 2 : index
      %c0_15 = arith.constant 0 : index
      %c0_16 = arith.constant 0 : index
      %31 = vector.load %arg2[%c2, %c0_15, %c0_16] : memref<9x3x16xf32, #tpu.memory_space<vmem>>, vector<1x3x16xf32>
      %32 = vector.shape_cast %31 : vector<1x3x16xf32> to vector<3x16xf32>
      %cst_17 = arith.constant dense<0.000000e+00> : vector<76x16xf32>
      %33 = tpu.matmul %30, %32, %cst_17 {dimension_numbers = #tpu.dot_dimension_numbers<[1], [0], [0], [1], [0, 0, 1, 1], [], []>} : vector<76x3xf32>, vector<3x16xf32>, vector<76x16xf32> -> vector<76x16xf32>
      %34 = arith.addf %29, %33 : vector<76x16xf32>
      %c1_i32_18 = arith.constant 1 : i32
      %35 = arith.addi %16, %c1_i32_18 : i32
      %c0_19 = arith.constant 0 : index
      %36 = arith.index_cast %35 : i32 to index
      %c0_20 = arith.constant 0 : index
      %c0_21 = arith.constant 0 : index
      %37 = vector.load %arg1[%c0_19, %36, %c0_20, %c0_21] : memref<1x38x78x3xf32, #tpu.memory_space<vmem>>, vector<1x1x78x3xf32>
      %38 = vector.shape_cast %37 : vector<1x1x78x3xf32> to vector<78x3xf32>
      %39 = vector.extract_strided_slice %38 {offsets = [0, 0], sizes = [76, 3], strides = [1, 1]} : vector<78x3xf32> to vector<76x3xf32>
      %c3 = arith.constant 3 : index
      %c0_22 = arith.constant 0 : index
      %c0_23 = arith.constant 0 : index
      %40 = vector.load %arg2[%c3, %c0_22, %c0_23] : memref<9x3x16xf32, #tpu.memory_space<vmem>>, vector<1x3x16xf32>
      %41 = vector.shape_cast %40 : vector<1x3x16xf32> to vector<3x16xf32>
      %cst_24 = arith.constant dense<0.000000e+00> : vector<76x16xf32>
      %42 = tpu.matmul %39, %41, %cst_24 {dimension_numbers = #tpu.dot_dimension_numbers<[1], [0], [0], [1], [0, 0, 1, 1], [], []>} : vector<76x3xf32>, vector<3x16xf32>, vector<76x16xf32> -> vector<76x16xf32>
      %43 = arith.addf %34, %42 : vector<76x16xf32>
      %44 = vector.extract_strided_slice %38 {offsets = [1, 0], sizes = [76, 3], strides = [1, 1]} : vector<78x3xf32> to vector<76x3xf32>
      %c4 = arith.constant 4 : index
      %c0_25 = arith.constant 0 : index
      %c0_26 = arith.constant 0 : index
      %45 = vector.load %arg2[%c4, %c0_25, %c0_26] : memref<9x3x16xf32, #tpu.memory_space<vmem>>, vector<1x3x16xf32>
      %46 = vector.shape_cast %45 : vector<1x3x16xf32> to vector<3x16xf32>
      %cst_27 = arith.constant dense<0.000000e+00> : vector<76x16xf32>
      %47 = tpu.matmul %44, %46, %cst_27 {dimension_numbers = #tpu.dot_dimension_numbers<[1], [0], [0], [1], [0, 0, 1, 1], [], []>} : vector<76x3xf32>, vector<3x16xf32>, vector<76x16xf32> -> vector<76x16xf32>
      %48 = arith.addf %43, %47 : vector<76x16xf32>
      %49 = vector.extract_strided_slice %38 {offsets = [2, 0], sizes = [76, 3], strides = [1, 1]} : vector<78x3xf32> to vector<76x3xf32>
      %c5 = arith.constant 5 : index
      %c0_28 = arith.constant 0 : index
      %c0_29 = arith.constant 0 : index
      %50 = vector.load %arg2[%c5, %c0_28, %c0_29] : memref<9x3x16xf32, #tpu.memory_space<vmem>>, vector<1x3x16xf32>
      %51 = vector.shape_cast %50 : vector<1x3x16xf32> to vector<3x16xf32>
      %cst_30 = arith.constant dense<0.000000e+00> : vector<76x16xf32>
      %52 = tpu.matmul %49, %51, %cst_30 {dimension_numbers = #tpu.dot_dimension_numbers<[1], [0], [0], [1], [0, 0, 1, 1], [], []>} : vector<76x3xf32>, vector<3x16xf32>, vector<76x16xf32> -> vector<76x16xf32>
      %53 = arith.addf %48, %52 : vector<76x16xf32>
      %c2_i32_31 = arith.constant 2 : i32
      %54 = arith.addi %16, %c2_i32_31 : i32
      %c0_32 = arith.constant 0 : index
      %55 = arith.index_cast %54 : i32 to index
      %c0_33 = arith.constant 0 : index
      %c0_34 = arith.constant 0 : index
      %56 = vector.load %arg1[%c0_32, %55, %c0_33, %c0_34] : memref<1x38x78x3xf32, #tpu.memory_space<vmem>>, vector<1x1x78x3xf32>
      %57 = vector.shape_cast %56 : vector<1x1x78x3xf32> to vector<78x3xf32>
      %58 = vector.extract_strided_slice %57 {offsets = [0, 0], sizes = [76, 3], strides = [1, 1]} : vector<78x3xf32> to vector<76x3xf32>
      %c6 = arith.constant 6 : index
      %c0_35 = arith.constant 0 : index
      %c0_36 = arith.constant 0 : index
      %59 = vector.load %arg2[%c6, %c0_35, %c0_36] : memref<9x3x16xf32, #tpu.memory_space<vmem>>, vector<1x3x16xf32>
      %60 = vector.shape_cast %59 : vector<1x3x16xf32> to vector<3x16xf32>
      %cst_37 = arith.constant dense<0.000000e+00> : vector<76x16xf32>
      %61 = tpu.matmul %58, %60, %cst_37 {dimension_numbers = #tpu.dot_dimension_numbers<[1], [0], [0], [1], [0, 0, 1, 1], [], []>} : vector<76x3xf32>, vector<3x16xf32>, vector<76x16xf32> -> vector<76x16xf32>
      %62 = arith.addf %53, %61 : vector<76x16xf32>
      %63 = vector.extract_strided_slice %57 {offsets = [1, 0], sizes = [76, 3], strides = [1, 1]} : vector<78x3xf32> to vector<76x3xf32>
      %c7 = arith.constant 7 : index
      %c0_38 = arith.constant 0 : index
      %c0_39 = arith.constant 0 : index
      %64 = vector.load %arg2[%c7, %c0_38, %c0_39] : memref<9x3x16xf32, #tpu.memory_space<vmem>>, vector<1x3x16xf32>
      %65 = vector.shape_cast %64 : vector<1x3x16xf32> to vector<3x16xf32>
      %cst_40 = arith.constant dense<0.000000e+00> : vector<76x16xf32>
      %66 = tpu.matmul %63, %65, %cst_40 {dimension_numbers = #tpu.dot_dimension_numbers<[1], [0], [0], [1], [0, 0, 1, 1], [], []>} : vector<76x3xf32>, vector<3x16xf32>, vector<76x16xf32> -> vector<76x16xf32>
      %67 = arith.addf %62, %66 : vector<76x16xf32>
      %68 = vector.extract_strided_slice %57 {offsets = [2, 0], sizes = [76, 3], strides = [1, 1]} : vector<78x3xf32> to vector<76x3xf32>
      %c8 = arith.constant 8 : index
      %c0_41 = arith.constant 0 : index
      %c0_42 = arith.constant 0 : index
      %69 = vector.load %arg2[%c8, %c0_41, %c0_42] : memref<9x3x16xf32, #tpu.memory_space<vmem>>, vector<1x3x16xf32>
      %70 = vector.shape_cast %69 : vector<1x3x16xf32> to vector<3x16xf32>
      %cst_43 = arith.constant dense<0.000000e+00> : vector<76x16xf32>
      %71 = tpu.matmul %68, %70, %cst_43 {dimension_numbers = #tpu.dot_dimension_numbers<[1], [0], [0], [1], [0, 0, 1, 1], [], []>} : vector<76x3xf32>, vector<3x16xf32>, vector<76x16xf32> -> vector<76x16xf32>
      %72 = arith.addf %67, %71 : vector<76x16xf32>
      %c1_i32_44 = arith.constant 1 : i32
      %73 = arith.addi %16, %c1_i32_44 : i32
      %c0_i32_45 = arith.constant 0 : i32
      %74 = arith.addi %73, %c0_i32_45 : i32
      %c0_46 = arith.constant 0 : index
      %75 = arith.index_cast %74 : i32 to index
      %c0_47 = arith.constant 0 : index
      %c0_48 = arith.constant 0 : index
      %76 = vector.load %arg1[%c0_46, %75, %c0_47, %c0_48] : memref<1x38x78x3xf32, #tpu.memory_space<vmem>>, vector<1x1x78x3xf32>
      %77 = vector.shape_cast %76 : vector<1x1x78x3xf32> to vector<78x3xf32>
      %78 = vector.extract_strided_slice %77 {offsets = [0, 0], sizes = [76, 3], strides = [1, 1]} : vector<78x3xf32> to vector<76x3xf32>
      %c0_49 = arith.constant 0 : index
      %c0_50 = arith.constant 0 : index
      %c0_51 = arith.constant 0 : index
      %79 = vector.load %arg2[%c0_49, %c0_50, %c0_51] : memref<9x3x16xf32, #tpu.memory_space<vmem>>, vector<1x3x16xf32>
      %80 = vector.shape_cast %79 : vector<1x3x16xf32> to vector<3x16xf32>
      %cst_52 = arith.constant dense<0.000000e+00> : vector<76x16xf32>
      %81 = tpu.matmul %78, %80, %cst_52 {dimension_numbers = #tpu.dot_dimension_numbers<[1], [0], [0], [1], [0, 0, 1, 1], [], []>} : vector<76x3xf32>, vector<3x16xf32>, vector<76x16xf32> -> vector<76x16xf32>
      %82 = vector.extract_strided_slice %77 {offsets = [1, 0], sizes = [76, 3], strides = [1, 1]} : vector<78x3xf32> to vector<76x3xf32>
      %c1_53 = arith.constant 1 : index
      %c0_54 = arith.constant 0 : index
      %c0_55 = arith.constant 0 : index
      %83 = vector.load %arg2[%c1_53, %c0_54, %c0_55] : memref<9x3x16xf32, #tpu.memory_space<vmem>>, vector<1x3x16xf32>
      %84 = vector.shape_cast %83 : vector<1x3x16xf32> to vector<3x16xf32>
      %cst_56 = arith.constant dense<0.000000e+00> : vector<76x16xf32>
      %85 = tpu.matmul %82, %84, %cst_56 {dimension_numbers = #tpu.dot_dimension_numbers<[1], [0], [0], [1], [0, 0, 1, 1], [], []>} : vector<76x3xf32>, vector<3x16xf32>, vector<76x16xf32> -> vector<76x16xf32>
      %86 = arith.addf %81, %85 : vector<76x16xf32>
      %87 = vector.extract_strided_slice %77 {offsets = [2, 0], sizes = [76, 3], strides = [1, 1]} : vector<78x3xf32> to vector<76x3xf32>
      %c2_57 = arith.constant 2 : index
      %c0_58 = arith.constant 0 : index
      %c0_59 = arith.constant 0 : index
      %88 = vector.load %arg2[%c2_57, %c0_58, %c0_59] : memref<9x3x16xf32, #tpu.memory_space<vmem>>, vector<1x3x16xf32>
      %89 = vector.shape_cast %88 : vector<1x3x16xf32> to vector<3x16xf32>
      %cst_60 = arith.constant dense<0.000000e+00> : vector<76x16xf32>
      %90 = tpu.matmul %87, %89, %cst_60 {dimension_numbers = #tpu.dot_dimension_numbers<[1], [0], [0], [1], [0, 0, 1, 1], [], []>} : vector<76x3xf32>, vector<3x16xf32>, vector<76x16xf32> -> vector<76x16xf32>
      %91 = arith.addf %86, %90 : vector<76x16xf32>
      %c1_i32_61 = arith.constant 1 : i32
      %92 = arith.addi %73, %c1_i32_61 : i32
      %c0_62 = arith.constant 0 : index
      %93 = arith.index_cast %92 : i32 to index
      %c0_63 = arith.constant 0 : index
      %c0_64 = arith.constant 0 : index
      %94 = vector.load %arg1[%c0_62, %93, %c0_63, %c0_64] : memref<1x38x78x3xf32, #tpu.memory_space<vmem>>, vector<1x1x78x3xf32>
      %95 = vector.shape_cast %94 : vector<1x1x78x3xf32> to vector<78x3xf32>
      %96 = vector.extract_strided_slice %95 {offsets = [0, 0], sizes = [76, 3], strides = [1, 1]} : vector<78x3xf32> to vector<76x3xf32>
      %c3_65 = arith.constant 3 : index
      %c0_66 = arith.constant 0 : index
      %c0_67 = arith.constant 0 : index
      %97 = vector.load %arg2[%c3_65, %c0_66, %c0_67] : memref<9x3x16xf32, #tpu.memory_space<vmem>>, vector<1x3x16xf32>
      %98 = vector.shape_cast %97 : vector<1x3x16xf32> to vector<3x16xf32>
      %cst_68 = arith.constant dense<0.000000e+00> : vector<76x16xf32>
      %99 = tpu.matmul %96, %98, %cst_68 {dimension_numbers = #tpu.dot_dimension_numbers<[1], [0], [0], [1], [0, 0, 1, 1], [], []>} : vector<76x3xf32>, vector<3x16xf32>, vector<76x16xf32> -> vector<76x16xf32>
      %100 = arith.addf %91, %99 : vector<76x16xf32>
      %101 = vector.extract_strided_slice %95 {offsets = [1, 0], sizes = [76, 3], strides = [1, 1]} : vector<78x3xf32> to vector<76x3xf32>
      %c4_69 = arith.constant 4 : index
      %c0_70 = arith.constant 0 : index
      %c0_71 = arith.constant 0 : index
      %102 = vector.load %arg2[%c4_69, %c0_70, %c0_71] : memref<9x3x16xf32, #tpu.memory_space<vmem>>, vector<1x3x16xf32>
      %103 = vector.shape_cast %102 : vector<1x3x16xf32> to vector<3x16xf32>
      %cst_72 = arith.constant dense<0.000000e+00> : vector<76x16xf32>
      %104 = tpu.matmul %101, %103, %cst_72 {dimension_numbers = #tpu.dot_dimension_numbers<[1], [0], [0], [1], [0, 0, 1, 1], [], []>} : vector<76x3xf32>, vector<3x16xf32>, vector<76x16xf32> -> vector<76x16xf32>
      %105 = arith.addf %100, %104 : vector<76x16xf32>
      %106 = vector.extract_strided_slice %95 {offsets = [2, 0], sizes = [76, 3], strides = [1, 1]} : vector<78x3xf32> to vector<76x3xf32>
      %c5_73 = arith.constant 5 : index
      %c0_74 = arith.constant 0 : index
      %c0_75 = arith.constant 0 : index
      %107 = vector.load %arg2[%c5_73, %c0_74, %c0_75] : memref<9x3x16xf32, #tpu.memory_space<vmem>>, vector<1x3x16xf32>
      %108 = vector.shape_cast %107 : vector<1x3x16xf32> to vector<3x16xf32>
      %cst_76 = arith.constant dense<0.000000e+00> : vector<76x16xf32>
      %109 = tpu.matmul %106, %108, %cst_76 {dimension_numbers = #tpu.dot_dimension_numbers<[1], [0], [0], [1], [0, 0, 1, 1], [], []>} : vector<76x3xf32>, vector<3x16xf32>, vector<76x16xf32> -> vector<76x16xf32>
      %110 = arith.addf %105, %109 : vector<76x16xf32>
      %c2_i32_77 = arith.constant 2 : i32
      %111 = arith.addi %73, %c2_i32_77 : i32
      %c0_78 = arith.constant 0 : index
      %112 = arith.index_cast %111 : i32 to index
      %c0_79 = arith.constant 0 : index
      %c0_80 = arith.constant 0 : index
      %113 = vector.load %arg1[%c0_78, %112, %c0_79, %c0_80] : memref<1x38x78x3xf32, #tpu.memory_space<vmem>>, vector<1x1x78x3xf32>
      %114 = vector.shape_cast %113 : vector<1x1x78x3xf32> to vector<78x3xf32>
      %115 = vector.extract_strided_slice %114 {offsets = [0, 0], sizes = [76, 3], strides = [1, 1]} : vector<78x3xf32> to vector<76x3xf32>
      %c6_81 = arith.constant 6 : index
      %c0_82 = arith.constant 0 : index
      %c0_83 = arith.constant 0 : index
      %116 = vector.load %arg2[%c6_81, %c0_82, %c0_83] : memref<9x3x16xf32, #tpu.memory_space<vmem>>, vector<1x3x16xf32>
      %117 = vector.shape_cast %116 : vector<1x3x16xf32> to vector<3x16xf32>
      %cst_84 = arith.constant dense<0.000000e+00> : vector<76x16xf32>
      %118 = tpu.matmul %115, %117, %cst_84 {dimension_numbers = #tpu.dot_dimension_numbers<[1], [0], [0], [1], [0, 0, 1, 1], [], []>} : vector<76x3xf32>, vector<3x16xf32>, vector<76x16xf32> -> vector<76x16xf32>
      %119 = arith.addf %110, %118 : vector<76x16xf32>
      %120 = vector.extract_strided_slice %114 {offsets = [1, 0], sizes = [76, 3], strides = [1, 1]} : vector<78x3xf32> to vector<76x3xf32>
      %c7_85 = arith.constant 7 : index
      %c0_86 = arith.constant 0 : index
      %c0_87 = arith.constant 0 : index
      %121 = vector.load %arg2[%c7_85, %c0_86, %c0_87] : memref<9x3x16xf32, #tpu.memory_space<vmem>>, vector<1x3x16xf32>
      %122 = vector.shape_cast %121 : vector<1x3x16xf32> to vector<3x16xf32>
      %cst_88 = arith.constant dense<0.000000e+00> : vector<76x16xf32>
      %123 = tpu.matmul %120, %122, %cst_88 {dimension_numbers = #tpu.dot_dimension_numbers<[1], [0], [0], [1], [0, 0, 1, 1], [], []>} : vector<76x3xf32>, vector<3x16xf32>, vector<76x16xf32> -> vector<76x16xf32>
      %124 = arith.addf %119, %123 : vector<76x16xf32>
      %125 = vector.extract_strided_slice %114 {offsets = [2, 0], sizes = [76, 3], strides = [1, 1]} : vector<78x3xf32> to vector<76x3xf32>
      %c8_89 = arith.constant 8 : index
      %c0_90 = arith.constant 0 : index
      %c0_91 = arith.constant 0 : index
      %126 = vector.load %arg2[%c8_89, %c0_90, %c0_91] : memref<9x3x16xf32, #tpu.memory_space<vmem>>, vector<1x3x16xf32>
      %127 = vector.shape_cast %126 : vector<1x3x16xf32> to vector<3x16xf32>
      %cst_92 = arith.constant dense<0.000000e+00> : vector<76x16xf32>
      %128 = tpu.matmul %125, %127, %cst_92 {dimension_numbers = #tpu.dot_dimension_numbers<[1], [0], [0], [1], [0, 0, 1, 1], [], []>} : vector<76x3xf32>, vector<3x16xf32>, vector<76x16xf32> -> vector<76x16xf32>
      %129 = arith.addf %124, %128 : vector<76x16xf32>
      %130 = arith.maximumf %72, %129 : vector<76x16xf32>
      %131 = vector.broadcast %14 : vector<1x16xf32> to vector<76x16xf32>
      %132 = arith.addf %130, %131 : vector<76x16xf32>
      %cst_93 = arith.constant 0.000000e+00 : f32
      %133 = vector.broadcast %cst_93 : f32 to vector<76x16xf32>
      %134 = arith.maximumf %132, %133 : vector<76x16xf32>
      %cst_94 = arith.constant dense<0.000000e+00> : vector<38x16xf32>
      %135 = tpu.matmul %6, %134, %cst_94 {dimension_numbers = #tpu.dot_dimension_numbers<[1], [0], [0], [1], [0, 0, 1, 1], [], []>} : vector<38x76xf32>, vector<76x16xf32>, vector<38x16xf32> -> vector<38x16xf32>
      %cst_95 = arith.constant dense<0.000000e+00> : vector<38x16xf32>
      %136 = tpu.matmul %13, %134, %cst_95 {dimension_numbers = #tpu.dot_dimension_numbers<[1], [0], [0], [1], [0, 0, 1, 1], [], []>} : vector<38x76xf32>, vector<76x16xf32>, vector<38x16xf32> -> vector<38x16xf32>
      %137 = arith.maximumf %135, %136 : vector<38x16xf32>
      %c0_96 = arith.constant 0 : index
      %138 = arith.index_cast %arg5 : i32 to index
      %c0_97 = arith.constant 0 : index
      %c0_98 = arith.constant 0 : index
      %139 = vector.load %arg4[%c0_96, %138, %c0_97, %c0_98] : memref<1x18x38x16xf32, #tpu.memory_space<vmem>>, vector<1x1x38x16xf32>
      %140 = vector.shape_cast %139 : vector<1x1x38x16xf32> to vector<38x16xf32>
      %141 = vector.shape_cast %137 : vector<38x16xf32> to vector<1x1x38x16xf32>
      tpu.vector_store %arg4[%c0_96, %138, %c0_97, %c0_98], %141 {strides = array<i32>} : memref<1x18x38x16xf32, #tpu.memory_space<vmem>>, vector<1x1x38x16xf32>,
    }
    %c18_i32_3 = arith.constant 18 : i32
    return
  }
  func.func @transform_0(%arg0: i32) -> (i32, i32, i32, i32) {
    %c0_i32 = arith.constant 0 : i32
    %c0_i32_0 = arith.constant 0 : i32
    %c0_i32_1 = arith.constant 0 : i32
    %c0_i32_2 = arith.constant 0 : i32
    return %arg0, %c0_i32, %c0_i32_0, %c0_i32_1 : i32, i32, i32, i32
  }
  func.func @transform_1(%arg0: i32) -> (i32, i32, i32) {
    %c0_i32 = arith.constant 0 : i32
    %c0_i32_0 = arith.constant 0 : i32
    %c0_i32_1 = arith.constant 0 : i32
    %c0_i32_2 = arith.constant 0 : i32
    return %c0_i32, %c0_i32_0, %c0_i32_1 : i32, i32, i32
  }
  func.func @transform_2(%arg0: i32) -> (i32, i32) {
    %c0_i32 = arith.constant 0 : i32
    %c0_i32_0 = arith.constant 0 : i32
    %c0_i32_1 = arith.constant 0 : i32
    return %c0_i32, %c0_i32_0 : i32, i32
  }
  func.func @transform_3(%arg0: i32) -> (i32, i32, i32, i32) {
    %c0_i32 = arith.constant 0 : i32
    %c0_i32_0 = arith.constant 0 : i32
    %c0_i32_1 = arith.constant 0 : i32
    %c0_i32_2 = arith.constant 0 : i32
    return %arg0, %c0_i32, %c0_i32_0, %c0_i32_1 : i32, i32, i32, i32
  }
}

module attributes {stable_mosaic.version = 11 : i64} {
  func.func @_conv3x3_relu_pool_kernel(%arg0: i32, %arg1: memref<1x18x38x16xf32, #tpu.memory_space<vmem>>, %arg2: memref<9x16x32xf32, #tpu.memory_space<vmem>>, %arg3: memref<1x32xf32, #tpu.memory_space<vmem>>, %arg4: memref<1x8x18x32xf32, #tpu.memory_space<vmem>>) attributes {dimension_semantics = [#tpu.dimension_semantics<parallel>], iteration_bounds = array<i64: 2>, scalar_prefetch = 0 : i64, scratch_operands = 0 : i64, tpu.core_type = #tpu.core_type<tc>, window_params = [{transform_indices = @transform_0, window_bounds = array<i64: 1, 18, 38, 16>}, {pipeline_mode = #tpu.pipeline_mode<synchronous>, transform_indices = @transform_1, window_bounds = array<i64: 9, 16, 32>}, {pipeline_mode = #tpu.pipeline_mode<synchronous>, transform_indices = @transform_2, window_bounds = array<i64: 1, 32>}, {transform_indices = @transform_3, window_bounds = array<i64: 1, 8, 18, 32>}]} {
    %0 = tpu.iota {dimensions = array<i32: 0>} : vector<18x36xi32>
    %1 = tpu.iota {dimensions = array<i32: 1>} : vector<18x36xi32>
    %c2_i32 = arith.constant 2 : i32
    %2 = vector.broadcast %c2_i32 : i32 to vector<18x36xi32>
    %3 = arith.muli %2, %0 : vector<18x36xi32>
    %4 = arith.cmpi eq, %1, %3 : vector<18x36xi32>
    %5 = arith.extui %4 : vector<18x36xi1> to vector<18x36xi32>
    %6 = arith.sitofp %5 : vector<18x36xi32> to vector<18x36xf32>
    %c2_i32_0 = arith.constant 2 : i32
    %7 = vector.broadcast %c2_i32_0 : i32 to vector<18x36xi32>
    %8 = arith.muli %7, %0 : vector<18x36xi32>
    %c1_i32 = arith.constant 1 : i32
    %9 = vector.broadcast %c1_i32 : i32 to vector<18x36xi32>
    %10 = arith.addi %8, %9 : vector<18x36xi32>
    %11 = arith.cmpi eq, %1, %10 : vector<18x36xi32>
    %12 = arith.extui %11 : vector<18x36xi1> to vector<18x36xi32>
    %13 = arith.sitofp %12 : vector<18x36xi32> to vector<18x36xf32>
    %c0 = arith.constant 0 : index
    %c0_1 = arith.constant 0 : index
    %14 = vector.load %arg3[%c0, %c0_1] : memref<1x32xf32, #tpu.memory_space<vmem>>, vector<1x32xf32>
    %c0_i32 = arith.constant 0 : i32
    %c8_i32 = arith.constant 8 : i32
    %15 = arith.addi %c0_i32, %c8_i32 : i32
    %c1_i32_2 = arith.constant 1 : i32
    scf.for %arg5 = %c0_i32 to %15 step %c1_i32_2  : i32 {
      %c2_i32_4 = arith.constant 2 : i32
      %16 = arith.muli %c2_i32_4, %arg5 : i32
      %c0_i32_5 = arith.constant 0 : i32
      %17 = arith.addi %16, %c0_i32_5 : i32
      %c0_6 = arith.constant 0 : index
      %18 = arith.index_cast %17 : i32 to index
      %c0_7 = arith.constant 0 : index
      %c0_8 = arith.constant 0 : index
      %19 = vector.load %arg1[%c0_6, %18, %c0_7, %c0_8] : memref<1x18x38x16xf32, #tpu.memory_space<vmem>>, vector<1x1x38x16xf32>
      %20 = vector.shape_cast %19 : vector<1x1x38x16xf32> to vector<38x16xf32>
      %21 = vector.extract_strided_slice %20 {offsets = [0, 0], sizes = [36, 16], strides = [1, 1]} : vector<38x16xf32> to vector<36x16xf32>
      %c0_9 = arith.constant 0 : index
      %c0_10 = arith.constant 0 : index
      %c0_11 = arith.constant 0 : index
      %22 = vector.load %arg2[%c0_9, %c0_10, %c0_11] : memref<9x16x32xf32, #tpu.memory_space<vmem>>, vector<1x16x32xf32>
      %23 = vector.shape_cast %22 : vector<1x16x32xf32> to vector<16x32xf32>
      %cst = arith.constant dense<0.000000e+00> : vector<36x32xf32>
      %24 = tpu.matmul %21, %23, %cst {dimension_numbers = #tpu.dot_dimension_numbers<[1], [0], [0], [1], [0, 0, 1, 1], [], []>} : vector<36x16xf32>, vector<16x32xf32>, vector<36x32xf32> -> vector<36x32xf32>
      %25 = vector.extract_strided_slice %20 {offsets = [1, 0], sizes = [36, 16], strides = [1, 1]} : vector<38x16xf32> to vector<36x16xf32>
      %c1 = arith.constant 1 : index
      %c0_12 = arith.constant 0 : index
      %c0_13 = arith.constant 0 : index
      %26 = vector.load %arg2[%c1, %c0_12, %c0_13] : memref<9x16x32xf32, #tpu.memory_space<vmem>>, vector<1x16x32xf32>
      %27 = vector.shape_cast %26 : vector<1x16x32xf32> to vector<16x32xf32>
      %cst_14 = arith.constant dense<0.000000e+00> : vector<36x32xf32>
      %28 = tpu.matmul %25, %27, %cst_14 {dimension_numbers = #tpu.dot_dimension_numbers<[1], [0], [0], [1], [0, 0, 1, 1], [], []>} : vector<36x16xf32>, vector<16x32xf32>, vector<36x32xf32> -> vector<36x32xf32>
      %29 = arith.addf %24, %28 : vector<36x32xf32>
      %30 = vector.extract_strided_slice %20 {offsets = [2, 0], sizes = [36, 16], strides = [1, 1]} : vector<38x16xf32> to vector<36x16xf32>
      %c2 = arith.constant 2 : index
      %c0_15 = arith.constant 0 : index
      %c0_16 = arith.constant 0 : index
      %31 = vector.load %arg2[%c2, %c0_15, %c0_16] : memref<9x16x32xf32, #tpu.memory_space<vmem>>, vector<1x16x32xf32>
      %32 = vector.shape_cast %31 : vector<1x16x32xf32> to vector<16x32xf32>
      %cst_17 = arith.constant dense<0.000000e+00> : vector<36x32xf32>
      %33 = tpu.matmul %30, %32, %cst_17 {dimension_numbers = #tpu.dot_dimension_numbers<[1], [0], [0], [1], [0, 0, 1, 1], [], []>} : vector<36x16xf32>, vector<16x32xf32>, vector<36x32xf32> -> vector<36x32xf32>
      %34 = arith.addf %29, %33 : vector<36x32xf32>
      %c1_i32_18 = arith.constant 1 : i32
      %35 = arith.addi %16, %c1_i32_18 : i32
      %c0_19 = arith.constant 0 : index
      %36 = arith.index_cast %35 : i32 to index
      %c0_20 = arith.constant 0 : index
      %c0_21 = arith.constant 0 : index
      %37 = vector.load %arg1[%c0_19, %36, %c0_20, %c0_21] : memref<1x18x38x16xf32, #tpu.memory_space<vmem>>, vector<1x1x38x16xf32>
      %38 = vector.shape_cast %37 : vector<1x1x38x16xf32> to vector<38x16xf32>
      %39 = vector.extract_strided_slice %38 {offsets = [0, 0], sizes = [36, 16], strides = [1, 1]} : vector<38x16xf32> to vector<36x16xf32>
      %c3 = arith.constant 3 : index
      %c0_22 = arith.constant 0 : index
      %c0_23 = arith.constant 0 : index
      %40 = vector.load %arg2[%c3, %c0_22, %c0_23] : memref<9x16x32xf32, #tpu.memory_space<vmem>>, vector<1x16x32xf32>
      %41 = vector.shape_cast %40 : vector<1x16x32xf32> to vector<16x32xf32>
      %cst_24 = arith.constant dense<0.000000e+00> : vector<36x32xf32>
      %42 = tpu.matmul %39, %41, %cst_24 {dimension_numbers = #tpu.dot_dimension_numbers<[1], [0], [0], [1], [0, 0, 1, 1], [], []>} : vector<36x16xf32>, vector<16x32xf32>, vector<36x32xf32> -> vector<36x32xf32>
      %43 = arith.addf %34, %42 : vector<36x32xf32>
      %44 = vector.extract_strided_slice %38 {offsets = [1, 0], sizes = [36, 16], strides = [1, 1]} : vector<38x16xf32> to vector<36x16xf32>
      %c4 = arith.constant 4 : index
      %c0_25 = arith.constant 0 : index
      %c0_26 = arith.constant 0 : index
      %45 = vector.load %arg2[%c4, %c0_25, %c0_26] : memref<9x16x32xf32, #tpu.memory_space<vmem>>, vector<1x16x32xf32>
      %46 = vector.shape_cast %45 : vector<1x16x32xf32> to vector<16x32xf32>
      %cst_27 = arith.constant dense<0.000000e+00> : vector<36x32xf32>
      %47 = tpu.matmul %44, %46, %cst_27 {dimension_numbers = #tpu.dot_dimension_numbers<[1], [0], [0], [1], [0, 0, 1, 1], [], []>} : vector<36x16xf32>, vector<16x32xf32>, vector<36x32xf32> -> vector<36x32xf32>
      %48 = arith.addf %43, %47 : vector<36x32xf32>
      %49 = vector.extract_strided_slice %38 {offsets = [2, 0], sizes = [36, 16], strides = [1, 1]} : vector<38x16xf32> to vector<36x16xf32>
      %c5 = arith.constant 5 : index
      %c0_28 = arith.constant 0 : index
      %c0_29 = arith.constant 0 : index
      %50 = vector.load %arg2[%c5, %c0_28, %c0_29] : memref<9x16x32xf32, #tpu.memory_space<vmem>>, vector<1x16x32xf32>
      %51 = vector.shape_cast %50 : vector<1x16x32xf32> to vector<16x32xf32>
      %cst_30 = arith.constant dense<0.000000e+00> : vector<36x32xf32>
      %52 = tpu.matmul %49, %51, %cst_30 {dimension_numbers = #tpu.dot_dimension_numbers<[1], [0], [0], [1], [0, 0, 1, 1], [], []>} : vector<36x16xf32>, vector<16x32xf32>, vector<36x32xf32> -> vector<36x32xf32>
      %53 = arith.addf %48, %52 : vector<36x32xf32>
      %c2_i32_31 = arith.constant 2 : i32
      %54 = arith.addi %16, %c2_i32_31 : i32
      %c0_32 = arith.constant 0 : index
      %55 = arith.index_cast %54 : i32 to index
      %c0_33 = arith.constant 0 : index
      %c0_34 = arith.constant 0 : index
      %56 = vector.load %arg1[%c0_32, %55, %c0_33, %c0_34] : memref<1x18x38x16xf32, #tpu.memory_space<vmem>>, vector<1x1x38x16xf32>
      %57 = vector.shape_cast %56 : vector<1x1x38x16xf32> to vector<38x16xf32>
      %58 = vector.extract_strided_slice %57 {offsets = [0, 0], sizes = [36, 16], strides = [1, 1]} : vector<38x16xf32> to vector<36x16xf32>
      %c6 = arith.constant 6 : index
      %c0_35 = arith.constant 0 : index
      %c0_36 = arith.constant 0 : index
      %59 = vector.load %arg2[%c6, %c0_35, %c0_36] : memref<9x16x32xf32, #tpu.memory_space<vmem>>, vector<1x16x32xf32>
      %60 = vector.shape_cast %59 : vector<1x16x32xf32> to vector<16x32xf32>
      %cst_37 = arith.constant dense<0.000000e+00> : vector<36x32xf32>
      %61 = tpu.matmul %58, %60, %cst_37 {dimension_numbers = #tpu.dot_dimension_numbers<[1], [0], [0], [1], [0, 0, 1, 1], [], []>} : vector<36x16xf32>, vector<16x32xf32>, vector<36x32xf32> -> vector<36x32xf32>
      %62 = arith.addf %53, %61 : vector<36x32xf32>
      %63 = vector.extract_strided_slice %57 {offsets = [1, 0], sizes = [36, 16], strides = [1, 1]} : vector<38x16xf32> to vector<36x16xf32>
      %c7 = arith.constant 7 : index
      %c0_38 = arith.constant 0 : index
      %c0_39 = arith.constant 0 : index
      %64 = vector.load %arg2[%c7, %c0_38, %c0_39] : memref<9x16x32xf32, #tpu.memory_space<vmem>>, vector<1x16x32xf32>
      %65 = vector.shape_cast %64 : vector<1x16x32xf32> to vector<16x32xf32>
      %cst_40 = arith.constant dense<0.000000e+00> : vector<36x32xf32>
      %66 = tpu.matmul %63, %65, %cst_40 {dimension_numbers = #tpu.dot_dimension_numbers<[1], [0], [0], [1], [0, 0, 1, 1], [], []>} : vector<36x16xf32>, vector<16x32xf32>, vector<36x32xf32> -> vector<36x32xf32>
      %67 = arith.addf %62, %66 : vector<36x32xf32>
      %68 = vector.extract_strided_slice %57 {offsets = [2, 0], sizes = [36, 16], strides = [1, 1]} : vector<38x16xf32> to vector<36x16xf32>
      %c8 = arith.constant 8 : index
      %c0_41 = arith.constant 0 : index
      %c0_42 = arith.constant 0 : index
      %69 = vector.load %arg2[%c8, %c0_41, %c0_42] : memref<9x16x32xf32, #tpu.memory_space<vmem>>, vector<1x16x32xf32>
      %70 = vector.shape_cast %69 : vector<1x16x32xf32> to vector<16x32xf32>
      %cst_43 = arith.constant dense<0.000000e+00> : vector<36x32xf32>
      %71 = tpu.matmul %68, %70, %cst_43 {dimension_numbers = #tpu.dot_dimension_numbers<[1], [0], [0], [1], [0, 0, 1, 1], [], []>} : vector<36x16xf32>, vector<16x32xf32>, vector<36x32xf32> -> vector<36x32xf32>
      %72 = arith.addf %67, %71 : vector<36x32xf32>
      %c1_i32_44 = arith.constant 1 : i32
      %73 = arith.addi %16, %c1_i32_44 : i32
      %c0_i32_45 = arith.constant 0 : i32
      %74 = arith.addi %73, %c0_i32_45 : i32
      %c0_46 = arith.constant 0 : index
      %75 = arith.index_cast %74 : i32 to index
      %c0_47 = arith.constant 0 : index
      %c0_48 = arith.constant 0 : index
      %76 = vector.load %arg1[%c0_46, %75, %c0_47, %c0_48] : memref<1x18x38x16xf32, #tpu.memory_space<vmem>>, vector<1x1x38x16xf32>
      %77 = vector.shape_cast %76 : vector<1x1x38x16xf32> to vector<38x16xf32>
      %78 = vector.extract_strided_slice %77 {offsets = [0, 0], sizes = [36, 16], strides = [1, 1]} : vector<38x16xf32> to vector<36x16xf32>
      %c0_49 = arith.constant 0 : index
      %c0_50 = arith.constant 0 : index
      %c0_51 = arith.constant 0 : index
      %79 = vector.load %arg2[%c0_49, %c0_50, %c0_51] : memref<9x16x32xf32, #tpu.memory_space<vmem>>, vector<1x16x32xf32>
      %80 = vector.shape_cast %79 : vector<1x16x32xf32> to vector<16x32xf32>
      %cst_52 = arith.constant dense<0.000000e+00> : vector<36x32xf32>
      %81 = tpu.matmul %78, %80, %cst_52 {dimension_numbers = #tpu.dot_dimension_numbers<[1], [0], [0], [1], [0, 0, 1, 1], [], []>} : vector<36x16xf32>, vector<16x32xf32>, vector<36x32xf32> -> vector<36x32xf32>
      %82 = vector.extract_strided_slice %77 {offsets = [1, 0], sizes = [36, 16], strides = [1, 1]} : vector<38x16xf32> to vector<36x16xf32>
      %c1_53 = arith.constant 1 : index
      %c0_54 = arith.constant 0 : index
      %c0_55 = arith.constant 0 : index
      %83 = vector.load %arg2[%c1_53, %c0_54, %c0_55] : memref<9x16x32xf32, #tpu.memory_space<vmem>>, vector<1x16x32xf32>
      %84 = vector.shape_cast %83 : vector<1x16x32xf32> to vector<16x32xf32>
      %cst_56 = arith.constant dense<0.000000e+00> : vector<36x32xf32>
      %85 = tpu.matmul %82, %84, %cst_56 {dimension_numbers = #tpu.dot_dimension_numbers<[1], [0], [0], [1], [0, 0, 1, 1], [], []>} : vector<36x16xf32>, vector<16x32xf32>, vector<36x32xf32> -> vector<36x32xf32>
      %86 = arith.addf %81, %85 : vector<36x32xf32>
      %87 = vector.extract_strided_slice %77 {offsets = [2, 0], sizes = [36, 16], strides = [1, 1]} : vector<38x16xf32> to vector<36x16xf32>
      %c2_57 = arith.constant 2 : index
      %c0_58 = arith.constant 0 : index
      %c0_59 = arith.constant 0 : index
      %88 = vector.load %arg2[%c2_57, %c0_58, %c0_59] : memref<9x16x32xf32, #tpu.memory_space<vmem>>, vector<1x16x32xf32>
      %89 = vector.shape_cast %88 : vector<1x16x32xf32> to vector<16x32xf32>
      %cst_60 = arith.constant dense<0.000000e+00> : vector<36x32xf32>
      %90 = tpu.matmul %87, %89, %cst_60 {dimension_numbers = #tpu.dot_dimension_numbers<[1], [0], [0], [1], [0, 0, 1, 1], [], []>} : vector<36x16xf32>, vector<16x32xf32>, vector<36x32xf32> -> vector<36x32xf32>
      %91 = arith.addf %86, %90 : vector<36x32xf32>
      %c1_i32_61 = arith.constant 1 : i32
      %92 = arith.addi %73, %c1_i32_61 : i32
      %c0_62 = arith.constant 0 : index
      %93 = arith.index_cast %92 : i32 to index
      %c0_63 = arith.constant 0 : index
      %c0_64 = arith.constant 0 : index
      %94 = vector.load %arg1[%c0_62, %93, %c0_63, %c0_64] : memref<1x18x38x16xf32, #tpu.memory_space<vmem>>, vector<1x1x38x16xf32>
      %95 = vector.shape_cast %94 : vector<1x1x38x16xf32> to vector<38x16xf32>
      %96 = vector.extract_strided_slice %95 {offsets = [0, 0], sizes = [36, 16], strides = [1, 1]} : vector<38x16xf32> to vector<36x16xf32>
      %c3_65 = arith.constant 3 : index
      %c0_66 = arith.constant 0 : index
      %c0_67 = arith.constant 0 : index
      %97 = vector.load %arg2[%c3_65, %c0_66, %c0_67] : memref<9x16x32xf32, #tpu.memory_space<vmem>>, vector<1x16x32xf32>
      %98 = vector.shape_cast %97 : vector<1x16x32xf32> to vector<16x32xf32>
      %cst_68 = arith.constant dense<0.000000e+00> : vector<36x32xf32>
      %99 = tpu.matmul %96, %98, %cst_68 {dimension_numbers = #tpu.dot_dimension_numbers<[1], [0], [0], [1], [0, 0, 1, 1], [], []>} : vector<36x16xf32>, vector<16x32xf32>, vector<36x32xf32> -> vector<36x32xf32>
      %100 = arith.addf %91, %99 : vector<36x32xf32>
      %101 = vector.extract_strided_slice %95 {offsets = [1, 0], sizes = [36, 16], strides = [1, 1]} : vector<38x16xf32> to vector<36x16xf32>
      %c4_69 = arith.constant 4 : index
      %c0_70 = arith.constant 0 : index
      %c0_71 = arith.constant 0 : index
      %102 = vector.load %arg2[%c4_69, %c0_70, %c0_71] : memref<9x16x32xf32, #tpu.memory_space<vmem>>, vector<1x16x32xf32>
      %103 = vector.shape_cast %102 : vector<1x16x32xf32> to vector<16x32xf32>
      %cst_72 = arith.constant dense<0.000000e+00> : vector<36x32xf32>
      %104 = tpu.matmul %101, %103, %cst_72 {dimension_numbers = #tpu.dot_dimension_numbers<[1], [0], [0], [1], [0, 0, 1, 1], [], []>} : vector<36x16xf32>, vector<16x32xf32>, vector<36x32xf32> -> vector<36x32xf32>
      %105 = arith.addf %100, %104 : vector<36x32xf32>
      %106 = vector.extract_strided_slice %95 {offsets = [2, 0], sizes = [36, 16], strides = [1, 1]} : vector<38x16xf32> to vector<36x16xf32>
      %c5_73 = arith.constant 5 : index
      %c0_74 = arith.constant 0 : index
      %c0_75 = arith.constant 0 : index
      %107 = vector.load %arg2[%c5_73, %c0_74, %c0_75] : memref<9x16x32xf32, #tpu.memory_space<vmem>>, vector<1x16x32xf32>
      %108 = vector.shape_cast %107 : vector<1x16x32xf32> to vector<16x32xf32>
      %cst_76 = arith.constant dense<0.000000e+00> : vector<36x32xf32>
      %109 = tpu.matmul %106, %108, %cst_76 {dimension_numbers = #tpu.dot_dimension_numbers<[1], [0], [0], [1], [0, 0, 1, 1], [], []>} : vector<36x16xf32>, vector<16x32xf32>, vector<36x32xf32> -> vector<36x32xf32>
      %110 = arith.addf %105, %109 : vector<36x32xf32>
      %c2_i32_77 = arith.constant 2 : i32
      %111 = arith.addi %73, %c2_i32_77 : i32
      %c0_78 = arith.constant 0 : index
      %112 = arith.index_cast %111 : i32 to index
      %c0_79 = arith.constant 0 : index
      %c0_80 = arith.constant 0 : index
      %113 = vector.load %arg1[%c0_78, %112, %c0_79, %c0_80] : memref<1x18x38x16xf32, #tpu.memory_space<vmem>>, vector<1x1x38x16xf32>
      %114 = vector.shape_cast %113 : vector<1x1x38x16xf32> to vector<38x16xf32>
      %115 = vector.extract_strided_slice %114 {offsets = [0, 0], sizes = [36, 16], strides = [1, 1]} : vector<38x16xf32> to vector<36x16xf32>
      %c6_81 = arith.constant 6 : index
      %c0_82 = arith.constant 0 : index
      %c0_83 = arith.constant 0 : index
      %116 = vector.load %arg2[%c6_81, %c0_82, %c0_83] : memref<9x16x32xf32, #tpu.memory_space<vmem>>, vector<1x16x32xf32>
      %117 = vector.shape_cast %116 : vector<1x16x32xf32> to vector<16x32xf32>
      %cst_84 = arith.constant dense<0.000000e+00> : vector<36x32xf32>
      %118 = tpu.matmul %115, %117, %cst_84 {dimension_numbers = #tpu.dot_dimension_numbers<[1], [0], [0], [1], [0, 0, 1, 1], [], []>} : vector<36x16xf32>, vector<16x32xf32>, vector<36x32xf32> -> vector<36x32xf32>
      %119 = arith.addf %110, %118 : vector<36x32xf32>
      %120 = vector.extract_strided_slice %114 {offsets = [1, 0], sizes = [36, 16], strides = [1, 1]} : vector<38x16xf32> to vector<36x16xf32>
      %c7_85 = arith.constant 7 : index
      %c0_86 = arith.constant 0 : index
      %c0_87 = arith.constant 0 : index
      %121 = vector.load %arg2[%c7_85, %c0_86, %c0_87] : memref<9x16x32xf32, #tpu.memory_space<vmem>>, vector<1x16x32xf32>
      %122 = vector.shape_cast %121 : vector<1x16x32xf32> to vector<16x32xf32>
      %cst_88 = arith.constant dense<0.000000e+00> : vector<36x32xf32>
      %123 = tpu.matmul %120, %122, %cst_88 {dimension_numbers = #tpu.dot_dimension_numbers<[1], [0], [0], [1], [0, 0, 1, 1], [], []>} : vector<36x16xf32>, vector<16x32xf32>, vector<36x32xf32> -> vector<36x32xf32>
      %124 = arith.addf %119, %123 : vector<36x32xf32>
      %125 = vector.extract_strided_slice %114 {offsets = [2, 0], sizes = [36, 16], strides = [1, 1]} : vector<38x16xf32> to vector<36x16xf32>
      %c8_89 = arith.constant 8 : index
      %c0_90 = arith.constant 0 : index
      %c0_91 = arith.constant 0 : index
      %126 = vector.load %arg2[%c8_89, %c0_90, %c0_91] : memref<9x16x32xf32, #tpu.memory_space<vmem>>, vector<1x16x32xf32>
      %127 = vector.shape_cast %126 : vector<1x16x32xf32> to vector<16x32xf32>
      %cst_92 = arith.constant dense<0.000000e+00> : vector<36x32xf32>
      %128 = tpu.matmul %125, %127, %cst_92 {dimension_numbers = #tpu.dot_dimension_numbers<[1], [0], [0], [1], [0, 0, 1, 1], [], []>} : vector<36x16xf32>, vector<16x32xf32>, vector<36x32xf32> -> vector<36x32xf32>
      %129 = arith.addf %124, %128 : vector<36x32xf32>
      %130 = arith.maximumf %72, %129 : vector<36x32xf32>
      %131 = vector.broadcast %14 : vector<1x32xf32> to vector<36x32xf32>
      %132 = arith.addf %130, %131 : vector<36x32xf32>
      %cst_93 = arith.constant 0.000000e+00 : f32
      %133 = vector.broadcast %cst_93 : f32 to vector<36x32xf32>
      %134 = arith.maximumf %132, %133 : vector<36x32xf32>
      %cst_94 = arith.constant dense<0.000000e+00> : vector<18x32xf32>
      %135 = tpu.matmul %6, %134, %cst_94 {dimension_numbers = #tpu.dot_dimension_numbers<[1], [0], [0], [1], [0, 0, 1, 1], [], []>} : vector<18x36xf32>, vector<36x32xf32>, vector<18x32xf32> -> vector<18x32xf32>
      %cst_95 = arith.constant dense<0.000000e+00> : vector<18x32xf32>
      %136 = tpu.matmul %13, %134, %cst_95 {dimension_numbers = #tpu.dot_dimension_numbers<[1], [0], [0], [1], [0, 0, 1, 1], [], []>} : vector<18x36xf32>, vector<36x32xf32>, vector<18x32xf32> -> vector<18x32xf32>
      %137 = arith.maximumf %135, %136 : vector<18x32xf32>
      %c0_96 = arith.constant 0 : index
      %138 = arith.index_cast %arg5 : i32 to index
      %c0_97 = arith.constant 0 : index
      %c0_98 = arith.constant 0 : index
      %139 = vector.load %arg4[%c0_96, %138, %c0_97, %c0_98] : memref<1x8x18x32xf32, #tpu.memory_space<vmem>>, vector<1x1x18x32xf32>
      %140 = vector.shape_cast %139 : vector<1x1x18x32xf32> to vector<18x32xf32>
      %141 = vector.shape_cast %137 : vector<18x32xf32> to vector<1x1x18x32xf32>
      tpu.vector_store %arg4[%c0_96, %138, %c0_97, %c0_98], %141 {strides = array<i32>} : memref<1x8x18x32xf32, #tpu.memory_space<vmem>>, vector<1x1x18x32xf32>,
    }
    %c8_i32_3 = arith.constant 8 : i32
    return
  }
  func.func @transform_0(%arg0: i32) -> (i32, i32, i32, i32) {
    %c0_i32 = arith.constant 0 : i32
    %c0_i32_0 = arith.constant 0 : i32
    %c0_i32_1 = arith.constant 0 : i32
    %c0_i32_2 = arith.constant 0 : i32
    return %arg0, %c0_i32, %c0_i32_0, %c0_i32_1 : i32, i32, i32, i32
  }
  func.func @transform_1(%arg0: i32) -> (i32, i32, i32) {
    %c0_i32 = arith.constant 0 : i32
    %c0_i32_0 = arith.constant 0 : i32
    %c0_i32_1 = arith.constant 0 : i32
    %c0_i32_2 = arith.constant 0 : i32
    return %c0_i32, %c0_i32_0, %c0_i32_1 : i32, i32, i32
  }
  func.func @transform_2(%arg0: i32) -> (i32, i32) {
    %c0_i32 = arith.constant 0 : i32
    %c0_i32_0 = arith.constant 0 : i32
    %c0_i32_1 = arith.constant 0 : i32
    return %c0_i32, %c0_i32_0 : i32, i32
  }
  func.func @transform_3(%arg0: i32) -> (i32, i32, i32, i32) {
    %c0_i32 = arith.constant 0 : i32
    %c0_i32_0 = arith.constant 0 : i32
    %c0_i32_1 = arith.constant 0 : i32
    %c0_i32_2 = arith.constant 0 : i32
    return %arg0, %c0_i32, %c0_i32_0, %c0_i32_1 : i32, i32, i32, i32
  }
}

module attributes {stable_mosaic.version = 11 : i64} {
  func.func @_conv3x3_relu_pool_kernel(%arg0: i32, %arg1: memref<1x8x18x32xf32, #tpu.memory_space<vmem>>, %arg2: memref<9x32x16xf32, #tpu.memory_space<vmem>>, %arg3: memref<1x16xf32, #tpu.memory_space<vmem>>, %arg4: memref<1x3x8x16xf32, #tpu.memory_space<vmem>>) attributes {dimension_semantics = [#tpu.dimension_semantics<parallel>], iteration_bounds = array<i64: 2>, scalar_prefetch = 0 : i64, scratch_operands = 0 : i64, tpu.core_type = #tpu.core_type<tc>, window_params = [{transform_indices = @transform_0, window_bounds = array<i64: 1, 8, 18, 32>}, {pipeline_mode = #tpu.pipeline_mode<synchronous>, transform_indices = @transform_1, window_bounds = array<i64: 9, 32, 16>}, {pipeline_mode = #tpu.pipeline_mode<synchronous>, transform_indices = @transform_2, window_bounds = array<i64: 1, 16>}, {transform_indices = @transform_3, window_bounds = array<i64: 1, 3, 8, 16>}]} {
    %0 = tpu.iota {dimensions = array<i32: 0>} : vector<8x16xi32>
    %1 = tpu.iota {dimensions = array<i32: 1>} : vector<8x16xi32>
    %c2_i32 = arith.constant 2 : i32
    %2 = vector.broadcast %c2_i32 : i32 to vector<8x16xi32>
    %3 = arith.muli %2, %0 : vector<8x16xi32>
    %4 = arith.cmpi eq, %1, %3 : vector<8x16xi32>
    %5 = arith.extui %4 : vector<8x16xi1> to vector<8x16xi32>
    %6 = arith.sitofp %5 : vector<8x16xi32> to vector<8x16xf32>
    %c2_i32_0 = arith.constant 2 : i32
    %7 = vector.broadcast %c2_i32_0 : i32 to vector<8x16xi32>
    %8 = arith.muli %7, %0 : vector<8x16xi32>
    %c1_i32 = arith.constant 1 : i32
    %9 = vector.broadcast %c1_i32 : i32 to vector<8x16xi32>
    %10 = arith.addi %8, %9 : vector<8x16xi32>
    %11 = arith.cmpi eq, %1, %10 : vector<8x16xi32>
    %12 = arith.extui %11 : vector<8x16xi1> to vector<8x16xi32>
    %13 = arith.sitofp %12 : vector<8x16xi32> to vector<8x16xf32>
    %c0 = arith.constant 0 : index
    %c0_1 = arith.constant 0 : index
    %14 = vector.load %arg3[%c0, %c0_1] : memref<1x16xf32, #tpu.memory_space<vmem>>, vector<1x16xf32>
    %c0_i32 = arith.constant 0 : i32
    %c3_i32 = arith.constant 3 : i32
    %15 = arith.addi %c0_i32, %c3_i32 : i32
    %c1_i32_2 = arith.constant 1 : i32
    scf.for %arg5 = %c0_i32 to %15 step %c1_i32_2  : i32 {
      %c2_i32_4 = arith.constant 2 : i32
      %16 = arith.muli %c2_i32_4, %arg5 : i32
      %c0_i32_5 = arith.constant 0 : i32
      %17 = arith.addi %16, %c0_i32_5 : i32
      %c0_6 = arith.constant 0 : index
      %18 = arith.index_cast %17 : i32 to index
      %c0_7 = arith.constant 0 : index
      %c0_8 = arith.constant 0 : index
      %19 = vector.load %arg1[%c0_6, %18, %c0_7, %c0_8] : memref<1x8x18x32xf32, #tpu.memory_space<vmem>>, vector<1x1x18x32xf32>
      %20 = vector.shape_cast %19 : vector<1x1x18x32xf32> to vector<18x32xf32>
      %21 = vector.extract_strided_slice %20 {offsets = [0, 0], sizes = [16, 32], strides = [1, 1]} : vector<18x32xf32> to vector<16x32xf32>
      %c0_9 = arith.constant 0 : index
      %c0_10 = arith.constant 0 : index
      %c0_11 = arith.constant 0 : index
      %22 = vector.load %arg2[%c0_9, %c0_10, %c0_11] : memref<9x32x16xf32, #tpu.memory_space<vmem>>, vector<1x32x16xf32>
      %23 = vector.shape_cast %22 : vector<1x32x16xf32> to vector<32x16xf32>
      %cst = arith.constant dense<0.000000e+00> : vector<16x16xf32>
      %24 = tpu.matmul %21, %23, %cst {dimension_numbers = #tpu.dot_dimension_numbers<[1], [0], [0], [1], [0, 0, 1, 1], [], []>} : vector<16x32xf32>, vector<32x16xf32>, vector<16x16xf32> -> vector<16x16xf32>
      %25 = vector.extract_strided_slice %20 {offsets = [1, 0], sizes = [16, 32], strides = [1, 1]} : vector<18x32xf32> to vector<16x32xf32>
      %c1 = arith.constant 1 : index
      %c0_12 = arith.constant 0 : index
      %c0_13 = arith.constant 0 : index
      %26 = vector.load %arg2[%c1, %c0_12, %c0_13] : memref<9x32x16xf32, #tpu.memory_space<vmem>>, vector<1x32x16xf32>
      %27 = vector.shape_cast %26 : vector<1x32x16xf32> to vector<32x16xf32>
      %cst_14 = arith.constant dense<0.000000e+00> : vector<16x16xf32>
      %28 = tpu.matmul %25, %27, %cst_14 {dimension_numbers = #tpu.dot_dimension_numbers<[1], [0], [0], [1], [0, 0, 1, 1], [], []>} : vector<16x32xf32>, vector<32x16xf32>, vector<16x16xf32> -> vector<16x16xf32>
      %29 = arith.addf %24, %28 : vector<16x16xf32>
      %30 = vector.extract_strided_slice %20 {offsets = [2, 0], sizes = [16, 32], strides = [1, 1]} : vector<18x32xf32> to vector<16x32xf32>
      %c2 = arith.constant 2 : index
      %c0_15 = arith.constant 0 : index
      %c0_16 = arith.constant 0 : index
      %31 = vector.load %arg2[%c2, %c0_15, %c0_16] : memref<9x32x16xf32, #tpu.memory_space<vmem>>, vector<1x32x16xf32>
      %32 = vector.shape_cast %31 : vector<1x32x16xf32> to vector<32x16xf32>
      %cst_17 = arith.constant dense<0.000000e+00> : vector<16x16xf32>
      %33 = tpu.matmul %30, %32, %cst_17 {dimension_numbers = #tpu.dot_dimension_numbers<[1], [0], [0], [1], [0, 0, 1, 1], [], []>} : vector<16x32xf32>, vector<32x16xf32>, vector<16x16xf32> -> vector<16x16xf32>
      %34 = arith.addf %29, %33 : vector<16x16xf32>
      %c1_i32_18 = arith.constant 1 : i32
      %35 = arith.addi %16, %c1_i32_18 : i32
      %c0_19 = arith.constant 0 : index
      %36 = arith.index_cast %35 : i32 to index
      %c0_20 = arith.constant 0 : index
      %c0_21 = arith.constant 0 : index
      %37 = vector.load %arg1[%c0_19, %36, %c0_20, %c0_21] : memref<1x8x18x32xf32, #tpu.memory_space<vmem>>, vector<1x1x18x32xf32>
      %38 = vector.shape_cast %37 : vector<1x1x18x32xf32> to vector<18x32xf32>
      %39 = vector.extract_strided_slice %38 {offsets = [0, 0], sizes = [16, 32], strides = [1, 1]} : vector<18x32xf32> to vector<16x32xf32>
      %c3 = arith.constant 3 : index
      %c0_22 = arith.constant 0 : index
      %c0_23 = arith.constant 0 : index
      %40 = vector.load %arg2[%c3, %c0_22, %c0_23] : memref<9x32x16xf32, #tpu.memory_space<vmem>>, vector<1x32x16xf32>
      %41 = vector.shape_cast %40 : vector<1x32x16xf32> to vector<32x16xf32>
      %cst_24 = arith.constant dense<0.000000e+00> : vector<16x16xf32>
      %42 = tpu.matmul %39, %41, %cst_24 {dimension_numbers = #tpu.dot_dimension_numbers<[1], [0], [0], [1], [0, 0, 1, 1], [], []>} : vector<16x32xf32>, vector<32x16xf32>, vector<16x16xf32> -> vector<16x16xf32>
      %43 = arith.addf %34, %42 : vector<16x16xf32>
      %44 = vector.extract_strided_slice %38 {offsets = [1, 0], sizes = [16, 32], strides = [1, 1]} : vector<18x32xf32> to vector<16x32xf32>
      %c4 = arith.constant 4 : index
      %c0_25 = arith.constant 0 : index
      %c0_26 = arith.constant 0 : index
      %45 = vector.load %arg2[%c4, %c0_25, %c0_26] : memref<9x32x16xf32, #tpu.memory_space<vmem>>, vector<1x32x16xf32>
      %46 = vector.shape_cast %45 : vector<1x32x16xf32> to vector<32x16xf32>
      %cst_27 = arith.constant dense<0.000000e+00> : vector<16x16xf32>
      %47 = tpu.matmul %44, %46, %cst_27 {dimension_numbers = #tpu.dot_dimension_numbers<[1], [0], [0], [1], [0, 0, 1, 1], [], []>} : vector<16x32xf32>, vector<32x16xf32>, vector<16x16xf32> -> vector<16x16xf32>
      %48 = arith.addf %43, %47 : vector<16x16xf32>
      %49 = vector.extract_strided_slice %38 {offsets = [2, 0], sizes = [16, 32], strides = [1, 1]} : vector<18x32xf32> to vector<16x32xf32>
      %c5 = arith.constant 5 : index
      %c0_28 = arith.constant 0 : index
      %c0_29 = arith.constant 0 : index
      %50 = vector.load %arg2[%c5, %c0_28, %c0_29] : memref<9x32x16xf32, #tpu.memory_space<vmem>>, vector<1x32x16xf32>
      %51 = vector.shape_cast %50 : vector<1x32x16xf32> to vector<32x16xf32>
      %cst_30 = arith.constant dense<0.000000e+00> : vector<16x16xf32>
      %52 = tpu.matmul %49, %51, %cst_30 {dimension_numbers = #tpu.dot_dimension_numbers<[1], [0], [0], [1], [0, 0, 1, 1], [], []>} : vector<16x32xf32>, vector<32x16xf32>, vector<16x16xf32> -> vector<16x16xf32>
      %53 = arith.addf %48, %52 : vector<16x16xf32>
      %c2_i32_31 = arith.constant 2 : i32
      %54 = arith.addi %16, %c2_i32_31 : i32
      %c0_32 = arith.constant 0 : index
      %55 = arith.index_cast %54 : i32 to index
      %c0_33 = arith.constant 0 : index
      %c0_34 = arith.constant 0 : index
      %56 = vector.load %arg1[%c0_32, %55, %c0_33, %c0_34] : memref<1x8x18x32xf32, #tpu.memory_space<vmem>>, vector<1x1x18x32xf32>
      %57 = vector.shape_cast %56 : vector<1x1x18x32xf32> to vector<18x32xf32>
      %58 = vector.extract_strided_slice %57 {offsets = [0, 0], sizes = [16, 32], strides = [1, 1]} : vector<18x32xf32> to vector<16x32xf32>
      %c6 = arith.constant 6 : index
      %c0_35 = arith.constant 0 : index
      %c0_36 = arith.constant 0 : index
      %59 = vector.load %arg2[%c6, %c0_35, %c0_36] : memref<9x32x16xf32, #tpu.memory_space<vmem>>, vector<1x32x16xf32>
      %60 = vector.shape_cast %59 : vector<1x32x16xf32> to vector<32x16xf32>
      %cst_37 = arith.constant dense<0.000000e+00> : vector<16x16xf32>
      %61 = tpu.matmul %58, %60, %cst_37 {dimension_numbers = #tpu.dot_dimension_numbers<[1], [0], [0], [1], [0, 0, 1, 1], [], []>} : vector<16x32xf32>, vector<32x16xf32>, vector<16x16xf32> -> vector<16x16xf32>
      %62 = arith.addf %53, %61 : vector<16x16xf32>
      %63 = vector.extract_strided_slice %57 {offsets = [1, 0], sizes = [16, 32], strides = [1, 1]} : vector<18x32xf32> to vector<16x32xf32>
      %c7 = arith.constant 7 : index
      %c0_38 = arith.constant 0 : index
      %c0_39 = arith.constant 0 : index
      %64 = vector.load %arg2[%c7, %c0_38, %c0_39] : memref<9x32x16xf32, #tpu.memory_space<vmem>>, vector<1x32x16xf32>
      %65 = vector.shape_cast %64 : vector<1x32x16xf32> to vector<32x16xf32>
      %cst_40 = arith.constant dense<0.000000e+00> : vector<16x16xf32>
      %66 = tpu.matmul %63, %65, %cst_40 {dimension_numbers = #tpu.dot_dimension_numbers<[1], [0], [0], [1], [0, 0, 1, 1], [], []>} : vector<16x32xf32>, vector<32x16xf32>, vector<16x16xf32> -> vector<16x16xf32>
      %67 = arith.addf %62, %66 : vector<16x16xf32>
      %68 = vector.extract_strided_slice %57 {offsets = [2, 0], sizes = [16, 32], strides = [1, 1]} : vector<18x32xf32> to vector<16x32xf32>
      %c8 = arith.constant 8 : index
      %c0_41 = arith.constant 0 : index
      %c0_42 = arith.constant 0 : index
      %69 = vector.load %arg2[%c8, %c0_41, %c0_42] : memref<9x32x16xf32, #tpu.memory_space<vmem>>, vector<1x32x16xf32>
      %70 = vector.shape_cast %69 : vector<1x32x16xf32> to vector<32x16xf32>
      %cst_43 = arith.constant dense<0.000000e+00> : vector<16x16xf32>
      %71 = tpu.matmul %68, %70, %cst_43 {dimension_numbers = #tpu.dot_dimension_numbers<[1], [0], [0], [1], [0, 0, 1, 1], [], []>} : vector<16x32xf32>, vector<32x16xf32>, vector<16x16xf32> -> vector<16x16xf32>
      %72 = arith.addf %67, %71 : vector<16x16xf32>
      %c1_i32_44 = arith.constant 1 : i32
      %73 = arith.addi %16, %c1_i32_44 : i32
      %c0_i32_45 = arith.constant 0 : i32
      %74 = arith.addi %73, %c0_i32_45 : i32
      %c0_46 = arith.constant 0 : index
      %75 = arith.index_cast %74 : i32 to index
      %c0_47 = arith.constant 0 : index
      %c0_48 = arith.constant 0 : index
      %76 = vector.load %arg1[%c0_46, %75, %c0_47, %c0_48] : memref<1x8x18x32xf32, #tpu.memory_space<vmem>>, vector<1x1x18x32xf32>
      %77 = vector.shape_cast %76 : vector<1x1x18x32xf32> to vector<18x32xf32>
      %78 = vector.extract_strided_slice %77 {offsets = [0, 0], sizes = [16, 32], strides = [1, 1]} : vector<18x32xf32> to vector<16x32xf32>
      %c0_49 = arith.constant 0 : index
      %c0_50 = arith.constant 0 : index
      %c0_51 = arith.constant 0 : index
      %79 = vector.load %arg2[%c0_49, %c0_50, %c0_51] : memref<9x32x16xf32, #tpu.memory_space<vmem>>, vector<1x32x16xf32>
      %80 = vector.shape_cast %79 : vector<1x32x16xf32> to vector<32x16xf32>
      %cst_52 = arith.constant dense<0.000000e+00> : vector<16x16xf32>
      %81 = tpu.matmul %78, %80, %cst_52 {dimension_numbers = #tpu.dot_dimension_numbers<[1], [0], [0], [1], [0, 0, 1, 1], [], []>} : vector<16x32xf32>, vector<32x16xf32>, vector<16x16xf32> -> vector<16x16xf32>
      %82 = vector.extract_strided_slice %77 {offsets = [1, 0], sizes = [16, 32], strides = [1, 1]} : vector<18x32xf32> to vector<16x32xf32>
      %c1_53 = arith.constant 1 : index
      %c0_54 = arith.constant 0 : index
      %c0_55 = arith.constant 0 : index
      %83 = vector.load %arg2[%c1_53, %c0_54, %c0_55] : memref<9x32x16xf32, #tpu.memory_space<vmem>>, vector<1x32x16xf32>
      %84 = vector.shape_cast %83 : vector<1x32x16xf32> to vector<32x16xf32>
      %cst_56 = arith.constant dense<0.000000e+00> : vector<16x16xf32>
      %85 = tpu.matmul %82, %84, %cst_56 {dimension_numbers = #tpu.dot_dimension_numbers<[1], [0], [0], [1], [0, 0, 1, 1], [], []>} : vector<16x32xf32>, vector<32x16xf32>, vector<16x16xf32> -> vector<16x16xf32>
      %86 = arith.addf %81, %85 : vector<16x16xf32>
      %87 = vector.extract_strided_slice %77 {offsets = [2, 0], sizes = [16, 32], strides = [1, 1]} : vector<18x32xf32> to vector<16x32xf32>
      %c2_57 = arith.constant 2 : index
      %c0_58 = arith.constant 0 : index
      %c0_59 = arith.constant 0 : index
      %88 = vector.load %arg2[%c2_57, %c0_58, %c0_59] : memref<9x32x16xf32, #tpu.memory_space<vmem>>, vector<1x32x16xf32>
      %89 = vector.shape_cast %88 : vector<1x32x16xf32> to vector<32x16xf32>
      %cst_60 = arith.constant dense<0.000000e+00> : vector<16x16xf32>
      %90 = tpu.matmul %87, %89, %cst_60 {dimension_numbers = #tpu.dot_dimension_numbers<[1], [0], [0], [1], [0, 0, 1, 1], [], []>} : vector<16x32xf32>, vector<32x16xf32>, vector<16x16xf32> -> vector<16x16xf32>
      %91 = arith.addf %86, %90 : vector<16x16xf32>
      %c1_i32_61 = arith.constant 1 : i32
      %92 = arith.addi %73, %c1_i32_61 : i32
      %c0_62 = arith.constant 0 : index
      %93 = arith.index_cast %92 : i32 to index
      %c0_63 = arith.constant 0 : index
      %c0_64 = arith.constant 0 : index
      %94 = vector.load %arg1[%c0_62, %93, %c0_63, %c0_64] : memref<1x8x18x32xf32, #tpu.memory_space<vmem>>, vector<1x1x18x32xf32>
      %95 = vector.shape_cast %94 : vector<1x1x18x32xf32> to vector<18x32xf32>
      %96 = vector.extract_strided_slice %95 {offsets = [0, 0], sizes = [16, 32], strides = [1, 1]} : vector<18x32xf32> to vector<16x32xf32>
      %c3_65 = arith.constant 3 : index
      %c0_66 = arith.constant 0 : index
      %c0_67 = arith.constant 0 : index
      %97 = vector.load %arg2[%c3_65, %c0_66, %c0_67] : memref<9x32x16xf32, #tpu.memory_space<vmem>>, vector<1x32x16xf32>
      %98 = vector.shape_cast %97 : vector<1x32x16xf32> to vector<32x16xf32>
      %cst_68 = arith.constant dense<0.000000e+00> : vector<16x16xf32>
      %99 = tpu.matmul %96, %98, %cst_68 {dimension_numbers = #tpu.dot_dimension_numbers<[1], [0], [0], [1], [0, 0, 1, 1], [], []>} : vector<16x32xf32>, vector<32x16xf32>, vector<16x16xf32> -> vector<16x16xf32>
      %100 = arith.addf %91, %99 : vector<16x16xf32>
      %101 = vector.extract_strided_slice %95 {offsets = [1, 0], sizes = [16, 32], strides = [1, 1]} : vector<18x32xf32> to vector<16x32xf32>
      %c4_69 = arith.constant 4 : index
      %c0_70 = arith.constant 0 : index
      %c0_71 = arith.constant 0 : index
      %102 = vector.load %arg2[%c4_69, %c0_70, %c0_71] : memref<9x32x16xf32, #tpu.memory_space<vmem>>, vector<1x32x16xf32>
      %103 = vector.shape_cast %102 : vector<1x32x16xf32> to vector<32x16xf32>
      %cst_72 = arith.constant dense<0.000000e+00> : vector<16x16xf32>
      %104 = tpu.matmul %101, %103, %cst_72 {dimension_numbers = #tpu.dot_dimension_numbers<[1], [0], [0], [1], [0, 0, 1, 1], [], []>} : vector<16x32xf32>, vector<32x16xf32>, vector<16x16xf32> -> vector<16x16xf32>
      %105 = arith.addf %100, %104 : vector<16x16xf32>
      %106 = vector.extract_strided_slice %95 {offsets = [2, 0], sizes = [16, 32], strides = [1, 1]} : vector<18x32xf32> to vector<16x32xf32>
      %c5_73 = arith.constant 5 : index
      %c0_74 = arith.constant 0 : index
      %c0_75 = arith.constant 0 : index
      %107 = vector.load %arg2[%c5_73, %c0_74, %c0_75] : memref<9x32x16xf32, #tpu.memory_space<vmem>>, vector<1x32x16xf32>
      %108 = vector.shape_cast %107 : vector<1x32x16xf32> to vector<32x16xf32>
      %cst_76 = arith.constant dense<0.000000e+00> : vector<16x16xf32>
      %109 = tpu.matmul %106, %108, %cst_76 {dimension_numbers = #tpu.dot_dimension_numbers<[1], [0], [0], [1], [0, 0, 1, 1], [], []>} : vector<16x32xf32>, vector<32x16xf32>, vector<16x16xf32> -> vector<16x16xf32>
      %110 = arith.addf %105, %109 : vector<16x16xf32>
      %c2_i32_77 = arith.constant 2 : i32
      %111 = arith.addi %73, %c2_i32_77 : i32
      %c0_78 = arith.constant 0 : index
      %112 = arith.index_cast %111 : i32 to index
      %c0_79 = arith.constant 0 : index
      %c0_80 = arith.constant 0 : index
      %113 = vector.load %arg1[%c0_78, %112, %c0_79, %c0_80] : memref<1x8x18x32xf32, #tpu.memory_space<vmem>>, vector<1x1x18x32xf32>
      %114 = vector.shape_cast %113 : vector<1x1x18x32xf32> to vector<18x32xf32>
      %115 = vector.extract_strided_slice %114 {offsets = [0, 0], sizes = [16, 32], strides = [1, 1]} : vector<18x32xf32> to vector<16x32xf32>
      %c6_81 = arith.constant 6 : index
      %c0_82 = arith.constant 0 : index
      %c0_83 = arith.constant 0 : index
      %116 = vector.load %arg2[%c6_81, %c0_82, %c0_83] : memref<9x32x16xf32, #tpu.memory_space<vmem>>, vector<1x32x16xf32>
      %117 = vector.shape_cast %116 : vector<1x32x16xf32> to vector<32x16xf32>
      %cst_84 = arith.constant dense<0.000000e+00> : vector<16x16xf32>
      %118 = tpu.matmul %115, %117, %cst_84 {dimension_numbers = #tpu.dot_dimension_numbers<[1], [0], [0], [1], [0, 0, 1, 1], [], []>} : vector<16x32xf32>, vector<32x16xf32>, vector<16x16xf32> -> vector<16x16xf32>
      %119 = arith.addf %110, %118 : vector<16x16xf32>
      %120 = vector.extract_strided_slice %114 {offsets = [1, 0], sizes = [16, 32], strides = [1, 1]} : vector<18x32xf32> to vector<16x32xf32>
      %c7_85 = arith.constant 7 : index
      %c0_86 = arith.constant 0 : index
      %c0_87 = arith.constant 0 : index
      %121 = vector.load %arg2[%c7_85, %c0_86, %c0_87] : memref<9x32x16xf32, #tpu.memory_space<vmem>>, vector<1x32x16xf32>
      %122 = vector.shape_cast %121 : vector<1x32x16xf32> to vector<32x16xf32>
      %cst_88 = arith.constant dense<0.000000e+00> : vector<16x16xf32>
      %123 = tpu.matmul %120, %122, %cst_88 {dimension_numbers = #tpu.dot_dimension_numbers<[1], [0], [0], [1], [0, 0, 1, 1], [], []>} : vector<16x32xf32>, vector<32x16xf32>, vector<16x16xf32> -> vector<16x16xf32>
      %124 = arith.addf %119, %123 : vector<16x16xf32>
      %125 = vector.extract_strided_slice %114 {offsets = [2, 0], sizes = [16, 32], strides = [1, 1]} : vector<18x32xf32> to vector<16x32xf32>
      %c8_89 = arith.constant 8 : index
      %c0_90 = arith.constant 0 : index
      %c0_91 = arith.constant 0 : index
      %126 = vector.load %arg2[%c8_89, %c0_90, %c0_91] : memref<9x32x16xf32, #tpu.memory_space<vmem>>, vector<1x32x16xf32>
      %127 = vector.shape_cast %126 : vector<1x32x16xf32> to vector<32x16xf32>
      %cst_92 = arith.constant dense<0.000000e+00> : vector<16x16xf32>
      %128 = tpu.matmul %125, %127, %cst_92 {dimension_numbers = #tpu.dot_dimension_numbers<[1], [0], [0], [1], [0, 0, 1, 1], [], []>} : vector<16x32xf32>, vector<32x16xf32>, vector<16x16xf32> -> vector<16x16xf32>
      %129 = arith.addf %124, %128 : vector<16x16xf32>
      %130 = arith.maximumf %72, %129 : vector<16x16xf32>
      %131 = vector.broadcast %14 : vector<1x16xf32> to vector<16x16xf32>
      %132 = arith.addf %130, %131 : vector<16x16xf32>
      %cst_93 = arith.constant 0.000000e+00 : f32
      %133 = vector.broadcast %cst_93 : f32 to vector<16x16xf32>
      %134 = arith.maximumf %132, %133 : vector<16x16xf32>
      %cst_94 = arith.constant dense<0.000000e+00> : vector<8x16xf32>
      %135 = tpu.matmul %6, %134, %cst_94 {dimension_numbers = #tpu.dot_dimension_numbers<[1], [0], [0], [1], [0, 0, 1, 1], [], []>} : vector<8x16xf32>, vector<16x16xf32>, vector<8x16xf32> -> vector<8x16xf32>
      %cst_95 = arith.constant dense<0.000000e+00> : vector<8x16xf32>
      %136 = tpu.matmul %13, %134, %cst_95 {dimension_numbers = #tpu.dot_dimension_numbers<[1], [0], [0], [1], [0, 0, 1, 1], [], []>} : vector<8x16xf32>, vector<16x16xf32>, vector<8x16xf32> -> vector<8x16xf32>
      %137 = arith.maximumf %135, %136 : vector<8x16xf32>
      %c0_96 = arith.constant 0 : index
      %138 = arith.index_cast %arg5 : i32 to index
      %c0_97 = arith.constant 0 : index
      %c0_98 = arith.constant 0 : index
      %139 = vector.load %arg4[%c0_96, %138, %c0_97, %c0_98] : memref<1x3x8x16xf32, #tpu.memory_space<vmem>>, vector<1x1x8x16xf32>
      %140 = vector.shape_cast %139 : vector<1x1x8x16xf32> to vector<8x16xf32>
      %141 = vector.shape_cast %137 : vector<8x16xf32> to vector<1x1x8x16xf32>
      tpu.vector_store %arg4[%c0_96, %138, %c0_97, %c0_98], %141 {strides = array<i32>} : memref<1x3x8x16xf32, #tpu.memory_space<vmem>>, vector<1x1x8x16xf32>,
    }
    %c3_i32_3 = arith.constant 3 : i32
    return
  }
  func.func @transform_0(%arg0: i32) -> (i32, i32, i32, i32) {
    %c0_i32 = arith.constant 0 : i32
    %c0_i32_0 = arith.constant 0 : i32
    %c0_i32_1 = arith.constant 0 : i32
    %c0_i32_2 = arith.constant 0 : i32
    return %arg0, %c0_i32, %c0_i32_0, %c0_i32_1 : i32, i32, i32, i32
  }
  func.func @transform_1(%arg0: i32) -> (i32, i32, i32) {
    %c0_i32 = arith.constant 0 : i32
    %c0_i32_0 = arith.constant 0 : i32
    %c0_i32_1 = arith.constant 0 : i32
    %c0_i32_2 = arith.constant 0 : i32
    return %c0_i32, %c0_i32_0, %c0_i32_1 : i32, i32, i32
  }
  func.func @transform_2(%arg0: i32) -> (i32, i32) {
    %c0_i32 = arith.constant 0 : i32
    %c0_i32_0 = arith.constant 0 : i32
    %c0_i32_1 = arith.constant 0 : i32
    return %c0_i32, %c0_i32_0 : i32, i32
  }
  func.func @transform_3(%arg0: i32) -> (i32, i32, i32, i32) {
    %c0_i32 = arith.constant 0 : i32
    %c0_i32_0 = arith.constant 0 : i32
    %c0_i32_1 = arith.constant 0 : i32
    %c0_i32_2 = arith.constant 0 : i32
    return %arg0, %c0_i32, %c0_i32_0, %c0_i32_1 : i32, i32, i32, i32
  }
}

module attributes {stable_mosaic.version = 11 : i64} {
  func.func @_classifier_kernel(%arg0: memref<2x384xf32, #tpu.memory_space<vmem>>, %arg1: memref<384x128xf32, #tpu.memory_space<vmem>>, %arg2: memref<1x128xf32, #tpu.memory_space<vmem>>, %arg3: memref<128x2xf32, #tpu.memory_space<vmem>>, %arg4: memref<1x2xf32, #tpu.memory_space<vmem>>, %arg5: memref<2x2xf32, #tpu.memory_space<vmem>>) attributes {dimension_semantics = [], scalar_prefetch = 0 : i64, scratch_operands = 0 : i64, tpu.core_type = #tpu.core_type<tc>} {
    %c0 = arith.constant 0 : index
    %c0_0 = arith.constant 0 : index
    %0 = vector.load %arg0[%c0, %c0_0] : memref<2x384xf32, #tpu.memory_space<vmem>>, vector<2x384xf32>
    %c0_1 = arith.constant 0 : index
    %c0_2 = arith.constant 0 : index
    %1 = vector.load %arg1[%c0_1, %c0_2] : memref<384x128xf32, #tpu.memory_space<vmem>>, vector<384x128xf32>
    %cst = arith.constant dense<0.000000e+00> : vector<2x128xf32>
    %2 = tpu.matmul %0, %1, %cst {dimension_numbers = #tpu.dot_dimension_numbers<[1], [0], [0], [1], [0, 0, 1, 1], [], []>} : vector<2x384xf32>, vector<384x128xf32>, vector<2x128xf32> -> vector<2x128xf32>
    %c0_3 = arith.constant 0 : index
    %c0_4 = arith.constant 0 : index
    %3 = vector.load %arg2[%c0_3, %c0_4] : memref<1x128xf32, #tpu.memory_space<vmem>>, vector<1x128xf32>
    %4 = vector.broadcast %3 : vector<1x128xf32> to vector<2x128xf32>
    %5 = arith.addf %2, %4 : vector<2x128xf32>
    %cst_5 = arith.constant 0.000000e+00 : f32
    %6 = vector.broadcast %cst_5 : f32 to vector<2x128xf32>
    %7 = arith.maximumf %5, %6 : vector<2x128xf32>
    %c0_6 = arith.constant 0 : index
    %c0_7 = arith.constant 0 : index
    %8 = vector.load %arg3[%c0_6, %c0_7] : memref<128x2xf32, #tpu.memory_space<vmem>>, vector<128x2xf32>
    %cst_8 = arith.constant dense<0.000000e+00> : vector<2x2xf32>
    %9 = tpu.matmul %7, %8, %cst_8 {dimension_numbers = #tpu.dot_dimension_numbers<[1], [0], [0], [1], [0, 0, 1, 1], [], []>} : vector<2x128xf32>, vector<128x2xf32>, vector<2x2xf32> -> vector<2x2xf32>
    %c0_9 = arith.constant 0 : index
    %c0_10 = arith.constant 0 : index
    %10 = vector.load %arg4[%c0_9, %c0_10] : memref<1x2xf32, #tpu.memory_space<vmem>>, vector<1x2xf32>
    %11 = vector.broadcast %10 : vector<1x2xf32> to vector<2x2xf32>
    %12 = arith.addf %9, %11 : vector<2x2xf32>
    %cst_11 = arith.constant 0.000000e+00 : f32
    %13 = vector.broadcast %cst_11 : f32 to vector<2x2xf32>
    %14 = arith.subf %13, %12 : vector<2x2xf32>
    %15 = math.exp %14 : vector<2x2xf32>
    %cst_12 = arith.constant 1.000000e+00 : f32
    %16 = vector.broadcast %cst_12 : f32 to vector<2x2xf32>
    %17 = arith.addf %16, %15 : vector<2x2xf32>
    %cst_13 = arith.constant 1.000000e+00 : f32
    %18 = vector.broadcast %cst_13 : f32 to vector<2x2xf32>
    %19 = arith.divf %18, %17 : vector<2x2xf32>
    %c0_14 = arith.constant 0 : index
    %c0_15 = arith.constant 0 : index
    %20 = vector.load %arg5[%c0_14, %c0_15] : memref<2x2xf32, #tpu.memory_space<vmem>>, vector<2x2xf32>
    tpu.vector_store %arg5[%c0_14, %c0_15], %19 {strides = array<i32>} : memref<2x2xf32, #tpu.memory_space<vmem>>, vector<2x2xf32>,
    return
  }
}

</mosaic_0001>

<bundles_post_ra>
// kernel: cnn_symbol_grounder.5
= control target key start
LH: loop header
LB: loop body
LE: loop exit
PB: predicated region body
PF: predicated region fallthrough
CT: control target
= control target key end

     0   :  { %s3424_s12 = smov 0   ;;  %s4129_s0 = inlined_call_operand.vmem [shape: f32[2,18,38,16], index: 0, kind: input, shape index: {}]   ;;  %s4130_s1 = inlined_call_operand.vmem [shape: f32[9,16,32], index: 1, kind: input, shape index: {}]   ;;  %s4131_s2 = inlined_call_operand.vmem [shape: f32[1,32], index: 2, kind: input, shape index: {}]   ;;  %s4132_s3 = inlined_call_operand.vmem [shape: f32[2,8,18,32], index: 3, kind: output, shape index: {}]  }
   0x1 LB: > { %s2461_s13 = sadd.s32 4294967295, %s3394_s12   ;;  %p2465_p0 = scmp.ge.s32.totalorder %s3394_s12, 1  ;;  %s3394_s12 = sphi %s3424_s12, %s13_s12  }
   0x2   : > { %p137_p1 = scmp.lt.s32.totalorder %s3394_s12, 3 }
   0x4   : > { %p138_p2 = pnand %p2465_p0, %p137_p1 }
   0x5   : > { %p161_p3 = scmp.lt.s32.totalorder (!%p138_p2), %s2461_s13, 1  ;;  %v171_v0 = vlaneseq (!%p138_p2)  ;;  %v3435_v1 = vld [vmem:[%s4131_s2] ss:$0 sm:$0xff] (!%p138_p2)  ;;  %v3400_v10 = vmov (!%p138_p2), 0.0   ;;  %s3459_s24 = smov (!%p138_p2), 0  }
   0x6   : > { %141 = sbr.rel (%p138_p2) target bundleno = 646 (0x286), region = 32 }
   0x7   : > { %v172_v2 = vshrl.u32 (!%p138_p2), %v171_v0, 7  ;;  %v176_v3 = vand.u32 (!%p138_p2), 127, %v171_v0 }
   0x9   : > { %v173_v4 = vadd.s32 (!%p138_p2), 8, %v172_v2  ;;  %v174_v5 = vadd.s32 (!%p138_p2), 16, %v172_v2  ;;  %v177_v6 = vmul.u32 (!%p138_p2), 2, %v172_v2 }
   0xb   : > { %v178_v7 = vmul.u32 (!%p138_p2), 2, %v173_v4  ;;  %v179_v8 = vmul.u32 (!%p138_p2), 2, %v174_v5  ;;  %vm180_vm0 = vcmp.eq.s32.totalorder (!%p138_p2), %v176_v3, %v177_v6  ;;  %v189_v9 = vadd.s32 (!%p138_p2), 1, %v177_v6 }
   0xc   : > { %v3447_v11 = vsel (!%p138_p2), %vm180_vm0, 1.0, %v3400_v10 }
   0xd   : > { %s4134_s13 = smov (!%p161_p3, %s2461_s13), 1  ;;  %vm181_vm1 = vcmp.eq.s32.totalorder %v176_v3, %v178_v7  ;;  %vm182_vm2 = vcmp.eq.s32.totalorder %v176_v3, %v179_v8  ;;  %v190_v12 = vadd.s32 1, %v178_v7  ;;  %v191_v13 = vadd.s32 1, %v179_v8 }
   0xe   : > { %s3362_s16 = smul.u32 720, %s4134_s13  ;;  %v3449_v14 = vsel %vm181_vm1, 1.0, %v3400_v10  ;;  %v3451_v15 = vsel %vm182_vm2, 1.0, %v3400_v10  ;;  %vm192_vm3 = vcmp.eq.s32.totalorder %v176_v3, %v189_v9 }
   0xf   : > { %s3363_s17 = smul.u32 192, %s4134_s13  ;;  %vm193_vm4 = vcmp.eq.s32.totalorder %v176_v3, %v190_v12  ;;  %vm194_vm5 = vcmp.eq.s32.totalorder %v176_v3, %v191_v13  ;;  %v3453_v16 = vsel %vm192_vm3, 1.0, %v3400_v10 }
  0x10   : > { %s3440_s20 = scalar_lea.vmem %s4129_s0, %s3362_s16  ;;  %v3455_v17 = vsel %vm193_vm4, 1.0, %v3400_v10  ;;  %v3457_v18 = vsel %vm194_vm5, 1.0, %v3400_v10 }
  0x11   : > { %s3445_s23 = scalar_lea.vmem %s4132_s3, %s3363_s17 }
  0x12 LB: >> { %v2476_v19 = vld [vmem:[%s4130_s1 + $0x10] sm:$0xff]  ;;  %v2477_v20 = vld [vmem:[%s4130_s1 + $0x18] sm:$0xff]  ;;  %v3401_v21 = vmov 0.0|0.0   ;;  %vm3402_vm6 = vmmov 0   ;;  %v3403_v23 = vmov 0.0   ;;  %s2475_s29 = smul.u32 80, %s3398_s24  ;;  %s3398_s24 = sphi %s3459_s24, %s207_s24  }
  0x13   : >> { %3136 = vmatprep.subr.bf16.mxu0 %v3401_v21  ;;  %3163 = vmatprep.subr.bf16.mxu1 %v3401_v21  ;;  %v3137_v22 = vpack.c.bf16 %v2477_v20, %v2476_v19  ;;  %v216_v24 = vld [vmem:[%s4130_s1] sm:$0xff]  ;;  %v217_v25 = vld [vmem:[%s4130_s1 + $0x8] sm:$0xff]  ;;  %vm226_vm7 = vcmask 1046528   ;;  %vm236_vm8 = vcmask 130048   ;;  %vm440_vm9 = vcmask 1045504   ;;  %s2378_s14 = smul.u32 24, %s3398_s24 }
  0x14   : >> { %2760 = vmatprep.mubr.msk.f32.mxu0 %vm3402_vm6, %v3403_v23  ;;  %2931 = vmatprep.mubr.msk.f32.mxu1 %vm3402_vm6, %v3403_v23  ;;  %s3478_s30 = scalar_lea.vmem %s3440_s20, %s2475_s29  ;;  %v3140_v38 = vpack.c.bf16 %v217_v25, %v216_v24  ;;  %vm2202_vm10 = vcmask 1043456   ;;  %vm2192_vm11 = vcmask 293888   ;;  %vm2380_vm12 = vcmask 261120   ;;  %s207_s24 = sadd.s32 1, %s3398_s24  }
  0x15   : >> { %3138 = vmatpush3.bf16.msra.mxu0 %v3137_v22  ;;  %3165 = vmatpush3.bf16.msra.mxu1 %v3137_v22  ;;  %v3489_v26 = vld [vmem:[%s3478_s30] sm:$0xff]  ;;  %v3492_v27 = vld [vmem:[%s3478_s30 + $0x8] sm:$0xff]  ;;  %v3500_v31 = vld [vmem:[%s3478_s30 + $0x30] sm:$0xff]  ;;  %s2379_s15 = scalar_lea.vmem %s3445_s23, %s2378_s14  ;;  %vm2383_vm13 = vcmask 254976   ;;  %p204_p4 = scmp.ge.s32.totalorder %s207_s24, 8  }
  0x16   : >> { %3139 = vmatprep.subr.bf16.mxu0 %v3401_v21  ;;  %3166 = vmatprep.subr.bf16.mxu1 %v3401_v21  ;;  %v3495_v28 = vld [vmem:[%s3478_s30 + $0x28] sm:$0xff]  ;;  %v227_v29 = vrot.slane %v3489_v26, 1  ;;  %v228_v30 = vrot.slane %v3492_v27, 1  ;;  %v3503_v32 = vld [vmem:[%s3478_s30 + $0x10] sm:$0xff]  ;;  %v680_v34 = vrot.slane %v3500_v31, 1  ;;  %v3509_v36 = vld [vmem:[%s3478_s30 + $0x38] sm:$0xff] }
  0x17   : >> { %v679_v33 = vrot.slane %v3495_v28, 1  ;;  %v230_v35 = vrot.slane %v3503_v32, 1  ;;  %v3512_v37 = vld [vmem:[%s3478_s30 + $0x18] sm:$0xff]  ;;  %v682_v40 = vrot.slane %v3509_v36, 1  ;;  %v3517_v41 = vld [vmem:[%s3478_s30 + $0x40] sm:$0xff]  ;;  %v3546_v50 = vld [vmem:[%s3478_s30 + $0x50] sm:$0xff] }
  0x18   : >> { %v229_v39 = vsel %vm226_vm7, %v227_v29, %v228_v30  ;;  %v3520_v42 = vld [vmem:[%s3478_s30 + $0x20] sm:$0x3f]  ;;  %v232_v45 = vrot.slane %v3512_v37, 1  ;;  %v684_v47 = vrot.slane %v3517_v41, 1  ;;  %v3540_v49 = vld [vmem:[%s3478_s30 + $0x48] sm:$0x3f] }
  0x19   : >> { %2761 = vmatmul.mubr.msk.f32.vlgmr.msra.gmra.mrb[0].mxu0 %vm236_vm8, %v229_v39  ;;  %v3524_v43 = vsel %vm226_vm7, %v679_v33, %v680_v34  ;;  %v231_v44 = vsel %vm226_vm7, %v228_v30, %v230_v35  ;;  %v3535_v46 = vsel %vm226_vm7, %v680_v34, %v682_v40  ;;  %v234_v48 = vrot.slane %v3520_v42, 1  ;;  %v3558_v54 = vld [vmem:[%s3478_s30 + $0x58] sm:$0xff]  ;;  %v3568_v58 = vld [vmem:[%s3478_s30 + $0x60] sm:$0xff]  ;;  %v3571_v59 = vld [vmem:[%s3478_s30 + $0x68] sm:$0xff] }
  0x1a   : >> { %2932 = vmatmul.mubr.msk.f32.vlgmr.msra.gmra.mrb[0].mxu1 %vm236_vm8, %v3524_v43  ;;  %2763 = vmatprep.mubr.msk.f32.mxu0 %vm3402_vm6, %v3403_v23  ;;  %v233_v51 = vsel %vm226_vm7, %v230_v35, %v232_v45  ;;  %v3554_v52 = vrot.slane %v3540_v49, 1  ;;  %v1034_v53 = vrot.slane %v3546_v50, 1  ;;  %v3563_v55 = vsel %vm226_vm7, %v682_v40, %v684_v47  ;;  %v3578_v0 = vld [vmem:[%s3478_s30 + $0x70] sm:$0x3f]  ;;  %v3592_v6 = vld [vmem:[%s3478_s30 + $0x78] sm:$0xff]  ;;  %v3628_v22 = vld [vmem:[%s3478_s30 + $0x80] sm:$0xff] }
  0x1b   : >> { %2934 = vmatprep.mubr.msk.f32.mxu1 %vm3402_vm6, %v3403_v23  ;;  %3141 = vmatpush3.bf16.msra.mxu0 %v3140_v38  ;;  %v235_v56 = vsel %vm226_vm7, %v232_v45, %v234_v48  ;;  %v1035_v57 = vrot.slane %v3558_v54, 1  ;;  %v1152_v60 = vrot.slane %v3558_v54, 2  ;;  %v1037_v61 = vrot.slane %v3568_v58, 1  ;;  %v3632_v25 = vld [vmem:[%s3478_s30 + $0x88] sm:$0xff]  ;;  %v2488_v33 = vld [vmem:[%s4130_s1 + $0x20] sm:$0xff]  ;;  %v3652_v35 = vld [vmem:[%s3478_s30 + $0x90] sm:$0xff] }
  0x1c   : >> { %3168 = vmatpush3.bf16.msra.mxu1 %v3140_v38  ;;  %3142 = vmatprep.subr.bf16.mxu0 %v3401_v21  ;;  %v1154_v62 = vrot.slane %v3568_v58, 2  ;;  %v1039_v63 = vrot.slane %v3571_v59, 1  ;;  %v1156_v2 = vrot.slane %v3571_v59, 2  ;;  %v3583_v3 = vrot.slane %v3578_v0, 1  ;;  %v2489_v34 = vld [vmem:[%s4130_s1 + $0x28] sm:$0xff] }
  0x1d   : >> { %2764 = vmatmul.mubr.msk.f32.gmra.mrb[2].mxu0 %vm236_vm8, %v231_v44  ;;  %3169 = vmatprep.subr.bf16.mxu1 %v3401_v21  ;;  %v3586_v4 = vrot.slane %v3578_v0, 2  ;;  %v3589_v5 = vsel %vm226_vm7, %v1034_v53, %v1035_v57  ;;  %v3600_v7 = vsel %vm226_vm7, %v684_v47, %v3554_v52  ;;  %v3603_v8 = vsel %vm226_vm7, %v1035_v57, %v1037_v61  ;;  %v3666_v44 = vld [vmem:[%s3478_s30 + $0x98] sm:$0x3f] }
  0x1e   : >> { %2935 = vmatmul.mubr.msk.f32.gmra.mrb[2].mxu1 %vm236_vm8, %v3535_v46  ;;  %2766 = vmatprep.mubr.msk.f32.mxu0 %vm3402_vm6, %v3403_v23  ;;  %v3606_v9 = vsel %vm226_vm7, %v1037_v61, %v1039_v63  ;;  %v1943_v10 = vrot.slane %v3592_v6, 1  ;;  %v3613_v12 = vsel %vm226_vm7, %v1039_v63, %v3583_v3  ;;  %v3618_v13 = vsel %vm440_vm9, %v1152_v60, %v1154_v62 }
  0x1f   : >> { %2937 = vmatprep.mubr.msk.f32.mxu1 %vm3402_vm6, %v3403_v23  ;;  %v3621_v19 = vsel %vm440_vm9, %v1154_v62, %v1156_v2  ;;  %v3625_v20 = vsel %vm440_vm9, %v1156_v2, %v3586_v4  ;;  %v1944_v24 = vrot.slane %v3628_v22, 1  ;;  %v1946_v29 = vrot.slane %v3632_v25, 1 }
  0x20   : >> { %v1948_v38 = vrot.slane %v3652_v35, 1  ;;  %v3143_v40 = vpack.c.bf16 %v2489_v34, %v2488_v33  ;;  %v1950_v45 = vrot.slane %v3666_v44, 1  ;;  %v2058_v53 = vrot.slane %v3628_v22, 2 }
  0x21   : >> { %2767 = vmatmul.mubr.msk.f32.gmra.mrb[4].mxu0 %vm236_vm8, %v233_v51  ;;  %v3641_v30 = vsel %vm226_vm7, %v1943_v10, %v1944_v24  ;;  %v3657_v39 = vsel %vm226_vm7, %v1944_v24, %v1946_v29  ;;  %v2057_v51 = vrot.slane %v3592_v6, 2  ;;  %v441_v61 = vrot.slane %v3489_v26, 2  ;;  %v2502_v10 = vld [vmem:[%s4130_s1 + $0x30] sm:$0xff] }
  0x22   : >> { %2938 = vmatmul.mubr.msk.f32.gmra.mrb[4].mxu1 %vm236_vm8, %v3563_v55  ;;  %2769 = vmatprep.mubr.msk.f32.mxu0 %vm3402_vm6, %v3403_v23  ;;  %v3672_v47 = vsel %vm226_vm7, %v1946_v29, %v1948_v38  ;;  %v442_v62 = vrot.slane %v3492_v27, 2  ;;  %v796_v63 = vrot.slane %v3495_v28, 2  ;;  %v797_v2 = vrot.slane %v3500_v31, 2 }
  0x23   : >> { %2940 = vmatprep.mubr.msk.f32.mxu1 %vm3402_vm6, %v3403_v23  ;;  %v3709_v57 = vsel %vm440_vm9, %v2057_v51, %v2058_v53  ;;  %v444_v33 = vrot.slane %v3503_v32, 2  ;;  %v2064_v51 = vrot.slane %v3666_v44, 2 }
  0x24   : >> { %v443_v29 = vsel %vm440_vm9, %v441_v61, %v442_v62  ;;  %v3742_v34 = vsel %vm440_vm9, %v796_v63, %v797_v2  ;;  %v446_v61 = vrot.slane %v3512_v37, 2 }
  0x25   : >> { %2770 = vmatmul.mubr.msk.f32.gmra.mrb[6].mxu0 %vm236_vm8, %v235_v56  ;;  %v2060_v56 = vrot.slane %v3632_v25, 2 }
  0x26   : >> { %2941 = vmatmul.mubr.msk.f32.gmra.mrb[6].mxu1 %vm236_vm8, %v3600_v7  ;;  %2772 = vmatprep.mubr.msk.f32.mxu0 %vm3402_vm6, %v3403_v23 }
  0x27   : >> { %2943 = vmatprep.mubr.msk.f32.mxu1 %vm3402_vm6, %v3403_v23  ;;  %v3731_v24 = vsel %vm440_vm9, %v2058_v53, %v2060_v56 }
  0x29   : >> { %2773 = vmatmul.mubr.msk.f32.gmra.mrb[8].mxu0 %vm236_vm8, %v234_v48  ;;  %v3687_v48 = vsel %vm226_vm7, %v1948_v38, %v1950_v45  ;;  %v799_v38 = vrot.slane %v3509_v36, 2 }
  0x2a   : >> { %2944 = vmatmul.mubr.msk.f32.gmra.mrb[8].mxu1 %vm236_vm8, %v3554_v52  ;;  %2779 = vmatprep.mubr.msk.f32.mxu0 %vm3402_vm6, %v3403_v23 }
  0x2b   : >> { %2950 = vmatprep.mubr.msk.f32.mxu1 %vm3402_vm6, %v3403_v23  ;;  %v3759_v63 = vsel %vm440_vm9, %v797_v2, %v799_v38  ;;  %v448_v2 = vrot.slane %v3520_v42, 2 }
  0x2d   : >> { %2780 = vmatmul.mubr.msk.f32.vlgmr.msra.gmra.mrb[0].mxu0 %vm236_vm8, %v3489_v26  ;;  %v2503_v26 = vld [vmem:[%s4130_s1 + $0x38] sm:$0xff] }
  0x2e   : >> { %2951 = vmatmul.mubr.msk.f32.vlgmr.msra.gmra.mrb[0].mxu1 %vm236_vm8, %v3495_v28  ;;  %2782 = vmatprep.mubr.msk.f32.mxu0 %vm3402_vm6, %v3403_v23 }
  0x2f   : >> { %2953 = vmatprep.mubr.msk.f32.mxu1 %vm3402_vm6, %v3403_v23  ;;  %3144 = vmatpush3.bf16.msra.mxu0 %v3143_v40 }
  0x30   : >> { %3171 = vmatpush3.bf16.msra.mxu1 %v3143_v40  ;;  %3145 = vmatprep.subr.bf16.mxu0 %v3401_v21  ;;  %v3146_v40 = vpack.c.bf16 %v2503_v26, %v2502_v10  ;;  %v3782_v26 = vrot.slane %v3540_v49, 2 }
  0x31   : >> { %2783 = vmatmul.mubr.msk.f32.gmra.mrb[2].mxu0 %vm236_vm8, %v3492_v27  ;;  %3172 = vmatprep.subr.bf16.mxu1 %v3401_v21  ;;  %v2062_v27 = vrot.slane %v3652_v35, 2 }
  0x32   : >> { %2954 = vmatmul.mubr.msk.f32.gmra.mrb[2].mxu1 %vm236_vm8, %v3500_v31  ;;  %2785 = vmatprep.mubr.msk.f32.mxu0 %vm3402_vm6, %v3403_v23 }
  0x33   : >> { %2956 = vmatprep.mubr.msk.f32.mxu1 %vm3402_vm6, %v3403_v23  ;;  %v3748_v53 = vsel %vm440_vm9, %v2060_v56, %v2062_v27  ;;  %v801_v56 = vrot.slane %v3517_v41, 2 }
  0x35   : >> { %2786 = vmatmul.mubr.msk.f32.gmra.mrb[4].mxu0 %vm236_vm8, %v3503_v32  ;;  %v445_v32 = vsel %vm440_vm9, %v442_v62, %v444_v33  ;;  %v447_v62 = vsel %vm440_vm9, %v444_v33, %v446_v61  ;;  %v3779_v10 = vsel %vm440_vm9, %v799_v38, %v801_v56  ;;  %v2510_v33 = vld [vmem:[%s4130_s1 + $0x48] sm:$0xff] }
  0x36   : >> { %2957 = vmatmul.mubr.msk.f32.gmra.mrb[4].mxu1 %vm236_vm8, %v3509_v36  ;;  %2788 = vmatprep.mubr.msk.f32.mxu0 %vm3402_vm6, %v3403_v23 }
  0x37   : >> { %2959 = vmatprep.mubr.msk.f32.mxu1 %vm3402_vm6, %v3403_v23 }
  0x39   : >> { %2789 = vmatmul.mubr.msk.f32.gmra.mrb[6].mxu0 %vm236_vm8, %v3512_v37  ;;  %v3768_v37 = vsel %vm440_vm9, %v2062_v27, %v2064_v51  ;;  %v449_v27 = vsel %vm440_vm9, %v446_v61, %v448_v2 }
  0x3a   : >> { %2960 = vmatmul.mubr.msk.f32.gmra.mrb[6].mxu1 %vm236_vm8, %v3517_v41  ;;  %2791 = vmatprep.mubr.msk.f32.mxu0 %vm3402_vm6, %v3403_v23 }
  0x3b   : >> { %2962 = vmatprep.mubr.msk.f32.mxu1 %vm3402_vm6, %v3403_v23 }
  0x3d   : >> { %2792 = vmatmul.mubr.msk.f32.gmra.mrb[8].mxu0 %vm236_vm8, %v3520_v42  ;;  %v3794_v42 = vsel %vm440_vm9, %v801_v56, %v3782_v26 }
  0x3e   : >> { %2963 = vmatmul.mubr.msk.f32.gmra.mrb[8].mxu1 %vm236_vm8, %v3540_v49  ;;  %2798 = vmatprep.mubr.msk.f32.mxu0 %vm3402_vm6, %v3403_v23 }
  0x3f   : >> { %2969 = vmatprep.mubr.msk.f32.mxu1 %vm3402_vm6, %v3403_v23 }
  0x41   : >> { %2799 = vmatmul.mubr.msk.f32.vlgmr.msra.gmra.mrb[0].mxu0 %vm236_vm8, %v443_v29  ;;  %v2509_v29 = vld [vmem:[%s4130_s1 + $0x40] sm:$0xff] }
  0x42   : >> { %2970 = vmatmul.mubr.msk.f32.vlgmr.msra.gmra.mrb[0].mxu1 %vm236_vm8, %v3742_v34  ;;  %2801 = vmatprep.mubr.msk.f32.mxu0 %vm3402_vm6, %v3403_v23  ;;  %v3149_v38 = vpack.c.bf16 %v2510_v33, %v2509_v29 }
  0x43   : >> { %2972 = vmatprep.mubr.msk.f32.mxu1 %vm3402_vm6, %v3403_v23  ;;  %3147 = vmatpush3.bf16.msra.mxu0 %v3146_v40 }
  0x44   : >> { %3174 = vmatpush3.bf16.msra.mxu1 %v3146_v40  ;;  %3148 = vmatprep.subr.bf16.mxu0 %v3401_v21 }
  0x45   : >> { %2802 = vmatmul.mubr.msk.f32.gmra.mrb[2].mxu0 %vm236_vm8, %v445_v32  ;;  %3175 = vmatprep.subr.bf16.mxu1 %v3401_v21 }
  0x46   : >> { %2973 = vmatmul.mubr.msk.f32.gmra.mrb[2].mxu1 %vm236_vm8, %v3759_v63  ;;  %2804 = vmatprep.mubr.msk.f32.mxu0 %vm3402_vm6, %v3403_v23 }
  0x47   : >> { %2975 = vmatprep.mubr.msk.f32.mxu1 %vm3402_vm6, %v3403_v23 }
  0x49   : >> { %2805 = vmatmul.mubr.msk.f32.gmra.mrb[4].mxu0 %vm236_vm8, %v447_v62 }
  0x4a   : >> { %2976 = vmatmul.mubr.msk.f32.gmra.mrb[4].mxu1 %vm236_vm8, %v3779_v10  ;;  %2807 = vmatprep.mubr.msk.f32.mxu0 %vm3402_vm6, %v3403_v23 }
  0x4b   : >> { %2978 = vmatprep.mubr.msk.f32.mxu1 %vm3402_vm6, %v3403_v23 }
  0x4d   : >> { %2808 = vmatmul.mubr.msk.f32.gmra.mrb[6].mxu0 %vm236_vm8, %v449_v27 }
  0x4e   : >> { %2979 = vmatmul.mubr.msk.f32.gmra.mrb[6].mxu1 %vm236_vm8, %v3794_v42  ;;  %2810 = vmatprep.mubr.msk.f32.mxu0 %vm3402_vm6, %v3403_v23 }
  0x4f   : >> { %2981 = vmatprep.mubr.msk.f32.mxu1 %vm3402_vm6, %v3403_v23 }
  0x51   : >> { %2811 = vmatmul.mubr.msk.f32.gmra.mrb[8].mxu0 %vm236_vm8, %v448_v2 }
  0x52   : >> { %2982 = vmatmul.mubr.msk.f32.gmra.mrb[8].mxu1 %vm236_vm8, %v3782_v26  ;;  %2817 = vmatprep.mubr.msk.f32.mxu0 %vm3402_vm6, %v3403_v23 }
  0x53   : >> { %2988 = vmatprep.mubr.msk.f32.mxu1 %vm3402_vm6, %v3403_v23 }
  0x55   : >> { %2818 = vmatmul.mubr.msk.f32.vlgmr.msra.gmra.mrb[0].mxu0 %vm236_vm8, %v3495_v28  ;;  %v2516_v28 = vld [vmem:[%s4130_s1 + $0x50] sm:$0xff] }
  0x56   : >> { %2989 = vmatmul.mubr.msk.f32.vlgmr.msra.gmra.mrb[0].mxu1 %vm236_vm8, %v3546_v50  ;;  %2820 = vmatprep.mubr.msk.f32.mxu0 %vm3402_vm6, %v3403_v23 }
  0x57   : >> { %2991 = vmatprep.mubr.msk.f32.mxu1 %vm3402_vm6, %v3403_v23  ;;  %3150 = vmatpush3.bf16.msra.mxu0 %v3149_v38 }
  0x58   : >> { %3177 = vmatpush3.bf16.msra.mxu1 %v3149_v38  ;;  %3151 = vmatprep.subr.bf16.mxu0 %v3401_v21 }
  0x59   : >> { %2821 = vmatmul.mubr.msk.f32.gmra.mrb[2].mxu0 %vm236_vm8, %v3500_v31  ;;  %3178 = vmatprep.subr.bf16.mxu1 %v3401_v21  ;;  %v2517_v31 = vld [vmem:[%s4130_s1 + $0x58] sm:$0xff] }
  0x5a   : >> { %2992 = vmatmul.mubr.msk.f32.gmra.mrb[2].mxu1 %vm236_vm8, %v3558_v54  ;;  %2823 = vmatprep.mubr.msk.f32.mxu0 %vm3402_vm6, %v3403_v23 }
  0x5b   : >> { %2994 = vmatprep.mubr.msk.f32.mxu1 %vm3402_vm6, %v3403_v23 }
  0x5d   : >> { %2824 = vmatmul.mubr.msk.f32.gmra.mrb[4].mxu0 %vm236_vm8, %v3509_v36  ;;  %v3152_v36 = vpack.c.bf16 %v2517_v31, %v2516_v28 }
  0x5e   : >> { %2995 = vmatmul.mubr.msk.f32.gmra.mrb[4].mxu1 %vm236_vm8, %v3568_v58  ;;  %2826 = vmatprep.mubr.msk.f32.mxu0 %vm3402_vm6, %v3403_v23 }
  0x5f   : >> { %2997 = vmatprep.mubr.msk.f32.mxu1 %vm3402_vm6, %v3403_v23 }
  0x61   : >> { %2827 = vmatmul.mubr.msk.f32.gmra.mrb[6].mxu0 %vm236_vm8, %v3517_v41  ;;  %v1151_v41 = vrot.slane %v3546_v50, 2 }
  0x62   : >> { %2998 = vmatmul.mubr.msk.f32.gmra.mrb[6].mxu1 %vm236_vm8, %v3571_v59  ;;  %2829 = vmatprep.mubr.msk.f32.mxu0 %vm3402_vm6, %v3403_v23 }
  0x63   : >> { %3000 = vmatprep.mubr.msk.f32.mxu1 %vm3402_vm6, %v3403_v23 }
  0x65   : >> { %2830 = vmatmul.mubr.msk.f32.gmra.mrb[8].mxu0 %vm236_vm8, %v3540_v49  ;;  %v3916_v49 = vsel %vm440_vm9, %v1151_v41, %v1152_v60  ;;  %v2538_v60 = vld [vmem:[%s4130_s1 + $0x78] sm:$0xff] }
  0x66   : >> { %3001 = vmatmul.mubr.msk.f32.gmra.mrb[8].mxu1 %vm236_vm8, %v3578_v0  ;;  %2836 = vmatprep.mubr.msk.f32.mxu0 %vm3402_vm6, %v3403_v23 }
  0x67   : >> { %3007 = vmatprep.mubr.msk.f32.mxu1 %vm3402_vm6, %v3403_v23 }
  0x69   : >> { %2837 = vmatmul.mubr.msk.f32.vlgmr.msra.gmra.mrb[0].mxu0 %vm236_vm8, %v3524_v43  ;;  %v2530_v43 = vld [vmem:[%s4130_s1 + $0x60] sm:$0xff] }
  0x6a   : >> { %3008 = vmatmul.mubr.msk.f32.vlgmr.msra.gmra.mrb[0].mxu1 %vm236_vm8, %v3589_v5  ;;  %2839 = vmatprep.mubr.msk.f32.mxu0 %vm3402_vm6, %v3403_v23 }
  0x6b   : >> { %3010 = vmatprep.mubr.msk.f32.mxu1 %vm3402_vm6, %v3403_v23  ;;  %3153 = vmatpush3.bf16.msra.mxu0 %v3152_v36 }
  0x6c   : >> { %3180 = vmatpush3.bf16.msra.mxu1 %v3152_v36  ;;  %3154 = vmatprep.subr.bf16.mxu0 %v3401_v21 }
  0x6d   : >> { %2840 = vmatmul.mubr.msk.f32.gmra.mrb[2].mxu0 %vm236_vm8, %v3535_v46  ;;  %3181 = vmatprep.subr.bf16.mxu1 %v3401_v21  ;;  %v2531_v46 = vld [vmem:[%s4130_s1 + $0x68] sm:$0xff] }
  0x6e   : >> { %3011 = vmatmul.mubr.msk.f32.gmra.mrb[2].mxu1 %vm236_vm8, %v3603_v8  ;;  %2842 = vmatprep.mubr.msk.f32.mxu0 %vm3402_vm6, %v3403_v23 }
  0x6f   : >> { %3013 = vmatprep.mubr.msk.f32.mxu1 %vm3402_vm6, %v3403_v23 }
  0x71   : >> { %2843 = vmatmul.mubr.msk.f32.gmra.mrb[4].mxu0 %vm236_vm8, %v3563_v55  ;;  %v3155_v55 = vpack.c.bf16 %v2531_v46, %v2530_v43 }
  0x72   : >> { %3014 = vmatmul.mubr.msk.f32.gmra.mrb[4].mxu1 %vm236_vm8, %v3606_v9  ;;  %2845 = vmatprep.mubr.msk.f32.mxu0 %vm3402_vm6, %v3403_v23 }
  0x73   : >> { %3016 = vmatprep.mubr.msk.f32.mxu1 %vm3402_vm6, %v3403_v23 }
  0x75   : >> { %2846 = vmatmul.mubr.msk.f32.gmra.mrb[6].mxu0 %vm236_vm8, %v3600_v7 }
  0x76   : >> { %3017 = vmatmul.mubr.msk.f32.gmra.mrb[6].mxu1 %vm236_vm8, %v3613_v12  ;;  %2848 = vmatprep.mubr.msk.f32.mxu0 %vm3402_vm6, %v3403_v23 }
  0x77   : >> { %3019 = vmatprep.mubr.msk.f32.mxu1 %vm3402_vm6, %v3403_v23 }
  0x79   : >> { %2849 = vmatmul.mubr.msk.f32.gmra.mrb[8].mxu0 %vm236_vm8, %v3554_v52  ;;  %v2537_v52 = vld [vmem:[%s4130_s1 + $0x70] sm:$0xff] }
  0x7a   : >> { %3020 = vmatmul.mubr.msk.f32.gmra.mrb[8].mxu1 %vm236_vm8, %v3583_v3  ;;  %2855 = vmatprep.mubr.msk.f32.mxu0 %vm3402_vm6, %v3403_v23  ;;  %v3158_v7 = vpack.c.bf16 %v2538_v60, %v2537_v52 }
  0x7b   : >> { %3026 = vmatprep.mubr.msk.f32.mxu1 %vm3402_vm6, %v3403_v23 }
  0x7d   : >> { %2856 = vmatmul.mubr.msk.f32.vlgmr.msra.gmra.mrb[0].mxu0 %vm236_vm8, %v3742_v34 }
  0x7e   : >> { %3027 = vmatmul.mubr.msk.f32.vlgmr.msra.gmra.mrb[0].mxu1 %vm236_vm8, %v3916_v49  ;;  %2858 = vmatprep.mubr.msk.f32.mxu0 %vm3402_vm6, %v3403_v23 }
  0x7f   : >> { %3029 = vmatprep.mubr.msk.f32.mxu1 %vm3402_vm6, %v3403_v23  ;;  %3156 = vmatpush3.bf16.msra.mxu0 %v3155_v55 }
  0x80   : >> { %3183 = vmatpush3.bf16.msra.mxu1 %v3155_v55  ;;  %3157 = vmatprep.subr.bf16.mxu0 %v3401_v21 }
  0x81   : >> { %2859 = vmatmul.mubr.msk.f32.gmra.mrb[2].mxu0 %vm236_vm8, %v3759_v63  ;;  %3184 = vmatprep.subr.bf16.mxu1 %v3401_v21 }
  0x82   : >> { %3030 = vmatmul.mubr.msk.f32.gmra.mrb[2].mxu1 %vm236_vm8, %v3618_v13  ;;  %2861 = vmatprep.mubr.msk.f32.mxu0 %vm3402_vm6, %v3403_v23 }
  0x83   : >> { %3032 = vmatprep.mubr.msk.f32.mxu1 %vm3402_vm6, %v3403_v23 }
  0x85   : >> { %2862 = vmatmul.mubr.msk.f32.gmra.mrb[4].mxu0 %vm236_vm8, %v3779_v10 }
  0x86   : >> { %3033 = vmatmul.mubr.msk.f32.gmra.mrb[4].mxu1 %vm236_vm8, %v3621_v19  ;;  %2864 = vmatprep.mubr.msk.f32.mxu0 %vm3402_vm6, %v3403_v23 }
  0x87   : >> { %3035 = vmatprep.mubr.msk.f32.mxu1 %vm3402_vm6, %v3403_v23 }
  0x89   : >> { %2865 = vmatmul.mubr.msk.f32.gmra.mrb[6].mxu0 %vm236_vm8, %v3794_v42 }
  0x8a   : >> { %3036 = vmatmul.mubr.msk.f32.gmra.mrb[6].mxu1 %vm236_vm8, %v3625_v20  ;;  %2867 = vmatprep.mubr.msk.f32.mxu0 %vm3402_vm6, %v3403_v23 }
  0x8b   : >> { %3038 = vmatprep.mubr.msk.f32.mxu1 %vm3402_vm6, %v3403_v23 }
  0x8d   : >> { %2868 = vmatmul.mubr.msk.f32.gmra.mrb[8].mxu0 %vm236_vm8, %v3782_v26 }
  0x8e   : >> { %3039 = vmatmul.mubr.msk.f32.gmra.mrb[8].mxu1 %vm236_vm8, %v3586_v4  ;;  %2874 = vmatprep.mubr.msk.f32.mxu0 %vm3402_vm6, %v3403_v23 }
  0x8f   : >> { %3045 = vmatprep.mubr.msk.f32.mxu1 %vm3402_vm6, %v3403_v23 }
  0x91   : >> { %2875 = vmatmul.mubr.msk.f32.vlgmr.msra.gmra.mrb[0].mxu0 %vm236_vm8, %v3546_v50  ;;  %v2544_v50 = vld [vmem:[%s4130_s1 + $0x80] sm:$0xff] }
  0x92   : >> { %3046 = vmatmul.mubr.msk.f32.vlgmr.msra.gmra.mrb[0].mxu1 %vm236_vm8, %v3592_v6  ;;  %2877 = vmatprep.mubr.msk.f32.mxu0 %vm3402_vm6, %v3403_v23 }
  0x93   : >> { %3048 = vmatprep.mubr.msk.f32.mxu1 %vm3402_vm6, %v3403_v23  ;;  %3159 = vmatpush3.bf16.msra.mxu0 %v3158_v7 }
  0x94   : >> { %3186 = vmatpush3.bf16.msra.mxu1 %v3158_v7  ;;  %3160 = vmatprep.subr.bf16.mxu0 %v3401_v21 }
  0x95   : >> { %2878 = vmatmul.mubr.msk.f32.gmra.mrb[2].mxu0 %vm236_vm8, %v3558_v54  ;;  %3187 = vmatprep.subr.bf16.mxu1 %v3401_v21  ;;  %v2545_v54 = vld [vmem:[%s4130_s1 + $0x88] sm:$0xff] }
  0x96   : >> { %3049 = vmatmul.mubr.msk.f32.gmra.mrb[2].mxu1 %vm236_vm8, %v3628_v22  ;;  %2880 = vmatprep.mubr.msk.f32.mxu0 %vm3402_vm6, %v3403_v23 }
  0x97   : >> { %3051 = vmatprep.mubr.msk.f32.mxu1 %vm3402_vm6, %v3403_v23 }
  0x99   : >> { %2881 = vmatmul.mubr.msk.f32.gmra.mrb[4].mxu0 %vm236_vm8, %v3568_v58  ;;  %v3161_v58 = vpack.c.bf16 %v2545_v54, %v2544_v50 }
  0x9a   : >> { %3052 = vmatmul.mubr.msk.f32.gmra.mrb[4].mxu1 %vm236_vm8, %v3632_v25  ;;  %2883 = vmatprep.mubr.msk.f32.mxu0 %vm3402_vm6, %v3403_v23 }
  0x9b   : >> { %3054 = vmatprep.mubr.msk.f32.mxu1 %vm3402_vm6, %v3403_v23 }
  0x9d   : >> { %2884 = vmatmul.mubr.msk.f32.gmra.mrb[6].mxu0 %vm236_vm8, %v3571_v59 }
  0x9e   : >> { %3055 = vmatmul.mubr.msk.f32.gmra.mrb[6].mxu1 %vm236_vm8, %v3652_v35  ;;  %2886 = vmatprep.mubr.msk.f32.mxu0 %vm3402_vm6, %v3403_v23 }
  0x9f   : >> { %3057 = vmatprep.mubr.msk.f32.mxu1 %vm3402_vm6, %v3403_v23 }
  0xa1   : >> { %2887 = vmatmul.mubr.msk.f32.gmra.mrb[8].mxu0 %vm236_vm8, %v3578_v0 }
  0xa2   : >> { %3058 = vmatmul.mubr.msk.f32.gmra.mrb[8].mxu1 %vm236_vm8, %v3666_v44  ;;  %2893 = vmatprep.mubr.msk.f32.mxu0 %vm3402_vm6, %v3403_v23 }
  0xa3   : >> { %3064 = vmatprep.mubr.msk.f32.mxu1 %vm3402_vm6, %v3403_v23 }
  0xa5   : >> { %2894 = vmatmul.mubr.msk.f32.vlgmr.msra.gmra.mrb[0].mxu0 %vm236_vm8, %v3589_v5 }
  0xa6   : >> { %3065 = vmatmul.mubr.msk.f32.vlgmr.msra.gmra.mrb[0].mxu1 %vm236_vm8, %v3641_v30  ;;  %2896 = vmatprep.mubr.msk.f32.mxu0 %vm3402_vm6, %v3403_v23 }
  0xa7   : >> { %3067 = vmatprep.mubr.msk.f32.mxu1 %vm3402_vm6, %v3403_v23  ;;  %3162 = vmatpush3.bf16.msra.mxu0 %v3161_v58 }
  0xa8   : >> { %3189 = vmatpush3.bf16.msra.mxu1 %v3161_v58  ;;  %3190 = vmatprep.subr.bf16.mxu0 %v3401_v21 }
  0xa9   : >> { %2897 = vmatmul.mubr.msk.f32.gmra.mrb[2].mxu0 %vm236_vm8, %v3603_v8  ;;  %3196 = vmatprep.subr.bf16.mxu1 %v3401_v21 }
  0xaa   : >> { %3068 = vmatmul.mubr.msk.f32.gmra.mrb[2].mxu1 %vm236_vm8, %v3657_v39  ;;  %2899 = vmatprep.mubr.msk.f32.mxu0 %vm3402_vm6, %v3403_v23 }
  0xab   : >> { %3070 = vmatprep.mubr.msk.f32.mxu1 %vm3402_vm6, %v3403_v23 }
  0xad   : >> { %2900 = vmatmul.mubr.msk.f32.gmra.mrb[4].mxu0 %vm236_vm8, %v3606_v9 }
  0xae   : >> { %3071 = vmatmul.mubr.msk.f32.gmra.mrb[4].mxu1 %vm236_vm8, %v3672_v47  ;;  %2902 = vmatprep.mubr.msk.f32.mxu0 %vm3402_vm6, %v3403_v23 }
  0xaf   : >> { %3073 = vmatprep.mubr.msk.f32.mxu1 %vm3402_vm6, %v3403_v23 }
  0xb1   : >> { %2903 = vmatmul.mubr.msk.f32.gmra.mrb[6].mxu0 %vm236_vm8, %v3613_v12 }
  0xb2   : >> { %3074 = vmatmul.mubr.msk.f32.gmra.mrb[6].mxu1 %vm236_vm8, %v3687_v48  ;;  %2905 = vmatprep.mubr.msk.f32.mxu0 %vm3402_vm6, %v3403_v23 }
  0xb3   : >> { %3076 = vmatprep.mubr.msk.f32.mxu1 %vm3402_vm6, %v3403_v23 }
  0xb5   : >> { %2906 = vmatmul.mubr.msk.f32.gmra.mrb[8].mxu0 %vm236_vm8, %v3583_v3 }
  0xb6   : >> { %3077 = vmatmul.mubr.msk.f32.gmra.mrb[8].mxu1 %vm236_vm8, %v1950_v45  ;;  %2912 = vmatprep.mubr.msk.f32.mxu0 %vm3402_vm6, %v3403_v23 }
  0xb7   : >> { %3083 = vmatprep.mubr.msk.f32.mxu1 %vm3402_vm6, %v3403_v23 }
  0xb9   : >> { %2913 = vmatmul.mubr.msk.f32.vlgmr.msra.gmra.mrb[0].mxu0 %vm236_vm8, %v3916_v49 }
  0xba   : >> { %3084 = vmatmul.mubr.msk.f32.vlgmr.msra.gmra.mrb[0].mxu1 %vm236_vm8, %v3709_v57  ;;  %2915 = vmatprep.mubr.msk.f32.mxu0 %vm3402_vm6, %v3403_v23 }
  0xbb   : >> { %3086 = vmatprep.mubr.msk.f32.mxu1 %vm3402_vm6, %v3403_v23 }
  0xbd   : >> { %2916 = vmatmul.mubr.msk.f32.gmra.mrb[2].mxu0 %vm236_vm8, %v3618_v13 }
  0xbe   : >> { %3087 = vmatmul.mubr.msk.f32.gmra.mrb[2].mxu1 %vm236_vm8, %v3731_v24  ;;  %2918 = vmatprep.mubr.msk.f32.mxu0 %vm3402_vm6, %v3403_v23 }
  0xbf   : >> { %3089 = vmatprep.mubr.msk.f32.mxu1 %vm3402_vm6, %v3403_v23 }
  0xc1   : >> { %2919 = vmatmul.mubr.msk.f32.gmra.mrb[4].mxu0 %vm236_vm8, %v3621_v19 }
  0xc2   : >> { %3090 = vmatmul.mubr.msk.f32.gmra.mrb[4].mxu1 %vm236_vm8, %v3748_v53  ;;  %2921 = vmatprep.mubr.msk.f32.mxu0 %vm3402_vm6, %v3403_v23 }
  0xc3   : >> { %3092 = vmatprep.mubr.msk.f32.mxu1 %vm3402_vm6, %v3403_v23 }
  0xc5   : >> { %2922 = vmatmul.mubr.msk.f32.gmra.mrb[6].mxu0 %vm236_vm8, %v3625_v20 }
  0xc6   : >> { %3093 = vmatmul.mubr.msk.f32.gmra.mrb[6].mxu1 %vm236_vm8, %v3768_v37  ;;  %2924 = vmatprep.mubr.msk.f32.mxu0 %vm3402_vm6, %v3403_v23 }
  0xc7   : >> { %3095 = vmatprep.mubr.msk.f32.mxu1 %vm3402_vm6, %v3403_v23 }
  0xc9   : >> { %2925 = vmatmul.mubr.msk.f32.gmra.mrb[8].mxu0 %vm236_vm8, %v3586_v4 }
  0xca   : >> { %3096 = vmatmul.mubr.msk.f32.gmra.mrb[8].mxu1 %vm236_vm8, %v2064_v51  ;;  %3108 = vmatprep.mubr.msk.f32.mxu0 %vm3402_vm6, %v3403_v23 }
  0xcb   : >> { %3127 = vmatprep.mubr.msk.f32.mxu1 %vm3402_vm6, %v3403_v23 }
 0x18c   : >> { %v1236_v59 = vpop.f32.mrb[0].mxu0 }
 0x18d   : >> { %v2142_v0 = vpop.f32.mrb[0].mxu1  ;;  %v2914_v3 = vpop.f32.mrb[1].mxu0 }
 0x18e   : >> { %v2171_v5 = vmax.f32 %v1236_v59, %v2142_v0  ;;  %v3085_v6 = vpop.f32.mrb[1].mxu1 }
 0x190   : >> { %v1241_v8 = vpop.f32.mrb[2].mxu0  ;;  %v2182_v4 = vadd.f32 %v3435_v1, %v2171_v5 }
 0x191   : >> { %v2147_v9 = vpop.f32.mrb[2].mxu1  ;;  %v2917_v12 = vpop.f32.mrb[3].mxu0 }
 0x192   : >> { %v2172_v13 = vmax.f32 %v1241_v8, %v2147_v9  ;;  %v3088_v19 = vpop.f32.mrb[3].mxu1  ;;  %v2187_v35 = vmax.f32 %v2182_v4, 0.0 }
 0x194   : >> { %v2183_v20 = vadd.f32 %v3435_v1, %v2172_v13  ;;  %v1246_v22 = vpop.f32.mrb[4].mxu0 }
 0x195   : >> { %v2152_v25 = vpop.f32.mrb[4].mxu1  ;;  %v2920_v30 = vpop.f32.mrb[5].mxu0 }
 0x196   : >> { %v2188_v39 = vmax.f32 %v2183_v20, 0.0  ;;  %v2173_v44 = vmax.f32 %v1246_v22, %v2152_v25  ;;  %v3091_v45 = vpop.f32.mrb[5].mxu1 }
 0x198   : >> { %v3191_v47 = vpack.c.bf16 %v2188_v39, %v2187_v35  ;;  %v1251_v48 = vpop.f32.mrb[6].mxu0  ;;  %v2184_v34 = vadd.f32 %v3435_v1, %v2173_v44 }
 0x199   : >> { %v2157_v57 = vpop.f32.mrb[6].mxu1  ;;  %v2923_v24 = vpop.f32.mrb[7].mxu0 }
 0x19a   : >> { %v2174_v40 = vmax.f32 %v1251_v48, %v2157_v57  ;;  %v3094_v51 = vpop.f32.mrb[7].mxu1  ;;  %3192 = vmatpush3.bf16.msra.mxu0 %v3191_v47  ;;  %3198 = vmatpush3.bf16.msra.mxu1 %v3191_v47  ;;  %v2189_v56 = vmax.f32 %v2184_v34, 0.0 }
 0x19b   : >> { %3193 = vmatprep.subr.bf16.mxu0 %v3401_v21  ;;  %3199 = vmatprep.subr.bf16.mxu1 %v3401_v21 }
 0x19c   : >> { %v2185_v53 = vadd.f32 %v3435_v1, %v2174_v40  ;;  %v1256_v32 = vpop.f32.mrb[8].mxu0 }
 0x19d   : >> { %v2162_v61 = vpop.f32.mrb[8].mxu1  ;;  %v2926_v63 = vpop.f32.mrb[9].mxu0 }
 0x19e   : >> { %v2190_v37 = vmax.f32 %v2185_v53, 0.0  ;;  %v2175_v62 = vmax.f32 %v1256_v32, %v2162_v61  ;;  %v3097_v2 = vpop.f32.mrb[9].mxu1 }
 0x1a0   : >> { %v3194_v10 = vpack.c.bf16 %v2190_v37, %v2189_v56  ;;  %v2186_v26 = vadd.f32 %v3435_v1, %v2175_v62 }
 0x1a2   : >> { %3195 = vmatpush3.bf16.msra.mxu0 %v3194_v10  ;;  %3201 = vmatpush3.bf16.msra.mxu1 %v3194_v10  ;;  %v2191_v21 = vmax.f32 %v2186_v26, 0.0 }
 0x1a3   : >> { %3106 = vmatprep.subr.mxu0 %v3403_v23  ;;  %3125 = vmatprep.subr.mxu1 %v3403_v23 }
 0x1a6   : >> { %3107 = vmatpush3.msk.msra.mxu0 %vm2202_vm10, %v2191_v21  ;;  %3126 = vmatpush3.msk.msra.mxu1 %vm2202_vm10, %v2191_v21 }
 0x1a7   : >> { %3109 = vmatmul.mubr.msk.f32.vlgmr.msra.gmra.mrb[10].mxu0 %vm2192_vm11, %v3447_v11  ;;  %3128 = vmatmul.mubr.msk.f32.vlgmr.msra.gmra.mrb[10].mxu1 %vm2192_vm11, %v3453_v16 }
 0x1a8   : >> { %3111 = vmatprep.mubr.msk.f32.mxu0 %vm3402_vm6, %v3403_v23  ;;  %3130 = vmatprep.mubr.msk.f32.mxu1 %vm3402_vm6, %v3403_v23 }
 0x1ab   : >> { %3112 = vmatmul.mubr.msk.f32.gmra.mrb[12].mxu0 %vm2192_vm11, %v3449_v14  ;;  %3131 = vmatmul.mubr.msk.f32.gmra.mrb[12].mxu1 %vm2192_vm11, %v3455_v17 }
 0x1ac   : >> { %3114 = vmatprep.mubr.msk.f32.mxu0 %vm3402_vm6, %v3403_v23  ;;  %3133 = vmatprep.mubr.msk.f32.mxu1 %vm3402_vm6, %v3403_v23 }
 0x1af   : >> { %3115 = vmatmul.mubr.msk.f32.gmra.mrb[14].mxu0 %vm2192_vm11, %v3451_v15  ;;  %3134 = vmatmul.mubr.msk.f32.gmra.mrb[14].mxu1 %vm2192_vm11, %v3457_v18 }
 0x27a   : >> { %v2272_v27 = vpop.f32.mrb[10].mxu0  ;;  %v2361_v42 = vpop.f32.mrb[10].mxu1 }
 0x27b   : >> { %v2375_v29 = vmax.f32 %v2272_v27, %v2361_v42  ;;  %v3110_v33 = vpop.f32.mrb[11].mxu0  ;;  %v3129_v38 = vpop.f32.mrb[11].mxu1 }
 0x27d   : >> { %2381 = vst.msk [vmem:[%s2379_s15] sm:$0xff] %vm2380_vm12, %v2375_v29 }
 0x27e   : >> { %v2277_v28 = vpop.f32.mrb[12].mxu0  ;;  %v2366_v31 = vpop.f32.mrb[12].mxu1 }
 0x27f   : >> { %v2376_v36 = vmax.f32 %v2277_v28, %v2366_v31  ;;  %v3113_v41 = vpop.f32.mrb[13].mxu0  ;;  %v3132_v43 = vpop.f32.mrb[13].mxu1  ;;  %206 = sbr.rel (!%p204_p4) target bundleno = 18 (0x12), region = 82 }
 0x281   : >> { %2382 = vst.msk [vmem:[%s2379_s15 + $0x8] sm:$0xff] %vm2380_vm12, %v2376_v36 }
 0x282   : >> { %v2282_v23 = vpop.f32.mrb[14].mxu0  ;;  %v2371_v46 = vpop.f32.mrb[14].mxu1 }
 0x283   : >> { %v2377_v49 = vmax.f32 %v2282_v23, %v2371_v46  ;;  %v3116_v55 = vpop.f32.mrb[15].mxu0  ;;  %v3135_v52 = vpop.f32.mrb[15].mxu1 }
 0x285   : >> { %2384 = vst.msk [vmem:[%s2379_s15 + $0x10] sm:$0x3] %vm2383_vm13, %v2377_v49 }
 0x286 PF: > { %s13_s12 = sadd.s32 1, %s3394_s12  }
 0x287   : > { %p10_p5 = scmp.ge.s32.totalorder %s13_s12, 4  }
 0x289   :  { %12 = sbr.rel (!%p10_p5) target bundleno = 1 (0x1), region = 93 }

// kernel: cnn_symbol_grounder.6
= control target key start
LH: loop header
LB: loop body
LE: loop exit
PB: predicated region body
PF: predicated region fallthrough
CT: control target
= control target key end

     0   :  { %s2648_s12 = smov 0   ;;  %s2929_s0 = inlined_call_operand.vmem [shape: f32[2,8,18,32], index: 0, kind: input, shape index: {}]   ;;  %s2930_s1 = inlined_call_operand.vmem [shape: f32[9,32,16], index: 1, kind: input, shape index: {}]   ;;  %s2931_s2 = inlined_call_operand.vmem [shape: f32[1,16], index: 2, kind: input, shape index: {}]   ;;  %s2932_s3 = inlined_call_operand.vmem [shape: f32[2,3,8,16], index: 3, kind: output, shape index: {}]  }
   0x1 LB: > { %s1978_s13 = sadd.s32 4294967295, %s2618_s12   ;;  %p1982_p0 = scmp.ge.s32.totalorder %s2618_s12, 1  ;;  %s2618_s12 = sphi %s2648_s12, %s13_s12  }
   0x2   : > { %p137_p1 = scmp.lt.s32.totalorder %s2618_s12, 3 }
   0x4   : > { %p138_p2 = pnand %p1982_p0, %p137_p1 }
   0x5   : > { %p161_p3 = scmp.lt.s32.totalorder (!%p138_p2), %s1978_s13, 1  ;;  %v171_v0 = vlaneseq (!%p138_p2)  ;;  %v2659_v1 = vld [vmem:[%s2931_s2] ss:$0 sm:$0xff] (!%p138_p2)  ;;  %v2624_v6 = vmov (!%p138_p2), 0.0   ;;  %s2675_s24 = smov (!%p138_p2), 0  }
   0x6   : > { %141 = sbr.rel (%p138_p2) target bundleno = 532 (0x214), region = 32 }
   0x7   : > { %v172_v2 = vshrl.u32 (!%p138_p2), %v171_v0, 7  ;;  %v174_v3 = vand.u32 (!%p138_p2), 127, %v171_v0 }
   0x9   : > { %v175_v4 = vmul.u32 (!%p138_p2), 2, %v172_v2 }
   0xb   : > { %vm176_vm0 = vcmp.eq.s32.totalorder (!%p138_p2), %v174_v3, %v175_v4  ;;  %v179_v5 = vadd.s32 (!%p138_p2), 1, %v175_v4 }
   0xc   : > { %v2671_v7 = vsel (!%p138_p2), %vm176_vm0, 1.0, %v2624_v6 }
   0xd   : > { %s2934_s13 = smov (!%p161_p3, %s1978_s13), 1  ;;  %vm180_vm1 = vcmp.eq.s32.totalorder %v174_v3, %v179_v5 }
   0xe   : > { %s2586_s16 = smul.u32 192, %s2934_s13  ;;  %v2673_v8 = vsel %vm180_vm1, 1.0, %v2624_v6 }
   0xf   : > { %s2587_s17 = smul.u32 24, %s2934_s13 }
  0x10   : > { %s2664_s20 = scalar_lea.vmem %s2929_s0, %s2586_s16 }
  0x11   : > { %s2669_s23 = scalar_lea.vmem %s2932_s3, %s2587_s17 }
  0x12 LB: >> { %v1989_v9 = vld [vmem:[%s2930_s1 + $0x20] sm:$0xff]  ;;  %v1990_v10 = vld [vmem:[%s2930_s1 + $0x28] sm:$0xff]  ;;  %v1991_v11 = vld [vmem:[%s2930_s1 + $0x30] sm:$0xff]  ;;  %s1988_s6 = smul.u32 48, %s2622_s24  ;;  %vm208_vm2 = vcmask 1046528   ;;  %vm214_vm3 = vcmask 261120   ;;  %s2622_s24 = sphi %s2675_s24, %s189_s24  }
  0x13   : >> { %v2404_v12 = vpack.c.bf16 %v1990_v10, %v1989_v9  ;;  %v1992_v13 = vld [vmem:[%s2930_s1 + $0x38] sm:$0xff]  ;;  %v196_v15 = vld [vmem:[%s2930_s1] sm:$0xff]  ;;  %v197_v16 = vld [vmem:[%s2930_s1 + $0x8] sm:$0xff]  ;;  %vm378_vm4 = vcmask 1045504   ;;  %vm2626_vm5 = vmmov 0   ;;  %vm1751_vm6 = vcmask 130048  }
  0x14   : >> { %v2408_v14 = vpack.c.bf16 %v1992_v13, %v1991_v11  ;;  %s2700_s11 = scalar_lea.vmem %s2664_s20, %s1988_s6  ;;  %v198_v17 = vld [vmem:[%s2930_s1 + $0x10] sm:$0xff]  ;;  %v199_v18 = vld [vmem:[%s2930_s1 + $0x18] sm:$0xff]  ;;  %v2412_v22 = vpack.c.bf16 %v197_v16, %v196_v15  ;;  %v1997_v37 = vld [vmem:[%s2930_s1 + $0x40] sm:$0xff]  ;;  %s2075_s4 = sshll.u32 %s2622_s24, 3 }
  0x15   : >> { %2405 = vmatprep.subr.bf16.mxu0 %v2404_v12  ;;  %2477 = vmatprep.subr.bf16.mxu1 %v2404_v12  ;;  %v193_v19 = vld [vmem:[%s2700_s11] sm:$0xff]  ;;  %v2710_v20 = vld [vmem:[%s2700_s11 + $0x8] sm:$0xff]  ;;  %v2713_v21 = vld [vmem:[%s2700_s11 + $0x18] sm:$0xff]  ;;  %v2416_v35 = vpack.c.bf16 %v199_v18, %v198_v17  ;;  %s1900_s5 = scalar_lea.vmem %s2669_s23, %s2075_s4  ;;  %s189_s24 = sadd.s32 1, %s2622_s24  }
  0x16   : >> { %2407 = vmatpush3.bf16.msra.mxu0 %v2404_v12  ;;  %2479 = vmatpush3.bf16.msra.mxu1 %v2404_v12  ;;  %v209_v23 = vrot.slane %v193_v19, 1  ;;  %v210_v24 = vrot.slane %v2710_v20, 1  ;;  %v2717_v25 = vld [vmem:[%s2700_s11 + $0x20] sm:$0xff]  ;;  %v565_v26 = vrot.slane %v2713_v21, 1  ;;  %v195_v27 = vld [vmem:[%s2700_s11 + $0x10] sm:$0x3] }
  0x17   : >> { %2409 = vmatprep.subr.bf16.mxu0 %v2408_v14  ;;  %2481 = vmatprep.subr.bf16.mxu1 %v2408_v14  ;;  %v566_v28 = vrot.slane %v2717_v25, 1  ;;  %v212_v29 = vrot.slane %v195_v27, 1  ;;  %v2007_v30 = vld [vmem:[%s2700_s11 + $0x28] sm:$0x3]  ;;  %v1999_v40 = vld [vmem:[%s2930_s1 + $0x50] sm:$0xff]  ;;  %v2000_v41 = vld [vmem:[%s2930_s1 + $0x58] sm:$0xff] }
  0x18   : >> { %v211_v31 = vsel %vm208_vm2, %v209_v23, %v210_v24  ;;  %v568_v32 = vrot.slane %v2007_v30, 1  ;;  %v1998_v38 = vld [vmem:[%s2930_s1 + $0x48] sm:$0xff]  ;;  %v379_v42 = vrot.slane %v193_v19, 2  ;;  %v380_v43 = vrot.slane %v2710_v20, 2  ;;  %v2008_v47 = vld [vmem:[%s2930_s1 + $0x60] sm:$0xff]  ;;  %v2010_v54 = vld [vmem:[%s2930_s1 + $0x70] sm:$0xff] }
  0x19   : >> { %2200 = vmatprep.mubr.msk.f32.mxu0 %vm214_vm3, %v211_v31  ;;  %v2726_v33 = vsel %vm208_vm2, %v565_v26, %v566_v28  ;;  %v213_v34 = vsel %vm208_vm2, %v210_v24, %v212_v29  ;;  %v2420_v39 = vpack.c.bf16 %v1998_v38, %v1997_v37  ;;  %v656_v44 = vrot.slane %v2713_v21, 2  ;;  %v2009_v48 = vld [vmem:[%s2930_s1 + $0x68] sm:$0xff]  ;;  %v2011_v55 = vld [vmem:[%s2930_s1 + $0x78] sm:$0xff]  ;;  %v2014_v59 = vld [vmem:[%s2930_s1 + $0x80] sm:$0xff]  ;;  %p186_p4 = scmp.ge.s32.totalorder %s189_s24, 3  }
  0x1a   : >> { %2411 = vmatpush3.bf16.msra.mxu0 %v2408_v14  ;;  %2483 = vmatpush3.bf16.msra.mxu1 %v2408_v14  ;;  %v2732_v36 = vsel %vm208_vm2, %v566_v28, %v568_v32  ;;  %v657_v45 = vrot.slane %v2717_v25, 2  ;;  %v2424_v46 = vpack.c.bf16 %v2000_v41, %v1999_v40  ;;  %v381_v49 = vsel %vm378_vm4, %v379_v42, %v380_v43  ;;  %v2015_v60 = vld [vmem:[%s2930_s1 + $0x88] sm:$0xff]  ;;  %v2792_v61 = vld [vmem:[%s2700_s11 + $0x30] sm:$0xff]  ;;  %v2799_v63 = vld [vmem:[%s2700_s11 + $0x38] sm:$0xff] }
  0x1b   : >> { %2413 = vmatprep.subr.bf16.mxu0 %v2412_v22  ;;  %2299 = vmatprep.mubr.msk.f32.mxu1 %vm214_vm3, %v2726_v33  ;;  %v382_v51 = vrot.slane %v195_v27, 2  ;;  %v659_v52 = vrot.slane %v2007_v30, 2  ;;  %v2428_v53 = vpack.c.bf16 %v2009_v48, %v2008_v47  ;;  %v2432_v58 = vpack.c.bf16 %v2011_v55, %v2010_v54  ;;  %v2016_v0 = vld [vmem:[%s2930_s1 + $0x90] sm:$0xff]  ;;  %v2017_v2 = vld [vmem:[%s2930_s1 + $0x98] sm:$0xff]  ;;  %v2030_v6 = vld [vmem:[%s2700_s11 + $0x40] sm:$0x3] }
  0x1c   : >> { %2485 = vmatprep.subr.bf16.mxu1 %v2412_v22  ;;  %v2767_v50 = vsel %vm378_vm4, %v656_v44, %v657_v45  ;;  %v2436_v62 = vpack.c.bf16 %v2015_v60, %v2014_v59  ;;  %v842_v3 = vrot.slane %v2792_v61, 1  ;;  %v843_v4 = vrot.slane %v2799_v63, 1  ;;  %v2020_v9 = vld [vmem:[%s2930_s1 + $0xa0] sm:$0xff]  ;;  %v2021_v10 = vld [vmem:[%s2930_s1 + $0xa8] sm:$0xff]  ;;  %v2022_v14 = vld [vmem:[%s2930_s1 + $0xb0] sm:$0xff] }
  0x1d   : >> { %2201 = vmatmul.mubr.msk.f32.vlgmr.msra.gmra.mrb[0].mxu0 %vm214_vm3, %v213_v34  ;;  %2300 = vmatmul.mubr.msk.f32.vlgmr.msra.gmra.mrb[0].mxu1 %vm214_vm3, %v2732_v36  ;;  %v383_v56 = vsel %vm378_vm4, %v380_v43, %v382_v51  ;;  %v2780_v57 = vsel %vm378_vm4, %v657_v45, %v659_v52  ;;  %v2440_v5 = vpack.c.bf16 %v2017_v2, %v2016_v0  ;;  %v845_v12 = vrot.slane %v2030_v6, 1  ;;  %v2023_v15 = vld [vmem:[%s2930_s1 + $0xb8] sm:$0xff]  ;;  %v2037_v29 = vld [vmem:[%s2930_s1 + $0xe0] sm:$0xff]  ;;  %v2038_v30 = vld [vmem:[%s2930_s1 + $0xe8] sm:$0xff] }
  0x1e   : >> { %2415 = vmatpush3.bf16.msra.mxu0 %v2412_v22  ;;  %2487 = vmatpush3.bf16.msra.mxu1 %v2412_v22  ;;  %v2821_v11 = vsel %vm208_vm2, %v842_v3, %v843_v4  ;;  %v2444_v13 = vpack.c.bf16 %v2021_v10, %v2020_v9  ;;  %v933_v16 = vrot.slane %v2792_v61, 2  ;;  %v934_v17 = vrot.slane %v2799_v63, 2  ;;  %v2034_v26 = vld [vmem:[%s2930_s1 + $0xd8] sm:$0xff]  ;;  %v2063_v31 = vld [vmem:[%s2700_s11 + $0x48] sm:$0xff]  ;;  %v2039_v34 = vld [vmem:[%s2930_s1 + $0xf0] sm:$0xff] }
  0x1f   : >> { %2417 = vmatprep.subr.bf16.mxu0 %v2416_v35  ;;  %2489 = vmatprep.subr.bf16.mxu1 %v2416_v35  ;;  %v2836_v18 = vsel %vm208_vm2, %v843_v4, %v845_v12  ;;  %v936_v23 = vrot.slane %v2030_v6, 2  ;;  %v2460_v32 = vpack.c.bf16 %v2038_v30, %v2037_v29  ;;  %v2043_v40 = vld [vmem:[%s2930_s1 + $0x100] sm:$0xff]  ;;  %v2044_v41 = vld [vmem:[%s2930_s1 + $0x108] sm:$0xff]  ;;  %v2045_v45 = vld [vmem:[%s2930_s1 + $0x110] sm:$0xff]  ;;  %v1653_v47 = vrot.slane %v2063_v31, 2 }
  0x20   : >> { %2211 = vmatprep.mubr.msk.f32.mxu0 %vm214_vm3, %v193_v19  ;;  %2310 = vmatprep.mubr.msk.f32.mxu1 %vm214_vm3, %v2713_v21  ;;  %v2448_v19 = vpack.c.bf16 %v2023_v15, %v2022_v14  ;;  %v2849_v22 = vsel %vm378_vm4, %v933_v16, %v934_v17  ;;  %v2468_v44 = vpack.c.bf16 %v2044_v41, %v2043_v40  ;;  %v2625_v54 = vmov 0.0|0.0  }
  0x21   : >> { %v2862_v27 = vsel %vm378_vm4, %v934_v17, %v936_v23  ;;  %v2627_v55 = vmov 0.0  }
  0x22   : >> { %2419 = vmatpush3.bf16.msra.mxu0 %v2416_v35  ;;  %2491 = vmatpush3.bf16.msra.mxu1 %v2416_v35  ;;  %v2040_v35 = vld [vmem:[%s2930_s1 + $0xf8] sm:$0xff] }
  0x23   : >> { %2421 = vmatprep.subr.bf16.mxu0 %v2420_v39  ;;  %2493 = vmatprep.subr.bf16.mxu1 %v2420_v39  ;;  %v2464_v38 = vpack.c.bf16 %v2040_v35, %v2039_v34 }
  0x25   : >> { %2212 = vmatmul.mubr.msk.f32.vlgmr.msra.gmra.mrb[0].mxu0 %vm214_vm3, %v2710_v20  ;;  %2311 = vmatmul.mubr.msk.f32.vlgmr.msra.gmra.mrb[0].mxu1 %vm214_vm3, %v2717_v25  ;;  %v2031_v20 = vld [vmem:[%s2930_s1 + $0xc0] sm:$0xff] }
  0x26   : >> { %2423 = vmatpush3.bf16.msra.mxu0 %v2420_v39  ;;  %2495 = vmatpush3.bf16.msra.mxu1 %v2420_v39  ;;  %v2065_v39 = vld [vmem:[%s2700_s11 + $0x58] sm:$0x3] }
  0x27   : >> { %2425 = vmatprep.subr.bf16.mxu0 %v2424_v46  ;;  %2497 = vmatprep.subr.bf16.mxu1 %v2424_v46  ;;  %v1570_v43 = vrot.slane %v2065_v39, 1  ;;  %v1656_v52 = vrot.slane %v2065_v39, 2 }
  0x28   : >> { %2222 = vmatprep.mubr.msk.f32.mxu0 %vm214_vm3, %v381_v49  ;;  %2321 = vmatprep.mubr.msk.f32.mxu1 %vm214_vm3, %v2767_v50 }
  0x2a   : >> { %2427 = vmatpush3.bf16.msra.mxu0 %v2424_v46  ;;  %2499 = vmatpush3.bf16.msra.mxu1 %v2424_v46  ;;  %v2046_v46 = vld [vmem:[%s2930_s1 + $0x118] sm:$0xff] }
  0x2b   : >> { %2429 = vmatprep.subr.bf16.mxu0 %v2428_v53  ;;  %2501 = vmatprep.subr.bf16.mxu1 %v2428_v53 }
  0x2d   : >> { %2223 = vmatmul.mubr.msk.f32.vlgmr.msra.gmra.mrb[0].mxu0 %vm214_vm3, %v383_v56  ;;  %2322 = vmatmul.mubr.msk.f32.vlgmr.msra.gmra.mrb[0].mxu1 %vm214_vm3, %v2780_v57 }
  0x2e   : >> { %2431 = vmatpush3.bf16.msra.mxu0 %v2428_v53  ;;  %2503 = vmatpush3.bf16.msra.mxu1 %v2428_v53 }
  0x2f   : >> { %2433 = vmatprep.subr.bf16.mxu0 %v2432_v58  ;;  %2505 = vmatprep.subr.bf16.mxu1 %v2432_v58 }
  0x30   : >> { %2233 = vmatprep.mubr.msk.f32.mxu0 %vm214_vm3, %v2713_v21  ;;  %2332 = vmatprep.mubr.msk.f32.mxu1 %vm214_vm3, %v2792_v61  ;;  %v2032_v21 = vld [vmem:[%s2930_s1 + $0xc8] sm:$0xff] }
  0x31   : >> { %v2452_v24 = vpack.c.bf16 %v2032_v21, %v2031_v20 }
  0x32   : >> { %2435 = vmatpush3.bf16.msra.mxu0 %v2432_v58  ;;  %2507 = vmatpush3.bf16.msra.mxu1 %v2432_v58 }
  0x33   : >> { %2437 = vmatprep.subr.bf16.mxu0 %v2436_v62  ;;  %2509 = vmatprep.subr.bf16.mxu1 %v2436_v62 }
  0x35   : >> { %2234 = vmatmul.mubr.msk.f32.vlgmr.msra.gmra.mrb[0].mxu0 %vm214_vm3, %v2717_v25  ;;  %2333 = vmatmul.mubr.msk.f32.vlgmr.msra.gmra.mrb[0].mxu1 %vm214_vm3, %v2799_v63  ;;  %v2033_v25 = vld [vmem:[%s2930_s1 + $0xd0] sm:$0xff] }
  0x36   : >> { %2439 = vmatpush3.bf16.msra.mxu0 %v2436_v62  ;;  %2511 = vmatpush3.bf16.msra.mxu1 %v2436_v62  ;;  %v2456_v28 = vpack.c.bf16 %v2034_v26, %v2033_v25 }
  0x37   : >> { %2441 = vmatprep.subr.bf16.mxu0 %v2440_v5  ;;  %2513 = vmatprep.subr.bf16.mxu1 %v2440_v5 }
  0x38   : >> { %2244 = vmatprep.mubr.msk.f32.mxu0 %vm214_vm3, %v2726_v33  ;;  %2343 = vmatprep.mubr.msk.f32.mxu1 %vm214_vm3, %v2821_v11  ;;  %v2064_v33 = vld [vmem:[%s2700_s11 + $0x50] sm:$0xff] }
  0x39   : >> { %v1568_v37 = vrot.slane %v2064_v33, 1  ;;  %v1654_v48 = vrot.slane %v2064_v33, 2 }
  0x3a   : >> { %2443 = vmatpush3.bf16.msra.mxu0 %v2440_v5  ;;  %2515 = vmatpush3.bf16.msra.mxu1 %v2440_v5 }
  0x3b   : >> { %2445 = vmatprep.subr.bf16.mxu0 %v2444_v13  ;;  %2517 = vmatprep.subr.bf16.mxu1 %v2444_v13  ;;  %v1571_v49 = vsel %vm208_vm2, %v1568_v37, %v1570_v43  ;;  %v1655_v51 = vsel %vm378_vm4, %v1653_v47, %v1654_v48  ;;  %v1657_v53 = vsel %vm378_vm4, %v1654_v48, %v1656_v52 }
  0x3d   : >> { %2245 = vmatmul.mubr.msk.f32.vlgmr.msra.gmra.mrb[0].mxu0 %vm214_vm3, %v2732_v36  ;;  %2344 = vmatmul.mubr.msk.f32.vlgmr.msra.gmra.mrb[0].mxu1 %vm214_vm3, %v2836_v18  ;;  %v1567_v36 = vrot.slane %v2063_v31, 1 }
  0x3e   : >> { %2447 = vmatpush3.bf16.msra.mxu0 %v2444_v13  ;;  %2519 = vmatpush3.bf16.msra.mxu1 %v2444_v13 }
  0x3f   : >> { %2449 = vmatprep.subr.bf16.mxu0 %v2448_v19  ;;  %2521 = vmatprep.subr.bf16.mxu1 %v2448_v19  ;;  %v1569_v42 = vsel %vm208_vm2, %v1567_v36, %v1568_v37 }
  0x40   : >> { %2255 = vmatprep.mubr.msk.f32.mxu0 %vm214_vm3, %v2767_v50  ;;  %2354 = vmatprep.mubr.msk.f32.mxu1 %vm214_vm3, %v2849_v22  ;;  %v2472_v50 = vpack.c.bf16 %v2046_v46, %v2045_v45 }
  0x42   : >> { %2451 = vmatpush3.bf16.msra.mxu0 %v2448_v19  ;;  %2523 = vmatpush3.bf16.msra.mxu1 %v2448_v19 }
  0x43   : >> { %2453 = vmatprep.subr.bf16.mxu0 %v2452_v24  ;;  %2525 = vmatprep.subr.bf16.mxu1 %v2452_v24 }
  0x45   : >> { %2256 = vmatmul.mubr.msk.f32.vlgmr.msra.gmra.mrb[0].mxu0 %vm214_vm3, %v2780_v57  ;;  %2355 = vmatmul.mubr.msk.f32.vlgmr.msra.gmra.mrb[0].mxu1 %vm214_vm3, %v2862_v27 }
  0x46   : >> { %2455 = vmatpush3.bf16.msra.mxu0 %v2452_v24  ;;  %2527 = vmatpush3.bf16.msra.mxu1 %v2452_v24 }
  0x47   : >> { %2457 = vmatprep.subr.bf16.mxu0 %v2456_v28  ;;  %2529 = vmatprep.subr.bf16.mxu1 %v2456_v28 }
  0x48   : >> { %2266 = vmatprep.mubr.msk.f32.mxu0 %vm214_vm3, %v2792_v61  ;;  %2365 = vmatprep.mubr.msk.f32.mxu1 %vm214_vm3, %v2063_v31 }
  0x4a   : >> { %2459 = vmatpush3.bf16.msra.mxu0 %v2456_v28  ;;  %2531 = vmatpush3.bf16.msra.mxu1 %v2456_v28 }
  0x4b   : >> { %2461 = vmatprep.subr.bf16.mxu0 %v2460_v32  ;;  %2533 = vmatprep.subr.bf16.mxu1 %v2460_v32 }
  0x4d   : >> { %2267 = vmatmul.mubr.msk.f32.vlgmr.msra.gmra.mrb[0].mxu0 %vm214_vm3, %v2799_v63  ;;  %2366 = vmatmul.mubr.msk.f32.vlgmr.msra.gmra.mrb[0].mxu1 %vm214_vm3, %v2064_v33 }
  0x4e   : >> { %2463 = vmatpush3.bf16.msra.mxu0 %v2460_v32  ;;  %2535 = vmatpush3.bf16.msra.mxu1 %v2460_v32 }
  0x4f   : >> { %2465 = vmatprep.subr.bf16.mxu0 %v2464_v38  ;;  %2537 = vmatprep.subr.bf16.mxu1 %v2464_v38 }
  0x50   : >> { %2277 = vmatprep.mubr.msk.f32.mxu0 %vm214_vm3, %v2821_v11  ;;  %2376 = vmatprep.mubr.msk.f32.mxu1 %vm214_vm3, %v1569_v42 }
  0x52   : >> { %2467 = vmatpush3.bf16.msra.mxu0 %v2464_v38  ;;  %2539 = vmatpush3.bf16.msra.mxu1 %v2464_v38 }
  0x53   : >> { %2469 = vmatprep.subr.bf16.mxu0 %v2468_v44  ;;  %2541 = vmatprep.subr.bf16.mxu1 %v2468_v44 }
  0x55   : >> { %2278 = vmatmul.mubr.msk.f32.vlgmr.msra.gmra.mrb[0].mxu0 %vm214_vm3, %v2836_v18  ;;  %2377 = vmatmul.mubr.msk.f32.vlgmr.msra.gmra.mrb[0].mxu1 %vm214_vm3, %v1571_v49 }
  0x56   : >> { %2471 = vmatpush3.bf16.msra.mxu0 %v2468_v44  ;;  %2543 = vmatpush3.bf16.msra.mxu1 %v2468_v44 }
  0x57   : >> { %2473 = vmatprep.subr.bf16.mxu0 %v2472_v50  ;;  %2545 = vmatprep.subr.bf16.mxu1 %v2472_v50 }
  0x58   : >> { %2288 = vmatprep.mubr.msk.f32.mxu0 %vm214_vm3, %v2849_v22  ;;  %2387 = vmatprep.mubr.msk.f32.mxu1 %vm214_vm3, %v1655_v51 }
  0x5a   : >> { %2475 = vmatpush3.bf16.msra.mxu0 %v2472_v50  ;;  %2547 = vmatpush3.bf16.msra.mxu1 %v2472_v50 }
  0x5b   : >> { %2548 = vmatprep.subr.bf16.mxu0 %v2625_v54  ;;  %2551 = vmatprep.subr.bf16.mxu1 %v2625_v54 }
  0x5d   : >> { %2289 = vmatmul.mubr.msk.f32.vlgmr.msra.gmra.mrb[0].mxu0 %vm214_vm3, %v2862_v27  ;;  %2388 = vmatmul.mubr.msk.f32.vlgmr.msra.gmra.mrb[0].mxu1 %vm214_vm3, %v1657_v53 }
  0x5e   : >> { %2394 = vmatprep.mubr.msk.f32.mxu0 %vm2626_vm5, %v2627_v55  ;;  %2401 = vmatprep.mubr.msk.f32.mxu1 %vm2626_vm5, %v2627_v55 }
 0x130   : >> { %v2290_v56 = vpop.f32.mrb[0].mxu0  ;;  %v2389_v57 = vpop.f32.mrb[0].mxu1 }
 0x131   : >> { %v1740_v58 = vmax.f32 %v2290_v56, %v2389_v57  ;;  %v1008_v59 = vpop.f32.mrb[1].mxu0  ;;  %v1728_v60 = vpop.f32.mrb[1].mxu1 }
 0x132   : >> { %v1739_v61 = vmax.f32 %v1008_v59, %v1728_v60 }
 0x133   : >> { %v1748_v62 = vadd.f32 %v2659_v1, %v1740_v58 }
 0x134   : >> { %v1747_v63 = vadd.f32 %v2659_v1, %v1739_v61 }
 0x135   : >> { %v1750_v0 = vmax.f32 %v1748_v62, 0.0 }
 0x136   : >> { %v1749_v2 = vmax.f32 %v1747_v63, 0.0 }
 0x138   : >> { %v2549_v3 = vpack.c.bf16 %v1750_v0, %v1749_v2 }
 0x13a   : >> { %2550 = vmatpush3.bf16.msra.mxu0 %v2549_v3  ;;  %2553 = vmatpush3.bf16.msra.mxu1 %v2549_v3 }
 0x13d   : >> { %2395 = vmatmul.mubr.msk.f32.vlgmr.msra.gmra.mrb[2].mxu0 %vm1751_vm6, %v2671_v7  ;;  %2402 = vmatmul.mubr.msk.f32.vlgmr.msra.gmra.mrb[2].mxu1 %vm1751_vm6, %v2673_v8 }
 0x20d   : > { %188 = sbr.rel (!%p186_p4) target bundleno = 18 (0x12), region = 82 }
 0x210   : >> { %v1821_v4 = vpop.f32.mrb[2].mxu0  ;;  %v1894_v5 = vpop.f32.mrb[2].mxu1 }
 0x211   : >> { %v1898_v6 = vmax.f32 %v1821_v4, %v1894_v5  ;;  %v2396_v9 = vpop.f32.mrb[3].mxu0  ;;  %v2403_v10 = vpop.f32.mrb[3].mxu1 }
 0x213   : >> { %1901 = vst.msk [vmem:[%s1900_s5] sm:$0xff] %vm1751_vm6, %v1898_v6 }
 0x214 PF: > { %s13_s12 = sadd.s32 1, %s2618_s12  }
 0x215   : > { %p10_p5 = scmp.ge.s32.totalorder %s13_s12, 4  }
 0x217   :  { %12 = sbr.rel (!%p10_p5) target bundleno = 1 (0x1), region = 93 }

// kernel: cnn_symbol_grounder.4
= control target key start
LH: loop header
LB: loop body
LE: loop exit
PB: predicated region body
PF: predicated region fallthrough
CT: control target
= control target key end

     0   :  { %s4445_s12 = smov 0   ;;  %s5392_s0 = inlined_call_operand.vmem [shape: f32[2,38,78,3], index: 0, kind: input, shape index: {}]   ;;  %s5393_s1 = inlined_call_operand.vmem [shape: f32[9,3,16], index: 1, kind: input, shape index: {}]   ;;  %s5394_s2 = inlined_call_operand.vmem [shape: f32[1,16], index: 2, kind: input, shape index: {}]   ;;  %s5395_s3 = inlined_call_operand.vmem [shape: f32[2,18,38,16], index: 3, kind: output, shape index: {}]  }
   0x1 LB: > { %s3309_s13 = sadd.s32 4294967295, %s4414_s12   ;;  %p3313_p0 = scmp.ge.s32.totalorder %s4414_s12, 1  ;;  %s4414_s12 = sphi %s4445_s12, %s13_s12  }
   0x2   : > { %p137_p1 = scmp.lt.s32.totalorder %s4414_s12, 3 }
   0x4   : > { %p138_p2 = pnand %p3313_p0, %p137_p1 }
   0x5   : > { %p161_p3 = scmp.lt.s32.totalorder (!%p138_p2), %s3309_s13, 1  ;;  %v171_v0 = vlaneseq (!%p138_p2)  ;;  %v4456_v1 = vld [vmem:[%s5394_s2] ss:$0 sm:$0xff] (!%p138_p2)  ;;  %v4420_v14 = vmov (!%p138_p2), 0.0   ;;  %s4488_s24 = smov (!%p138_p2), 0  }
   0x6   : > { %141 = sbr.rel (%p138_p2) target bundleno = 661 (0x295), region = 32  ;;  %5426 = vst [vmem:[#allocation2_spill] sm:$0xff] (!%p138_p2), %v4456_v1 }
   0x7   : > { %v172_v2 = vshrl.u32 (!%p138_p2), %v171_v0, 7  ;;  %v178_v3 = vand.u32 (!%p138_p2), 127, %v171_v0 }
   0x9   : > { %v173_v4 = vadd.s32 (!%p138_p2), 8, %v172_v2  ;;  %v174_v5 = vadd.s32 (!%p138_p2), 16, %v172_v2  ;;  %v175_v6 = vadd.s32 (!%p138_p2), 24, %v172_v2  ;;  %v176_v7 = vadd.s32 (!%p138_p2), 32, %v172_v2 }
   0xa   : > { %v179_v8 = vmul.u32 (!%p138_p2), 2, %v172_v2 }
   0xb   : > { %v180_v9 = vmul.u32 (!%p138_p2), 2, %v173_v4  ;;  %v181_v10 = vmul.u32 (!%p138_p2), 2, %v174_v5 }
   0xc   : > { %v182_v11 = vmul.u32 (!%p138_p2), 2, %v175_v6  ;;  %v183_v12 = vmul.u32 (!%p138_p2), 2, %v176_v7  ;;  %vm184_vm0 = vcmp.eq.s32.totalorder (!%p138_p2), %v178_v3, %v179_v8  ;;  %v199_v13 = vadd.s32 (!%p138_p2), 1, %v179_v8 }
   0xd   : > { %s5527_s13 = smov (!%p161_p3, %s3309_s13), 1  ;;  %vm185_vm1 = vcmp.eq.s32.totalorder %v178_v3, %v180_v9  ;;  %vm186_vm2 = vcmp.eq.s32.totalorder %v178_v3, %v181_v10  ;;  %v4468_v15 = vsel %vm184_vm0, 1.0, %v4420_v14  ;;  %v200_v16 = vadd.s32 1, %v180_v9 }
   0xe   : > { %s4381_s16 = smul.u32 3040, %s5527_s13  ;;  %5427 = vst [vmem:[#allocation3_spill] sm:$0xff] %v4468_v15  ;;  %vm187_vm3 = vcmp.eq.s32.totalorder %v178_v3, %v182_v11  ;;  %vm188_vm4 = vcmp.eq.s32.totalorder %v178_v3, %v183_v12  ;;  %v4470_v17 = vsel %vm185_vm1, 1.0, %v4420_v14  ;;  %v4472_v18 = vsel %vm186_vm2, 1.0, %v4420_v14 }
   0xf   : > { %s4382_s17 = smul.u32 720, %s5527_s13  ;;  %5428 = vst [vmem:[#allocation4_spill] sm:$0xff] %v4470_v17  ;;  %5429 = vst [vmem:[#allocation5_spill] sm:$0xff] %v4472_v18  ;;  %v4474_v19 = vsel %vm187_vm3, 1.0, %v4420_v14  ;;  %v4476_v20 = vsel %vm188_vm4, 1.0, %v4420_v14  ;;  %v201_v21 = vadd.s32 1, %v181_v10  ;;  %vm204_vm5 = vcmp.eq.s32.totalorder %v178_v3, %v199_v13 }
  0x10   : > { %s4461_s20 = scalar_lea.vmem %s5392_s0, %s4381_s16  ;;  %5430 = vst [vmem:[#allocation6_spill] sm:$0xff] %v4474_v19  ;;  %5431 = vst [vmem:[#allocation7_spill] sm:$0xff] %v4476_v20  ;;  %v202_v22 = vadd.s32 1, %v182_v11  ;;  %v203_v23 = vadd.s32 1, %v183_v12  ;;  %vm205_vm6 = vcmp.eq.s32.totalorder %v178_v3, %v200_v16  ;;  %v4478_v24 = vsel %vm204_vm5, 1.0, %v4420_v14 }
  0x11   : > { %s4466_s23 = scalar_lea.vmem %s5395_s3, %s4382_s17  ;;  %vm206_vm7 = vcmp.eq.s32.totalorder %v178_v3, %v201_v21  ;;  %5432 = vst [vmem:[#allocation8_spill] sm:$0xff] %v4478_v24  ;;  %v4480_v25 = vsel %vm205_vm6, 1.0, %v4420_v14 }
  0x12   : > { %vm207_vm8 = vcmp.eq.s32.totalorder %v178_v3, %v202_v22  ;;  %5433 = vst [vmem:[#allocation9_spill] sm:$0xff] %v4480_v25  ;;  %vm208_vm9 = vcmp.eq.s32.totalorder %v178_v3, %v203_v23  ;;  %v4482_v26 = vsel %vm206_vm7, 1.0, %v4420_v14 }
  0x13   : > { %5434 = vst [vmem:[#allocation10_spill] sm:$0xff] %v4482_v26  ;;  %v4484_v27 = vsel %vm207_vm8, 1.0, %v4420_v14  ;;  %v4486_v28 = vsel %vm208_vm9, 1.0, %v4420_v14 }
  0x14   : > { %5435 = vst [vmem:[#allocation11_spill] sm:$0xff] %v4484_v27  ;;  %5436 = vst [vmem:[#allocation12_spill] sm:$0xff] %v4486_v28 }
  0x15 LB: >> { %v3328_v29 = vld [vmem:[%s5393_s1 + $0x4] sm:$0x7]  ;;  %vm293_vm10 = vcmask 1042432   ;;  %v239_v30 = vld [vmem:[%s5393_s1] sm:$0x7]  ;;  %s3327_s29 = smul.u32 160, %s4418_s24  ;;  %s4418_s24 = sphi %s4488_s24, %s225_s24  }
  0x16   : >> { %3813 = vmatprep.subr.msk.mxu0 %vm293_vm10, %v3328_v29  ;;  %3966 = vmatprep.subr.msk.mxu1 %vm293_vm10, %v3328_v29  ;;  %vm252_vm11 = vcmask 1046528   ;;  %vm272_vm12 = vcmask 23552   ;;  %v4587_v0 = vld [vmem:[%s5393_s1 + $0x8] sm:$0x7]  ;;  %vm552_vm13 = vcmask 1045504   ;;  %vm4422_vm14 = vmmov 0  }
  0x17   : >> { %3814 = vmatpush3.msk.msra.mxu0 %vm293_vm10, %v3328_v29  ;;  %3967 = vmatpush3.msk.msra.mxu1 %vm293_vm10, %v3328_v29  ;;  %s4507_s30 = scalar_lea.vmem %s4461_s20, %s3327_s29  ;;  %v4730_v25 = vld [vmem:[%s5393_s1 + $0xc] sm:$0x7]  ;;  %vm3020_vm15 = vcmask 1043456   ;;  %vm4424_vm0 = vmmov 1   ;;  %vm3004_vm2 = vcmask 621568   ;;  %s3224_s19 = smul.u32 40, %s4418_s24 }
  0x18   : >> { %3830 = vmatprep.subr.msk.mxu0 %vm293_vm10, %v239_v30  ;;  %3983 = vmatprep.subr.msk.mxu1 %vm293_vm10, %v239_v30  ;;  %v4510_v31 = vld [vmem:[%s4507_s30] sm:$0xff]  ;;  %v4513_v32 = vld [vmem:[%s4507_s30 + $0x8] sm:$0xff]  ;;  %v4516_v33 = vld [vmem:[%s4507_s30 + $0x50] sm:$0xff]  ;;  %vm3226_vm3 = vcmask 130048   ;;  %vm3231_vm4 = vcmask 128000   ;;  %s225_s24 = sadd.s32 1, %s4418_s24  }
  0x19   : >> { %v253_v34 = vrot.slane %v4510_v31, 1  ;;  %v254_v35 = vrot.slane %v4513_v32, 1  ;;  %v4521_v36 = vld [vmem:[%s4507_s30 + $0x58] sm:$0xff]  ;;  %v895_v37 = vrot.slane %v4516_v33, 1  ;;  %v4525_v38 = vld [vmem:[%s4507_s30 + $0x10] sm:$0xff]  ;;  %v4528_v39 = vld [vmem:[%s4507_s30 + $0x60] sm:$0xff]  ;;  %s3225_s21 = scalar_lea.vmem %s4466_s23, %s3224_s19 }
  0x1a   : >> { %v896_v40 = vrot.slane %v4521_v36, 1  ;;  %v256_v41 = vrot.slane %v4525_v38, 1  ;;  %v898_v42 = vrot.slane %v4528_v39, 1  ;;  %v4534_v43 = vld [vmem:[%s4507_s30 + $0x18] sm:$0xff]  ;;  %v4537_v44 = vld [vmem:[%s4507_s30 + $0x68] sm:$0xff]  ;;  %v4543_v48 = vld [vmem:[%s4507_s30 + $0x20] sm:$0xff] }
  0x1b   : >> { %v255_v45 = vsel %vm252_vm11, %v253_v34, %v254_v35  ;;  %v258_v46 = vrot.slane %v4534_v43, 1  ;;  %v900_v47 = vrot.slane %v4537_v44, 1  ;;  %v4546_v49 = vld [vmem:[%s4507_s30 + $0x70] sm:$0xff]  ;;  %v4549_v50 = vld [vmem:[%s4507_s30 + $0x28] sm:$0xff]  ;;  %v260_v54 = vrot.slane %v4543_v48, 1  ;;  %v4561_v55 = vld [vmem:[%s4507_s30 + $0x78] sm:$0xff] }
  0x1c   : >> { %3815 = vmatprep.mubr.msk.f32.mxu0 %vm272_vm12, %v255_v45  ;;  %v4553_v51 = vsel %vm252_vm11, %v895_v37, %v896_v40  ;;  %v257_v52 = vsel %vm252_vm11, %v254_v35, %v256_v41  ;;  %v4557_v53 = vsel %vm252_vm11, %v896_v40, %v898_v42  ;;  %v4564_v56 = vld [vmem:[%s4507_s30 + $0x30] sm:$0xff]  ;;  %v4567_v57 = vld [vmem:[%s4507_s30 + $0x80] sm:$0xff]  ;;  %v902_v60 = vrot.slane %v4546_v49, 1  ;;  %v4579_v62 = vld [vmem:[%s4507_s30 + $0x38] sm:$0xff]  ;;  %p222_p4 = scmp.ge.s32.totalorder %s225_s24, 18  }
  0x1d   : >> { %3968 = vmatprep.mubr.msk.f32.mxu1 %vm272_vm12, %v4553_v51  ;;  %3816 = vmatmul.mubr.msk.f32.vlgmr.msra.gmra.mrb[0].mxu0 %vm272_vm12, %v257_v52  ;;  %v259_v58 = vsel %vm252_vm11, %v256_v41, %v258_v46  ;;  %v4574_v59 = vsel %vm252_vm11, %v898_v42, %v900_v47  ;;  %v262_v61 = vrot.slane %v4549_v50, 1  ;;  %v4582_v63 = vld [vmem:[%s4507_s30 + $0x88] sm:$0xff]  ;;  %v261_v2 = vsel %vm252_vm11, %v258_v46, %v260_v54  ;;  %v4604_v9 = vld [vmem:[%s4507_s30 + $0x40] sm:$0xff]  ;;  %v4613_v12 = vld [vmem:[%s4507_s30 + $0x90] sm:$0xff] }
  0x1e   : >> { %3969 = vmatmul.mubr.msk.f32.vlgmr.msra.gmra.mrb[0].mxu1 %vm272_vm12, %v4557_v53  ;;  %3831 = vmatpush3.msk.msra.mxu0 %vm293_vm10, %v239_v30  ;;  %v904_v3 = vrot.slane %v4561_v55, 1  ;;  %v264_v4 = vrot.slane %v4564_v56, 1  ;;  %v4598_v5 = vsel %vm252_vm11, %v900_v47, %v902_v60  ;;  %v906_v7 = vrot.slane %v4567_v57, 1  ;;  %v4616_v13 = vld [vmem:[%s4507_s30 + $0x48] sm:$0x3f]  ;;  %v4667_v45 = vld [vmem:[%s4507_s30 + $0xa0] sm:$0xff]  ;;  %vm4203_vm1 = vmpackc.low %vm3020_vm15, %vm4424_vm0 }
  0x1f   : >> { %3984 = vmatpush3.msk.msra.mxu1 %vm293_vm10, %v239_v30  ;;  %3818 = vmatprep.mubr.msk.f32.mxu0 %vm272_vm12, %v259_v58  ;;  %5437 = vst [vmem:[#allocation13_spill] sm:$0xff] %v4598_v5  ;;  %v263_v6 = vsel %vm252_vm11, %v260_v54, %v262_v61  ;;  %v266_v8 = vrot.slane %v4579_v62, 1  ;;  %v908_v11 = vrot.slane %v4582_v63, 1  ;;  %v4622_v14 = vld [vmem:[%s4507_s30 + $0x98] sm:$0x3f]  ;;  %v268_v21 = vrot.slane %v4604_v9, 1 }
  0x20   : >> { %3971 = vmatprep.mubr.msk.f32.mxu1 %vm272_vm12, %v4574_v59  ;;  %v4609_v10 = vsel %vm252_vm11, %v902_v60, %v904_v3  ;;  %3847 = vmatprep.subr.msk.mxu0 %vm293_vm10, %v4587_v0  ;;  %v265_v16 = vsel %vm252_vm11, %v262_v61, %v264_v4  ;;  %v4634_v22 = vsel %vm252_vm11, %v904_v3, %v906_v7  ;;  %v910_v29 = vrot.slane %v4613_v12, 1  ;;  %v4670_v46 = vld [vmem:[%s4507_s30 + $0xb0] sm:$0xff]  ;;  %v4675_v54 = vld [vmem:[%s4507_s30 + $0xb8] sm:$0xff]  ;;  %v4678_v58 = vld [vmem:[%s4507_s30 + $0xc0] sm:$0xff] }
  0x21   : >> { %5438 = vst [vmem:[#allocation14_spill] sm:$0xff] %v4609_v10  ;;  %3819 = vmatmul.mubr.msk.f32.gmra.mrb[2].mxu0 %vm272_vm12, %v261_v2  ;;  %4000 = vmatprep.subr.msk.mxu1 %vm293_vm10, %v4587_v0  ;;  %5439 = vst [vmem:[#allocation15_spill] sm:$0xff] %v4634_v22  ;;  %v267_v23 = vsel %vm252_vm11, %v264_v4, %v266_v8  ;;  %v270_v30 = vrot.slane %v4616_v13, 1  ;;  %v4640_v34 = vsel %vm252_vm11, %v906_v7, %v908_v11  ;;  %v4682_v60 = vld [vmem:[%s4507_s30 + $0xa8] sm:$0xff]  ;;  %v4692_v7 = vld [vmem:[%s4507_s30 + $0xd0] sm:$0xff] }
  0x22   : >> { %3972 = vmatmul.mubr.msk.f32.gmra.mrb[2].mxu1 %vm272_vm12, %v4598_v5  ;;  %3821 = vmatprep.mubr.msk.f32.mxu0 %vm272_vm12, %v263_v6  ;;  %5440 = vst [vmem:[#allocation16_spill] sm:$0xff] %v4640_v34  ;;  %v4643_v35 = vrot.slane %v4622_v14, 1  ;;  %v269_v37 = vsel %vm252_vm11, %v266_v8, %v268_v21  ;;  %v4653_v40 = vsel %vm252_vm11, %v908_v11, %v910_v29  ;;  %v1406_v47 = vrot.slane %v4667_v45, 1  ;;  %v4689_v6 = vld [vmem:[%s4507_s30 + $0xc8] sm:$0xff] }
  0x23   : >> { %3974 = vmatprep.mubr.msk.f32.mxu1 %vm272_vm12, %v4609_v10  ;;  %5442 = vst [vmem:[#allocation18_spill] sm:$0xff] %v4653_v40  ;;  %v271_v41 = vsel %vm252_vm11, %v268_v21, %v270_v30  ;;  %v1409_v52 = vrot.slane %v4670_v46, 1  ;;  %v1578_v61 = vrot.slane %v4670_v46, 2  ;;  %v1411_v2 = vrot.slane %v4675_v54, 1  ;;  %v4715_v20 = vld [vmem:[%s4507_s30 + $0xe8] sm:$0x3f] }
  0x24   : >> { %5441 = vst [vmem:[#allocation17_spill] sm:$0xff] %v4643_v35  ;;  %v4658_v42 = vsel %vm252_vm11, %v910_v29, %v4643_v35  ;;  %v1580_v3 = vrot.slane %v4675_v54, 2  ;;  %v1413_v4 = vrot.slane %v4678_v58, 1  ;;  %v1582_v8 = vrot.slane %v4678_v58, 2  ;;  %v4706_v29 = vld [vmem:[%s4507_s30 + $0xe0] sm:$0xff] }
  0x25   : >> { %3822 = vmatmul.mubr.msk.f32.gmra.mrb[4].mxu0 %vm272_vm12, %v265_v16  ;;  %5443 = vst [vmem:[#allocation19_spill] sm:$0xff] %v4658_v42  ;;  %v1415_v11 = vrot.slane %v4689_v6, 1  ;;  %v1584_v16 = vrot.slane %v4689_v6, 2  ;;  %v1417_v21 = vrot.slane %v4692_v7, 1  ;;  %v1421_v28 = vrot.slane %v4706_v29, 1 }
  0x26   : >> { %3975 = vmatmul.mubr.msk.f32.gmra.mrb[4].mxu1 %vm272_vm12, %v4634_v22  ;;  %3824 = vmatprep.mubr.msk.f32.mxu0 %vm272_vm12, %v267_v23  ;;  %v4703_v23 = vld [vmem:[%s4507_s30 + $0xd8] sm:$0xff]  ;;  %v1590_v27 = vrot.slane %v4706_v29, 2  ;;  %v4719_v19 = vrot.slane %v4715_v20, 1  ;;  %v4722_v26 = vrot.slane %v4715_v20, 2  ;;  %v1407_v18 = vrot.slane %v4682_v60, 1 }
  0x27   : >> { %3977 = vmatprep.mubr.msk.f32.mxu1 %vm272_vm12, %v4640_v34  ;;  %v4733_v17 = vsel %vm252_vm11, %v1409_v52, %v1411_v2  ;;  %v4736_v24 = vsel %vm252_vm11, %v1411_v2, %v1413_v4  ;;  %v4739_v15 = vsel %vm252_vm11, %v1413_v4, %v1415_v11  ;;  %v4742_v1 = vsel %vm252_vm11, %v1415_v11, %v1417_v21 }
  0x28   : >> { %5444 = vst [vmem:[#allocation20_spill] sm:$0xff] %v4719_v19  ;;  %5445 = vst [vmem:[#allocation21_spill] sm:$0xff] %v4722_v26  ;;  %v5399_v4 = vrot.slane %v4682_v60, 2 }
  0x29   : >> { %3825 = vmatmul.mubr.msk.f32.gmra.mrb[6].mxu0 %vm272_vm12, %v269_v37  ;;  %v1419_v37 = vrot.slane %v4703_v23, 1  ;;  %5446 = vst [vmem:[#allocation22_spill] sm:$0xff] %v4736_v24  ;;  %5447 = vst [vmem:[#allocation23_spill] sm:$0xff] %v4739_v15 }
  0x2a   : >> { %3978 = vmatmul.mubr.msk.f32.gmra.mrb[6].mxu1 %vm272_vm12, %v4653_v40  ;;  %3827 = vmatprep.mubr.msk.f32.mxu0 %vm272_vm12, %v271_v41  ;;  %v1588_v41 = vrot.slane %v4703_v23, 2  ;;  %5448 = vst [vmem:[#allocation24_spill] sm:$0xff] %v4742_v1 }
  0x2b   : >> { %3980 = vmatprep.mubr.msk.f32.mxu1 %vm272_vm12, %v4658_v42  ;;  %v4752_v42 = vsel %vm252_vm11, %v1407_v18, %v1409_v52  ;;  %v4755_v2 = vsel %vm252_vm11, %v1417_v21, %v1419_v37  ;;  %v4763_v11 = vsel %vm252_vm11, %v1419_v37, %v1421_v28  ;;  %v4780_v52 = vsel %vm552_vm13, %v5399_v4, %v1578_v61  ;;  %v4803_v4 = vld [vmem:[%s4507_s30 + $0x108] sm:$0xff]  ;;  %v4818_v21 = vld [vmem:[%s4507_s30 + $0x100] sm:$0xff] }
  0x2c   : >> { %5449 = vst [vmem:[#allocation25_spill] sm:$0xff] %v4755_v2  ;;  %5450 = vst [vmem:[#allocation26_spill] sm:$0xff] %v4763_v11  ;;  %v4791_v37 = vsel %vm552_vm13, %v1582_v8, %v1584_v16  ;;  %v4846_v11 = vld [vmem:[%s4507_s30 + $0x138] sm:$0x3f]  ;;  %v2807_v34 = vrot.slane %v4818_v21, 2  ;;  %v2809_v15 = vrot.slane %v4803_v4, 2 }
  0x2d   : >> { %3828 = vmatmul.mubr.msk.f32.gmra.mrb[8].mxu0 %vm272_vm12, %v270_v30  ;;  %v1586_v30 = vrot.slane %v4692_v7, 2  ;;  %5453 = vst [vmem:[#allocation29_spill] sm:$0xff] %v4780_v52  ;;  %5455 = vst [vmem:[#allocation31_spill] sm:$0xff] %v4791_v37  ;;  %v4825_v37 = vld [vmem:[%s4507_s30 + $0x118] sm:$0xff]  ;;  %v2643_v52 = vrot.slane %v4818_v21, 1 }
  0x2e   : >> { %3981 = vmatmul.mubr.msk.f32.gmra.mrb[8].mxu1 %vm272_vm12, %v4643_v35  ;;  %3832 = vmatprep.mubr.msk.f32.mxu0 %vm272_vm12, %v4510_v31  ;;  %v4749_v35 = vsel %vm252_vm11, %v1406_v47, %v1407_v18  ;;  %v4767_v18 = vsel %vm252_vm11, %v1421_v28, %v4719_v19  ;;  %v4770_v47 = vsel %vm552_vm13, %v1578_v61, %v1580_v3  ;;  %v4852_v2 = vld [vmem:[%s4507_s30 + $0xf8] sm:$0xff] }
  0x2f   : >> { %3985 = vmatprep.mubr.msk.f32.mxu1 %vm272_vm12, %v4516_v33  ;;  %5451 = vst [vmem:[#allocation27_spill] sm:$0xff] %v4767_v18  ;;  %5452 = vst [vmem:[#allocation28_spill] sm:$0xff] %v4770_v47  ;;  %v4783_v28 = vsel %vm552_vm13, %v1580_v3, %v1582_v8  ;;  %v4797_v61 = vsel %vm552_vm13, %v1586_v30, %v1588_v41  ;;  %v4800_v3 = vld [vmem:[%s4507_s30 + $0xf0] sm:$0xff]  ;;  %v1064_v8 = vrot.slane %v4516_v33, 2  ;;  %v2641_v10 = vrot.slane %v4852_v2, 1 }
  0x30   : >> { %5454 = vst [vmem:[#allocation30_spill] sm:$0xff] %v4783_v28  ;;  %5457 = vst [vmem:[#allocation33_spill] sm:$0xff] %v4797_v61  ;;  %v2645_v61 = vrot.slane %v4803_v4, 1  ;;  %v4839_v28 = vld [vmem:[%s4507_s30 + $0x130] sm:$0xff]  ;;  %v2640_v47 = vrot.slane %v4800_v3, 1  ;;  %v2804_v40 = vrot.slane %v4800_v3, 2 }
  0x31   : >> { %3833 = vmatmul.mubr.msk.f32.vlgmr.msra.gmra.mrb[0].mxu0 %vm272_vm12, %v4513_v32  ;;  %5458 = vst [vmem:[#allocation34_spill] sm:$0xff] %v4800_v3  ;;  %5459 = vst [vmem:[#allocation35_spill] sm:$0xff] %v4803_v4  ;;  %v2655_v1 = vrot.slane %v4839_v28, 1 }
  0x32   : >> { %3986 = vmatmul.mubr.msk.f32.vlgmr.msra.gmra.mrb[0].mxu1 %vm272_vm12, %v4521_v36  ;;  %3848 = vmatpush3.msk.msra.mxu0 %vm293_vm10, %v4587_v0  ;;  %5462 = vst [vmem:[#allocation38_spill] sm:$0xff] %v4818_v21  ;;  %v4864_v3 = vsel %vm252_vm11, %v2643_v52, %v2645_v61 }
  0x33   : >> { %4001 = vmatpush3.msk.msra.mxu1 %vm293_vm10, %v4587_v0  ;;  %3835 = vmatprep.mubr.msk.f32.mxu0 %vm272_vm12, %v4525_v38  ;;  %v4794_v0 = vsel %vm552_vm13, %v1584_v16, %v1586_v30  ;;  %v4811_v16 = vsel %vm552_vm13, %v1588_v41, %v1590_v27  ;;  %v4815_v30 = vsel %vm552_vm13, %v1590_v27, %v4722_v26  ;;  %v1065_v41 = vrot.slane %v4521_v36, 2  ;;  %v4833_v26 = vld [vmem:[%s4507_s30 + $0x120] sm:$0xff] }
  0x34   : >> { %3988 = vmatprep.mubr.msk.f32.mxu1 %vm272_vm12, %v4528_v39  ;;  %3864 = vmatprep.subr.msk.mxu0 %vm293_vm10, %v4730_v25  ;;  %5456 = vst [vmem:[#allocation32_spill] sm:$0xff] %v4794_v0  ;;  %5460 = vst [vmem:[#allocation36_spill] sm:$0xff] %v4811_v16  ;;  %v4822_v0 = vld [vmem:[%s4507_s30 + $0x110] sm:$0xff]  ;;  %v2649_v27 = vrot.slane %v4825_v37, 1  ;;  %v2651_v19 = vrot.slane %v4833_v26, 1 }
  0x35   : >> { %3836 = vmatmul.mubr.msk.f32.gmra.mrb[2].mxu0 %vm272_vm12, %v4534_v43  ;;  %4017 = vmatprep.subr.msk.mxu1 %vm293_vm10, %v4730_v25  ;;  %5461 = vst [vmem:[#allocation37_spill] sm:$0xff] %v4815_v30  ;;  %v2647_v16 = vrot.slane %v4822_v0, 1  ;;  %v4836_v30 = vld [vmem:[%s4507_s30 + $0x128] sm:$0xff]  ;;  %5463 = vst [vmem:[#allocation39_spill] sm:$0xff] %v4864_v3  ;;  %v4884_v3 = vsel %vm252_vm11, %v2640_v47, %v2641_v10  ;;  %v5472_v47 = vrot.slane %v4510_v31, 2 }
  0x36   : >> { %3989 = vmatmul.mubr.msk.f32.gmra.mrb[2].mxu1 %vm272_vm12, %v4537_v44  ;;  %3838 = vmatprep.mubr.msk.f32.mxu0 %vm272_vm12, %v4543_v48  ;;  %v2653_v18 = vrot.slane %v4836_v30, 1  ;;  %v4875_v21 = vsel %vm252_vm11, %v2649_v27, %v2651_v19 }
  0x37   : >> { %3991 = vmatprep.mubr.msk.f32.mxu1 %vm272_vm12, %v4546_v49  ;;  %v4867_v24 = vsel %vm252_vm11, %v2645_v61, %v2647_v16  ;;  %v4872_v22 = vsel %vm252_vm11, %v2647_v16, %v2649_v27  ;;  %5465 = vst [vmem:[#allocation41_spill] sm:$0xff] %v4875_v21  ;;  %v4887_v61 = vsel %vm252_vm11, %v2641_v10, %v2643_v52  ;;  %v2805_v27 = vrot.slane %v4852_v2, 2 }
  0x38   : >> { %5464 = vst [vmem:[#allocation40_spill] sm:$0xff] %v4867_v24  ;;  %v4878_v5 = vsel %vm252_vm11, %v2651_v19, %v2653_v18  ;;  %v4881_v4 = vsel %vm252_vm11, %v2653_v18, %v2655_v1  ;;  %v5466_v24 = vrot.slane %v4846_v11, 1  ;;  %v556_v21 = vrot.slane %v4525_v38, 2 }
  0x39   : >> { %3839 = vmatmul.mubr.msk.f32.gmra.mrb[4].mxu0 %vm272_vm12, %v4549_v50  ;;  %v2811_v19 = vrot.slane %v4822_v0, 2  ;;  %v2813_v10 = vrot.slane %v4825_v37, 2  ;;  %v4911_v38 = vsel %vm552_vm13, %v2807_v34, %v2809_v15  ;;  %v5471_v18 = vrot.slane %v4513_v32, 2 }
  0x3a   : >> { %3992 = vmatmul.mubr.msk.f32.gmra.mrb[4].mxu1 %vm272_vm12, %v4561_v55  ;;  %3841 = vmatprep.mubr.msk.f32.mxu0 %vm272_vm12, %v4564_v56  ;;  %v4892_v16 = vsel %vm252_vm11, %v2655_v1, %v5466_v24  ;;  %v4905_v1 = vsel %vm552_vm13, %v2804_v40, %v2805_v27  ;;  %v4908_v24 = vsel %vm552_vm13, %v2805_v27, %v2807_v34  ;;  %v558_v27 = vrot.slane %v4534_v43, 2 }
  0x3b   : >> { %3994 = vmatprep.mubr.msk.f32.mxu1 %vm272_vm12, %v4567_v57  ;;  %5467 = vst [vmem:[#allocation42_spill] sm:$0xff] %v4892_v16  ;;  %5468 = vst [vmem:[#allocation43_spill] sm:$0xff] %v4905_v1  ;;  %v555_v52 = vsel %vm552_vm13, %v5472_v47, %v5471_v18  ;;  %v1067_v16 = vrot.slane %v4528_v39, 2  ;;  %v4922_v40 = vsel %vm552_vm13, %v1064_v8, %v1065_v41  ;;  %v1069_v34 = vrot.slane %v4537_v44, 2 }
  0x3c   : >> { %5469 = vst [vmem:[#allocation44_spill] sm:$0xff] %v4908_v24  ;;  %5470 = vst [vmem:[#allocation45_spill] sm:$0xff] %v4911_v38  ;;  %v2815_v38 = vrot.slane %v4833_v26, 2  ;;  %v4930_v24 = vsel %vm552_vm13, %v2809_v15, %v2811_v19  ;;  %v5474_v31 = vmov %v5471_v18  ;;  %v560_v43 = vrot.slane %v4543_v48, 2 }
  0x3d   : >> { %3842 = vmatmul.mubr.msk.f32.gmra.mrb[6].mxu0 %vm272_vm12, %v4579_v62  ;;  %5473 = vst [vmem:[#allocation46_spill] sm:$0xff] %v4930_v24  ;;  %v557_v8 = vsel %vm552_vm13, %v5474_v31, %v556_v21  ;;  %v2817_v18 = vrot.slane %v4836_v30, 2  ;;  %v4941_v47 = vsel %vm552_vm13, %v2811_v19, %v2813_v10  ;;  %v4946_v15 = vsel %vm552_vm13, %v1065_v41, %v1067_v16  ;;  %v3387_v19 = vld [vmem:[%s5393_s1 + $0x10] sm:$0x7] }
  0x3e   : >> { %3995 = vmatmul.mubr.msk.f32.gmra.mrb[6].mxu1 %vm272_vm12, %v4582_v63  ;;  %3844 = vmatprep.mubr.msk.f32.mxu0 %vm272_vm12, %v4604_v9  ;;  %5475 = vst [vmem:[#allocation47_spill] sm:$0xff] %v4941_v47  ;;  %v1071_v24 = vrot.slane %v4546_v49, 2  ;;  %v559_v32 = vsel %vm552_vm13, %v556_v21, %v558_v27  ;;  %v1073_v31 = vrot.slane %v4561_v55, 2  ;;  %v4954_v48 = vsel %vm552_vm13, %v1067_v16, %v1069_v34 }
  0x3f   : >> { %3997 = vmatprep.mubr.msk.f32.mxu1 %vm272_vm12, %v4613_v12  ;;  %v2819_v41 = vrot.slane %v4839_v28, 2  ;;  %v4961_v47 = vsel %vm552_vm13, %v2813_v10, %v2815_v38  ;;  %v564_v21 = vrot.slane %v4564_v56, 2  ;;  %v2821_v16 = vrot.slane %v4846_v11, 2 }
  0x40   : >> { %5476 = vst [vmem:[#allocation48_spill] sm:$0xff] %v4961_v47  ;;  %v4977_v10 = vsel %vm552_vm13, %v1069_v34, %v1071_v24  ;;  %v1075_v1 = vrot.slane %v4567_v57, 2  ;;  %v4985_v56 = vsel %vm552_vm13, %v1071_v24, %v1073_v31  ;;  %v568_v24 = vrot.slane %v4604_v9, 2 }
  0x41   : >> { %3845 = vmatmul.mubr.msk.f32.gmra.mrb[8].mxu0 %vm272_vm12, %v4616_v13  ;;  %v5002_v34 = vsel %vm552_vm13, %v2819_v41, %v2821_v16  ;;  %v5016_v9 = vrot.slane %v4622_v14, 2 }
  0x42   : >> { %3998 = vmatmul.mubr.msk.f32.gmra.mrb[8].mxu1 %vm272_vm12, %v4622_v14  ;;  %3849 = vmatprep.mubr.msk.f32.mxu0 %vm272_vm12, %v555_v52  ;;  %v562_v52 = vrot.slane %v4549_v50, 2  ;;  %v561_v50 = vsel %vm552_vm13, %v558_v27, %v560_v43  ;;  %v566_v27 = vrot.slane %v4579_v62, 2 }
  0x43   : >> { %4002 = vmatprep.mubr.msk.f32.mxu1 %vm272_vm12, %v4922_v40 }
  0x44   : >> { %v563_v47 = vsel %vm552_vm13, %v560_v43, %v562_v52  ;;  %v565_v62 = vsel %vm552_vm13, %v562_v52, %v564_v21  ;;  %v5007_v43 = vsel %vm552_vm13, %v1073_v31, %v1075_v1  ;;  %v569_v31 = vsel %vm552_vm13, %v566_v27, %v568_v24 }
  0x45   : >> { %3850 = vmatmul.mubr.msk.f32.vlgmr.msra.gmra.mrb[0].mxu0 %vm272_vm12, %v557_v8  ;;  %v4971_v8 = vsel %vm552_vm13, %v2815_v38, %v2817_v18  ;;  %v1077_v38 = vrot.slane %v4582_v63, 2 }
  0x46   : >> { %4003 = vmatmul.mubr.msk.f32.vlgmr.msra.gmra.mrb[0].mxu1 %vm272_vm12, %v4946_v15  ;;  %3865 = vmatpush3.msk.msra.mxu0 %vm293_vm10, %v4730_v25 }
  0x47   : >> { %4018 = vmatpush3.msk.msra.mxu1 %vm293_vm10, %v4730_v25  ;;  %3852 = vmatprep.mubr.msk.f32.mxu0 %vm272_vm12, %v559_v32  ;;  %v4992_v25 = vsel %vm552_vm13, %v2817_v18, %v2819_v41  ;;  %v567_v18 = vsel %vm552_vm13, %v564_v21, %v566_v27  ;;  %v1079_v32 = vrot.slane %v4613_v12, 2  ;;  %v5013_v52 = vsel %vm552_vm13, %v1075_v1, %v1077_v38 }
  0x48   : >> { %4005 = vmatprep.mubr.msk.f32.mxu1 %vm272_vm12, %v4954_v48  ;;  %3881 = vmatprep.subr.msk.mxu0 %vm293_vm10, %v3387_v19  ;;  %v5489_v21 = vrot.slane %v4682_v60, 2 }
  0x49   : >> { %3853 = vmatmul.mubr.msk.f32.gmra.mrb[2].mxu0 %vm272_vm12, %v561_v50  ;;  %4034 = vmatprep.subr.msk.mxu1 %vm293_vm10, %v3387_v19  ;;  %v5031_v41 = vsel %vm552_vm13, %v1079_v32, %v5016_v9  ;;  %v3399_v50 = vld [vmem:[%s5393_s1 + $0x14] sm:$0x7] }
  0x4a   : >> { %4006 = vmatmul.mubr.msk.f32.gmra.mrb[2].mxu1 %vm272_vm12, %v4977_v10  ;;  %3855 = vmatprep.mubr.msk.f32.mxu0 %vm272_vm12, %v563_v47  ;;  %v570_v47 = vrot.slane %v4616_v13, 2  ;;  %v5026_v13 = vsel %vm552_vm13, %v1077_v38, %v1079_v32  ;;  %v5490_v38 = vld [vmem:[#allocation17_spill] sm:$0xff]  ;;  %v5495_v32 = vld [vmem:[#allocation31_spill] sm:$0xff] }
  0x4b   : >> { %4008 = vmatprep.mubr.msk.f32.mxu1 %vm272_vm12, %v4985_v56 }
  0x4c   : >> { %v571_v1 = vsel %vm552_vm13, %v568_v24, %v570_v47  ;;  %v3435_v24 = vld [vmem:[%s5393_s1 + $0x1c] sm:$0x7] }
  0x4d   : >> { %3856 = vmatmul.mubr.msk.f32.gmra.mrb[4].mxu0 %vm272_vm12, %v565_v62  ;;  %v5491_v62 = vld [vmem:[#allocation20_spill] sm:$0xff] }
  0x4e   : >> { %4009 = vmatmul.mubr.msk.f32.gmra.mrb[4].mxu1 %vm272_vm12, %v5007_v43  ;;  %3858 = vmatprep.mubr.msk.f32.mxu0 %vm272_vm12, %v567_v18  ;;  %v5492_v18 = vld [vmem:[#allocation29_spill] sm:$0xff] }
  0x4f   : >> { %4011 = vmatprep.mubr.msk.f32.mxu1 %vm272_vm12, %v5013_v52 }
  0x51   : >> { %3859 = vmatmul.mubr.msk.f32.gmra.mrb[6].mxu0 %vm272_vm12, %v569_v31  ;;  %v3447_v31 = vld [vmem:[%s5393_s1 + $0x20] sm:$0x7] }
  0x52   : >> { %4012 = vmatmul.mubr.msk.f32.gmra.mrb[6].mxu1 %vm272_vm12, %v5026_v13  ;;  %3861 = vmatprep.mubr.msk.f32.mxu0 %vm272_vm12, %v571_v1 }
  0x53   : >> { %4014 = vmatprep.mubr.msk.f32.mxu1 %vm272_vm12, %v5031_v41 }
  0x55   : >> { %3862 = vmatmul.mubr.msk.f32.gmra.mrb[8].mxu0 %vm272_vm12, %v570_v47  ;;  %v5498_v47 = vld [vmem:[#allocation36_spill] sm:$0xff] }
  0x56   : >> { %4015 = vmatmul.mubr.msk.f32.gmra.mrb[8].mxu1 %vm272_vm12, %v5016_v9  ;;  %3866 = vmatprep.mubr.msk.f32.mxu0 %vm272_vm12, %v4516_v33  ;;  %v3423_v33 = vld [vmem:[%s5393_s1 + $0x18] sm:$0x7] }
  0x57   : >> { %4019 = vmatprep.mubr.msk.f32.mxu1 %vm272_vm12, %v4667_v45 }
  0x59   : >> { %3867 = vmatmul.mubr.msk.f32.vlgmr.msra.gmra.mrb[0].mxu0 %vm272_vm12, %v4521_v36  ;;  %v5477_v36 = vld [vmem:[#allocation13_spill] sm:$0xff] }
  0x5a   : >> { %4020 = vmatmul.mubr.msk.f32.vlgmr.msra.gmra.mrb[0].mxu1 %vm272_vm12, %v4682_v60  ;;  %3882 = vmatpush3.msk.msra.mxu0 %vm293_vm10, %v3387_v19 }
  0x5b   : >> { %4035 = vmatpush3.msk.msra.mxu1 %vm293_vm10, %v3387_v19  ;;  %3869 = vmatprep.mubr.msk.f32.mxu0 %vm272_vm12, %v4528_v39  ;;  %v5478_v39 = vld [vmem:[#allocation22_spill] sm:$0xff]  ;;  %v5488_v19 = vld [vmem:[#allocation27_spill] sm:$0xff] }
  0x5c   : >> { %4022 = vmatprep.mubr.msk.f32.mxu1 %vm272_vm12, %v4670_v46  ;;  %3898 = vmatprep.subr.msk.mxu0 %vm293_vm10, %v3399_v50 }
  0x5d   : >> { %3870 = vmatmul.mubr.msk.f32.gmra.mrb[2].mxu0 %vm272_vm12, %v4537_v44  ;;  %4051 = vmatprep.subr.msk.mxu1 %vm293_vm10, %v3399_v50  ;;  %v5479_v44 = vld [vmem:[#allocation14_spill] sm:$0xff] }
  0x5e   : >> { %4023 = vmatmul.mubr.msk.f32.gmra.mrb[2].mxu1 %vm272_vm12, %v4675_v54  ;;  %3872 = vmatprep.mubr.msk.f32.mxu0 %vm272_vm12, %v4546_v49  ;;  %v5480_v49 = vld [vmem:[#allocation23_spill] sm:$0xff] }
  0x5f   : >> { %4025 = vmatprep.mubr.msk.f32.mxu1 %vm272_vm12, %v4678_v58 }
  0x61   : >> { %3873 = vmatmul.mubr.msk.f32.gmra.mrb[4].mxu0 %vm272_vm12, %v4561_v55  ;;  %v5483_v55 = vld [vmem:[#allocation16_spill] sm:$0xff] }
  0x62   : >> { %4026 = vmatmul.mubr.msk.f32.gmra.mrb[4].mxu1 %vm272_vm12, %v4689_v6  ;;  %3875 = vmatprep.mubr.msk.f32.mxu0 %vm272_vm12, %v4567_v57  ;;  %v5484_v57 = vld [vmem:[#allocation25_spill] sm:$0xff] }
  0x63   : >> { %4028 = vmatprep.mubr.msk.f32.mxu1 %vm272_vm12, %v4692_v7 }
  0x65   : >> { %3876 = vmatmul.mubr.msk.f32.gmra.mrb[6].mxu0 %vm272_vm12, %v4582_v63  ;;  %v5485_v63 = vld [vmem:[#allocation18_spill] sm:$0xff] }
  0x66   : >> { %4029 = vmatmul.mubr.msk.f32.gmra.mrb[6].mxu1 %vm272_vm12, %v4703_v23  ;;  %3878 = vmatprep.mubr.msk.f32.mxu0 %vm272_vm12, %v4613_v12  ;;  %v5486_v12 = vld [vmem:[#allocation26_spill] sm:$0xff] }
  0x67   : >> { %4031 = vmatprep.mubr.msk.f32.mxu1 %vm272_vm12, %v4706_v29 }
  0x69   : >> { %3879 = vmatmul.mubr.msk.f32.gmra.mrb[8].mxu0 %vm272_vm12, %v4622_v14  ;;  %v5487_v14 = vld [vmem:[#allocation19_spill] sm:$0xff] }
  0x6a   : >> { %4032 = vmatmul.mubr.msk.f32.gmra.mrb[8].mxu1 %vm272_vm12, %v4715_v20  ;;  %3883 = vmatprep.mubr.msk.f32.mxu0 %vm272_vm12, %v4553_v51  ;;  %v5481_v51 = vld [vmem:[#allocation15_spill] sm:$0xff] }
  0x6b   : >> { %4036 = vmatprep.mubr.msk.f32.mxu1 %vm272_vm12, %v4749_v35 }
  0x6d   : >> { %3884 = vmatmul.mubr.msk.f32.vlgmr.msra.gmra.mrb[0].mxu0 %vm272_vm12, %v4557_v53  ;;  %v5482_v53 = vld [vmem:[#allocation24_spill] sm:$0xff] }
  0x6e   : >> { %4037 = vmatmul.mubr.msk.f32.vlgmr.msra.gmra.mrb[0].mxu1 %vm272_vm12, %v4752_v42  ;;  %3899 = vmatpush3.msk.msra.mxu0 %vm293_vm10, %v3399_v50 }
  0x6f   : >> { %4052 = vmatpush3.msk.msra.mxu1 %vm293_vm10, %v3399_v50  ;;  %3886 = vmatprep.mubr.msk.f32.mxu0 %vm272_vm12, %v4574_v59  ;;  %v1575_v59 = vrot.slane %v4667_v45, 2 }
  0x70   : >> { %4039 = vmatprep.mubr.msk.f32.mxu1 %vm272_vm12, %v4733_v17  ;;  %3915 = vmatprep.subr.msk.mxu0 %vm293_vm10, %v3423_v33 }
  0x71   : >> { %3887 = vmatmul.mubr.msk.f32.gmra.mrb[2].mxu0 %vm272_vm12, %v5477_v36  ;;  %4068 = vmatprep.subr.msk.mxu1 %vm293_vm10, %v3423_v33  ;;  %v5136_v27 = vsel %vm552_vm13, %v1575_v59, %v5489_v21 }
  0x72   : >> { %4040 = vmatmul.mubr.msk.f32.gmra.mrb[2].mxu1 %vm272_vm12, %v5478_v39  ;;  %3889 = vmatprep.mubr.msk.f32.mxu0 %vm272_vm12, %v5479_v44 }
  0x73   : >> { %4042 = vmatprep.mubr.msk.f32.mxu1 %vm272_vm12, %v5480_v49 }
  0x75   : >> { %3890 = vmatmul.mubr.msk.f32.gmra.mrb[4].mxu0 %vm272_vm12, %v5481_v51 }
  0x76   : >> { %4043 = vmatmul.mubr.msk.f32.gmra.mrb[4].mxu1 %vm272_vm12, %v5482_v53  ;;  %3892 = vmatprep.mubr.msk.f32.mxu0 %vm272_vm12, %v5483_v55 }
  0x77   : >> { %4045 = vmatprep.mubr.msk.f32.mxu1 %vm272_vm12, %v5484_v57 }
  0x79   : >> { %3893 = vmatmul.mubr.msk.f32.gmra.mrb[6].mxu0 %vm272_vm12, %v5485_v63 }
  0x7a   : >> { %4046 = vmatmul.mubr.msk.f32.gmra.mrb[6].mxu1 %vm272_vm12, %v5486_v12  ;;  %3895 = vmatprep.mubr.msk.f32.mxu0 %vm272_vm12, %v5487_v14 }
  0x7b   : >> { %4048 = vmatprep.mubr.msk.f32.mxu1 %vm272_vm12, %v5488_v19 }
  0x7d   : >> { %3896 = vmatmul.mubr.msk.f32.gmra.mrb[8].mxu0 %vm272_vm12, %v5490_v38 }
  0x7e   : >> { %4049 = vmatmul.mubr.msk.f32.gmra.mrb[8].mxu1 %vm272_vm12, %v5491_v62  ;;  %3900 = vmatprep.mubr.msk.f32.mxu0 %vm272_vm12, %v4922_v40  ;;  %v5493_v40 = vld [vmem:[#allocation28_spill] sm:$0xff] }
  0x7f   : >> { %4053 = vmatprep.mubr.msk.f32.mxu1 %vm272_vm12, %v5136_v27 }
  0x81   : >> { %3901 = vmatmul.mubr.msk.f32.vlgmr.msra.gmra.mrb[0].mxu0 %vm272_vm12, %v4946_v15  ;;  %v5494_v15 = vld [vmem:[#allocation30_spill] sm:$0xff] }
  0x82   : >> { %4054 = vmatmul.mubr.msk.f32.vlgmr.msra.gmra.mrb[0].mxu1 %vm272_vm12, %v5492_v18  ;;  %3916 = vmatpush3.msk.msra.mxu0 %vm293_vm10, %v3423_v33 }
  0x83   : >> { %4069 = vmatpush3.msk.msra.mxu1 %vm293_vm10, %v3423_v33  ;;  %3903 = vmatprep.mubr.msk.f32.mxu0 %vm272_vm12, %v4954_v48  ;;  %v5496_v48 = vld [vmem:[#allocation32_spill] sm:$0xff] }
  0x84   : >> { %4056 = vmatprep.mubr.msk.f32.mxu1 %vm272_vm12, %v5493_v40  ;;  %3932 = vmatprep.subr.msk.mxu0 %vm293_vm10, %v3435_v24 }
  0x85   : >> { %3904 = vmatmul.mubr.msk.f32.gmra.mrb[2].mxu0 %vm272_vm12, %v4977_v10  ;;  %4085 = vmatprep.subr.msk.mxu1 %vm293_vm10, %v3435_v24  ;;  %v5497_v10 = vld [vmem:[#allocation33_spill] sm:$0xff] }
  0x86   : >> { %4057 = vmatmul.mubr.msk.f32.gmra.mrb[2].mxu1 %vm272_vm12, %v5494_v15  ;;  %3906 = vmatprep.mubr.msk.f32.mxu0 %vm272_vm12, %v4985_v56  ;;  %v5499_v56 = vld [vmem:[#allocation37_spill] sm:$0xff] }
  0x87   : >> { %4059 = vmatprep.mubr.msk.f32.mxu1 %vm272_vm12, %v5495_v32 }
  0x89   : >> { %3907 = vmatmul.mubr.msk.f32.gmra.mrb[4].mxu0 %vm272_vm12, %v5007_v43  ;;  %v5500_v43 = vld [vmem:[#allocation21_spill] sm:$0xff] }
  0x8a   : >> { %4060 = vmatmul.mubr.msk.f32.gmra.mrb[4].mxu1 %vm272_vm12, %v5496_v48  ;;  %3909 = vmatprep.mubr.msk.f32.mxu0 %vm272_vm12, %v5013_v52  ;;  %v5501_v52 = vld [vmem:[#allocation34_spill] sm:$0xff] }
  0x8b   : >> { %4062 = vmatprep.mubr.msk.f32.mxu1 %vm272_vm12, %v5497_v10 }
  0x8d   : >> { %3910 = vmatmul.mubr.msk.f32.gmra.mrb[6].mxu0 %vm272_vm12, %v5026_v13 }
  0x8e   : >> { %4063 = vmatmul.mubr.msk.f32.gmra.mrb[6].mxu1 %vm272_vm12, %v5498_v47  ;;  %3912 = vmatprep.mubr.msk.f32.mxu0 %vm272_vm12, %v5031_v41 }
  0x8f   : >> { %4065 = vmatprep.mubr.msk.f32.mxu1 %vm272_vm12, %v5499_v56 }
  0x91   : >> { %3913 = vmatmul.mubr.msk.f32.gmra.mrb[8].mxu0 %vm272_vm12, %v5016_v9 }
  0x92   : >> { %4066 = vmatmul.mubr.msk.f32.gmra.mrb[8].mxu1 %vm272_vm12, %v5500_v43  ;;  %3917 = vmatprep.mubr.msk.f32.mxu0 %vm272_vm12, %v4667_v45  ;;  %v5502_v45 = vld [vmem:[#allocation38_spill] sm:$0xff] }
  0x93   : >> { %4070 = vmatprep.mubr.msk.f32.mxu1 %vm272_vm12, %v5501_v52 }
  0x95   : >> { %3918 = vmatmul.mubr.msk.f32.vlgmr.msra.gmra.mrb[0].mxu0 %vm272_vm12, %v4682_v60  ;;  %v5503_v60 = vld [vmem:[#allocation35_spill] sm:$0xff] }
  0x96   : >> { %4071 = vmatmul.mubr.msk.f32.vlgmr.msra.gmra.mrb[0].mxu1 %vm272_vm12, %v4852_v2  ;;  %3933 = vmatpush3.msk.msra.mxu0 %vm293_vm10, %v3435_v24 }
  0x97   : >> { %4086 = vmatpush3.msk.msra.mxu1 %vm293_vm10, %v3435_v24  ;;  %3920 = vmatprep.mubr.msk.f32.mxu0 %vm272_vm12, %v4670_v46  ;;  %v5511_v46 = vld [vmem:[#allocation45_spill] sm:$0xff] }
  0x98   : >> { %4073 = vmatprep.mubr.msk.f32.mxu1 %vm272_vm12, %v5502_v45  ;;  %3949 = vmatprep.subr.msk.mxu0 %vm293_vm10, %v3447_v31 }
  0x99   : >> { %3921 = vmatmul.mubr.msk.f32.gmra.mrb[2].mxu0 %vm272_vm12, %v4675_v54  ;;  %4102 = vmatprep.subr.msk.mxu1 %vm293_vm10, %v3447_v31  ;;  %v5512_v54 = vld [vmem:[#allocation46_spill] sm:$0xff] }
  0x9a   : >> { %4074 = vmatmul.mubr.msk.f32.gmra.mrb[2].mxu1 %vm272_vm12, %v5503_v60  ;;  %3923 = vmatprep.mubr.msk.f32.mxu0 %vm272_vm12, %v4678_v58  ;;  %v5513_v58 = vld [vmem:[#allocation47_spill] sm:$0xff] }
  0x9b   : >> { %4076 = vmatprep.mubr.msk.f32.mxu1 %vm272_vm12, %v4822_v0 }
  0x9d   : >> { %3924 = vmatmul.mubr.msk.f32.gmra.mrb[4].mxu0 %vm272_vm12, %v4689_v6  ;;  %v5514_v6 = vld [vmem:[#allocation48_spill] sm:$0xff] }
  0x9e   : >> { %4077 = vmatmul.mubr.msk.f32.gmra.mrb[4].mxu1 %vm272_vm12, %v4825_v37  ;;  %3926 = vmatprep.mubr.msk.f32.mxu0 %vm272_vm12, %v4692_v7  ;;  %v4421_v7 = vmov 0.0|0.0   ;;  %v5515_v37 = vld [vmem:[#allocation2_spill] sm:$0xff] }
  0x9f   : >> { %4079 = vmatprep.mubr.msk.f32.mxu1 %vm272_vm12, %v4833_v26  ;;  %v5505_v26 = vld [vmem:[#allocation40_spill] sm:$0xff] }
  0xa1   : >> { %3927 = vmatmul.mubr.msk.f32.gmra.mrb[6].mxu0 %vm272_vm12, %v4703_v23  ;;  %v4423_v23 = vmov 0.0  }
  0xa2   : >> { %4080 = vmatmul.mubr.msk.f32.gmra.mrb[6].mxu1 %vm272_vm12, %v4836_v30  ;;  %3929 = vmatprep.mubr.msk.f32.mxu0 %vm272_vm12, %v4706_v29 }
  0xa3   : >> { %4082 = vmatprep.mubr.msk.f32.mxu1 %vm272_vm12, %v4839_v28 }
  0xa5   : >> { %3930 = vmatmul.mubr.msk.f32.gmra.mrb[8].mxu0 %vm272_vm12, %v4715_v20  ;;  %v5504_v20 = vld [vmem:[#allocation39_spill] sm:$0xff] }
  0xa6   : >> { %4083 = vmatmul.mubr.msk.f32.gmra.mrb[8].mxu1 %vm272_vm12, %v4846_v11  ;;  %3934 = vmatprep.mubr.msk.f32.mxu0 %vm272_vm12, %v4749_v35  ;;  %v5506_v35 = vld [vmem:[#allocation41_spill] sm:$0xff] }
  0xa7   : >> { %4087 = vmatprep.mubr.msk.f32.mxu1 %vm272_vm12, %v4884_v3 }
  0xa9   : >> { %3935 = vmatmul.mubr.msk.f32.vlgmr.msra.gmra.mrb[0].mxu0 %vm272_vm12, %v4752_v42  ;;  %v5510_v42 = vld [vmem:[#allocation44_spill] sm:$0xff] }
  0xaa   : >> { %4088 = vmatmul.mubr.msk.f32.vlgmr.msra.gmra.mrb[0].mxu1 %vm272_vm12, %v4887_v61  ;;  %3950 = vmatpush3.msk.msra.mxu0 %vm293_vm10, %v3447_v31 }
  0xab   : >> { %4103 = vmatpush3.msk.msra.mxu1 %vm293_vm10, %v3447_v31  ;;  %3937 = vmatprep.mubr.msk.f32.mxu0 %vm272_vm12, %v4733_v17  ;;  %v5507_v17 = vld [vmem:[#allocation42_spill] sm:$0xff] }
  0xac   : >> { %4090 = vmatprep.mubr.msk.f32.mxu1 %vm272_vm12, %v5504_v20  ;;  %4189 = vmatprep.subr.bf16.mxu0 %v4421_v7 }
  0xad   : >> { %3938 = vmatmul.mubr.msk.f32.gmra.mrb[2].mxu0 %vm272_vm12, %v5478_v39  ;;  %4205 = vmatprep.subr.bf16.mxu1 %v4421_v7 }
  0xae   : >> { %4091 = vmatmul.mubr.msk.f32.gmra.mrb[2].mxu1 %vm272_vm12, %v5505_v26  ;;  %3940 = vmatprep.mubr.msk.f32.mxu0 %vm272_vm12, %v5480_v49 }
  0xaf   : >> { %4093 = vmatprep.mubr.msk.f32.mxu1 %vm272_vm12, %v4872_v22  ;;  %v5508_v22 = vrot.slane %v4846_v11, 1 }
  0xb1   : >> { %3941 = vmatmul.mubr.msk.f32.gmra.mrb[4].mxu0 %vm272_vm12, %v5482_v53 }
  0xb2   : >> { %4094 = vmatmul.mubr.msk.f32.gmra.mrb[4].mxu1 %vm272_vm12, %v5506_v35  ;;  %3943 = vmatprep.mubr.msk.f32.mxu0 %vm272_vm12, %v5484_v57 }
  0xb3   : >> { %4096 = vmatprep.mubr.msk.f32.mxu1 %vm272_vm12, %v4878_v5  ;;  %v5509_v5 = vld [vmem:[#allocation43_spill] sm:$0xff] }
  0xb5   : >> { %3944 = vmatmul.mubr.msk.f32.gmra.mrb[6].mxu0 %vm272_vm12, %v5486_v12 }
  0xb6   : >> { %4097 = vmatmul.mubr.msk.f32.gmra.mrb[6].mxu1 %vm272_vm12, %v4881_v4  ;;  %3946 = vmatprep.mubr.msk.f32.mxu0 %vm272_vm12, %v5488_v19 }
  0xb7   : >> { %4099 = vmatprep.mubr.msk.f32.mxu1 %vm272_vm12, %v5507_v17 }
  0xb9   : >> { %3947 = vmatmul.mubr.msk.f32.gmra.mrb[8].mxu0 %vm272_vm12, %v5491_v62 }
  0xba   : >> { %4100 = vmatmul.mubr.msk.f32.gmra.mrb[8].mxu1 %vm272_vm12, %v5508_v22  ;;  %3951 = vmatprep.mubr.msk.f32.mxu0 %vm272_vm12, %v5136_v27 }
  0xbb   : >> { %4104 = vmatprep.mubr.msk.f32.mxu1 %vm272_vm12, %v5509_v5  ;;  %v5516_v5 = vld [vmem:[#allocation3_spill] sm:$0xff] }
  0xbd   : >> { %3952 = vmatmul.mubr.msk.f32.vlgmr.msra.gmra.mrb[0].mxu0 %vm272_vm12, %v5492_v18 }
  0xbe   : >> { %4105 = vmatmul.mubr.msk.f32.vlgmr.msra.gmra.mrb[0].mxu1 %vm272_vm12, %v5510_v42  ;;  %3954 = vmatprep.mubr.msk.f32.mxu0 %vm272_vm12, %v5493_v40  ;;  %v5517_v42 = vld [vmem:[#allocation8_spill] sm:$0xff] }
  0xbf   : >> { %4107 = vmatprep.mubr.msk.f32.mxu1 %vm272_vm12, %v5511_v46  ;;  %v5518_v46 = vld [vmem:[#allocation4_spill] sm:$0xff] }
  0xc1   : >> { %3955 = vmatmul.mubr.msk.f32.gmra.mrb[2].mxu0 %vm272_vm12, %v5494_v15 }
  0xc2   : >> { %4108 = vmatmul.mubr.msk.f32.gmra.mrb[2].mxu1 %vm272_vm12, %v5512_v54  ;;  %3957 = vmatprep.mubr.msk.f32.mxu0 %vm272_vm12, %v5495_v32  ;;  %v5519_v54 = vld [vmem:[#allocation9_spill] sm:$0xff] }
  0xc3   : >> { %4110 = vmatprep.mubr.msk.f32.mxu1 %vm272_vm12, %v5513_v58  ;;  %v5520_v58 = vld [vmem:[#allocation5_spill] sm:$0xff] }
  0xc5   : >> { %3958 = vmatmul.mubr.msk.f32.gmra.mrb[4].mxu0 %vm272_vm12, %v5496_v48 }
  0xc6   : >> { %4111 = vmatmul.mubr.msk.f32.gmra.mrb[4].mxu1 %vm272_vm12, %v5514_v6  ;;  %3960 = vmatprep.mubr.msk.f32.mxu0 %vm272_vm12, %v5497_v10  ;;  %v5521_v6 = vld [vmem:[#allocation10_spill] sm:$0xff] }
  0xc7   : >> { %4113 = vmatprep.mubr.msk.f32.mxu1 %vm272_vm12, %v4971_v8 }
  0xc9   : >> { %3961 = vmatmul.mubr.msk.f32.gmra.mrb[6].mxu0 %vm272_vm12, %v5498_v47 }
  0xca   : >> { %4114 = vmatmul.mubr.msk.f32.gmra.mrb[6].mxu1 %vm272_vm12, %v4992_v25  ;;  %3963 = vmatprep.mubr.msk.f32.mxu0 %vm272_vm12, %v5499_v56 }
  0xcb   : >> { %4116 = vmatprep.mubr.msk.f32.mxu1 %vm272_vm12, %v5002_v34 }
  0xcd   : >> { %3964 = vmatmul.mubr.msk.f32.gmra.mrb[8].mxu0 %vm272_vm12, %v5500_v43 }
  0xce   : >> { %4117 = vmatmul.mubr.msk.f32.gmra.mrb[8].mxu1 %vm272_vm12, %v2821_v16  ;;  %4139 = vmatprep.mubr.msk.f32.mxu0 %vm4422_vm14, %v4423_v23 }
  0xcf   : >> { %4174 = vmatprep.mubr.msk.f32.mxu1 %vm4422_vm14, %v4423_v23 }
 0x190   : >> { %v3953_v29 = vpop.f32.mrb[0].mxu0 }
 0x191   : >> { %v4106_v2 = vpop.f32.mrb[0].mxu1  ;;  %v1683_v4 = vpop.f32.mrb[1].mxu0 }
 0x192   : >> { %v2969_v0 = vmax.f32 %v3953_v29, %v4106_v2  ;;  %v2909_v11 = vpop.f32.mrb[1].mxu1  ;;  %v5523_v29 = vld [vmem:[#allocation11_spill] sm:$0xff] }
 0x193   : >> { %v2968_v28 = vmax.f32 %v1683_v4, %v2909_v11  ;;  %v5524_v2 = vld [vmem:[#allocation7_spill] sm:$0xff]  ;;  %v5525_v4 = vld [vmem:[#allocation12_spill] sm:$0xff] }
 0x194   : >> { %v2985_v3 = vadd.f32 %v5515_v37, %v2969_v0  ;;  %v3956_v30 = vpop.f32.mrb[2].mxu0 }
 0x195   : >> { %v2984_v61 = vadd.f32 %v5515_v37, %v2968_v28  ;;  %v4109_v16 = vpop.f32.mrb[2].mxu1  ;;  %v1693_v8 = vpop.f32.mrb[3].mxu0 }
 0x196   : >> { %v2995_v25 = vmax.f32 %v2985_v3, 0.0  ;;  %v2971_v34 = vmax.f32 %v3956_v30, %v4109_v16  ;;  %v2919_v9 = vpop.f32.mrb[3].mxu1 }
 0x197   : >> { %v2994_v13 = vmax.f32 %v2984_v61, 0.0  ;;  %v2970_v1 = vmax.f32 %v1693_v8, %v2919_v9 }
 0x198   : >> { %v2987_v41 = vadd.f32 %v5515_v37, %v2971_v34  ;;  %v3959_v50 = vpop.f32.mrb[4].mxu0 }
 0x199   : >> { %v4190_v33 = vpack.c.bf16 %v2995_v25, %v2994_v13  ;;  %v2986_v36 = vadd.f32 %v5515_v37, %v2970_v1  ;;  %v4112_v39 = vpop.f32.mrb[4].mxu1  ;;  %v1703_v44 = vpop.f32.mrb[5].mxu0 }
 0x19a   : >> { %v2997_v49 = vmax.f32 %v2987_v41, 0.0  ;;  %v2973_v51 = vmax.f32 %v3959_v50, %v4112_v39  ;;  %v2929_v53 = vpop.f32.mrb[5].mxu1 }
 0x19b   : >> { %v2996_v55 = vmax.f32 %v2986_v36, 0.0  ;;  %v2972_v57 = vmax.f32 %v1703_v44, %v2929_v53  ;;  %4191 = vmatpush3.bf16.msra.mxu0 %v4190_v33  ;;  %4207 = vmatpush3.bf16.msra.mxu1 %v4190_v33 }
 0x19c   : >> { %v2989_v59 = vadd.f32 %v5515_v37, %v2973_v51  ;;  %v3962_v63 = vpop.f32.mrb[6].mxu0  ;;  %4192 = vmatprep.subr.bf16.mxu0 %v4421_v7  ;;  %4208 = vmatprep.subr.bf16.mxu1 %v4421_v7 }
 0x19d   : >> { %v4193_v12 = vpack.c.bf16 %v2997_v49, %v2996_v55  ;;  %v2988_v14 = vadd.f32 %v5515_v37, %v2972_v57  ;;  %v4115_v19 = vpop.f32.mrb[6].mxu1  ;;  %v1713_v21 = vpop.f32.mrb[7].mxu0 }
 0x19e   : >> { %v2999_v27 = vmax.f32 %v2989_v59, 0.0  ;;  %v2975_v38 = vmax.f32 %v3962_v63, %v4115_v19  ;;  %v2939_v62 = vpop.f32.mrb[7].mxu1 }
 0x19f   : >> { %v2998_v24 = vmax.f32 %v2988_v14, 0.0  ;;  %v2974_v18 = vmax.f32 %v1713_v21, %v2939_v62  ;;  %4194 = vmatpush3.bf16.msra.mxu0 %v4193_v12  ;;  %4210 = vmatpush3.bf16.msra.mxu1 %v4193_v12 }
 0x1a0   : >> { %v2991_v40 = vadd.f32 %v5515_v37, %v2975_v38  ;;  %v3965_v15 = vpop.f32.mrb[8].mxu0  ;;  %4195 = vmatprep.subr.bf16.mxu0 %v4421_v7  ;;  %4211 = vmatprep.subr.bf16.mxu1 %v4421_v7 }
 0x1a1   : >> { %v4196_v32 = vpack.c.bf16 %v2999_v27, %v2998_v24  ;;  %v2990_v48 = vadd.f32 %v5515_v37, %v2974_v18  ;;  %v4118_v10 = vpop.f32.mrb[8].mxu1  ;;  %v1723_v47 = vpop.f32.mrb[9].mxu0 }
 0x1a2   : >> { %v3001_v56 = vmax.f32 %v2991_v40, 0.0  ;;  %v2977_v43 = vmax.f32 %v3965_v15, %v4118_v10  ;;  %v2949_v52 = vpop.f32.mrb[9].mxu1 }
 0x1a3   : >> { %v3000_v31 = vmax.f32 %v2990_v48, 0.0  ;;  %v2976_v45 = vmax.f32 %v1723_v47, %v2949_v52  ;;  %4197 = vmatpush3.bf16.msra.mxu0 %v4196_v32  ;;  %4213 = vmatpush3.bf16.msra.mxu1 %v4196_v32 }
 0x1a4   : >> { %v2993_v60 = vadd.f32 %v5515_v37, %v2977_v43  ;;  %4198 = vmatprep.subr.bf16.mxu0 %v4421_v7  ;;  %4214 = vmatprep.subr.bf16.mxu1 %v4421_v7 }
 0x1a5   : >> { %v4199_v20 = vpack.c.bf16 %v3001_v56, %v3000_v31  ;;  %v2992_v26 = vadd.f32 %v5515_v37, %v2976_v45 }
 0x1a6   : >> { %v3003_v35 = vmax.f32 %v2993_v60, 0.0 }
 0x1a7   : >> { %v3002_v17 = vmax.f32 %v2992_v26, 0.0  ;;  %4200 = vmatpush3.bf16.msra.mxu0 %v4199_v20  ;;  %4216 = vmatpush3.bf16.msra.mxu1 %v4199_v20 }
 0x1a8   : >> { %4201 = vmatprep.subr.bf16.mxu0 %v4421_v7  ;;  %4217 = vmatprep.subr.bf16.mxu1 %v4421_v7  ;;  %v5522_v7 = vld [vmem:[#allocation6_spill] sm:$0xff] }
 0x1a9   : >> { %v4202_v22 = vpack.c.bf16 %v3003_v35, %v3002_v17 }
 0x1ab   : >> { %4204 = vmatpush3.bf16.msk.msra.mxu0 %vm4203_vm1, %v4202_v22  ;;  %4220 = vmatpush3.bf16.msk.msra.mxu1 %vm4203_vm1, %v4202_v22 }
 0x1ae   : >> { %4140 = vmatmul.mubr.msk.f32.vlgmr.msra.gmra.mrb[10].mxu0 %vm3004_vm2, %v5516_v5  ;;  %4175 = vmatmul.mubr.msk.f32.vlgmr.msra.gmra.mrb[10].mxu1 %vm3004_vm2, %v5517_v42 }
 0x1af   : >> { %4142 = vmatprep.mubr.msk.f32.mxu0 %vm4422_vm14, %v4423_v23  ;;  %4177 = vmatprep.mubr.msk.f32.mxu1 %vm4422_vm14, %v4423_v23 }
 0x1b2   : >> { %4143 = vmatmul.mubr.msk.f32.gmra.mrb[12].mxu0 %vm3004_vm2, %v5518_v46  ;;  %4178 = vmatmul.mubr.msk.f32.gmra.mrb[12].mxu1 %vm3004_vm2, %v5519_v54 }
 0x1b3   : >> { %4145 = vmatprep.mubr.msk.f32.mxu0 %vm4422_vm14, %v4423_v23  ;;  %4180 = vmatprep.mubr.msk.f32.mxu1 %vm4422_vm14, %v4423_v23 }
 0x1b6   : >> { %4146 = vmatmul.mubr.msk.f32.gmra.mrb[14].mxu0 %vm3004_vm2, %v5520_v58  ;;  %4181 = vmatmul.mubr.msk.f32.gmra.mrb[14].mxu1 %vm3004_vm2, %v5521_v6 }
 0x1b7   : >> { %4148 = vmatprep.mubr.msk.f32.mxu0 %vm4422_vm14, %v4423_v23  ;;  %4183 = vmatprep.mubr.msk.f32.mxu1 %vm4422_vm14, %v4423_v23 }
 0x1ba   : >> { %4149 = vmatmul.mubr.msk.f32.gmra.mrb[16].mxu0 %vm3004_vm2, %v5522_v7  ;;  %4184 = vmatmul.mubr.msk.f32.gmra.mrb[16].mxu1 %vm3004_vm2, %v5523_v29 }
 0x1bb   : >> { %4151 = vmatprep.mubr.msk.f32.mxu0 %vm4422_vm14, %v4423_v23  ;;  %4186 = vmatprep.mubr.msk.f32.mxu1 %vm4422_vm14, %v4423_v23 }
 0x1be   : >> { %4152 = vmatmul.mubr.msk.f32.gmra.mrb[18].mxu0 %vm3004_vm2, %v5524_v2  ;;  %4187 = vmatmul.mubr.msk.f32.gmra.mrb[18].mxu1 %vm3004_vm2, %v5525_v4 }
 0x281   : >> { %v3090_v0 = vpop.f32.mrb[10].mxu0  ;;  %v3195_v11 = vpop.f32.mrb[10].mxu1 }
 0x282   : >> { %v3219_v28 = vmax.f32 %v3090_v0, %v3195_v11  ;;  %v4141_v3 = vpop.f32.mrb[11].mxu0  ;;  %v4176_v30 = vpop.f32.mrb[11].mxu1 }
 0x284   : >> { %3227 = vst.msk [vmem:[%s3225_s21] sm:$0xff] %vm3226_vm3, %v3219_v28 }
 0x285   : >> { %v3095_v61 = vpop.f32.mrb[12].mxu0  ;;  %v3200_v16 = vpop.f32.mrb[12].mxu1 }
 0x286   : >> { %v3220_v8 = vmax.f32 %v3095_v61, %v3200_v16  ;;  %v4144_v23 = vpop.f32.mrb[13].mxu0  ;;  %v4179_v25 = vpop.f32.mrb[13].mxu1 }
 0x288   : >> { %3228 = vst.msk [vmem:[%s3225_s21 + $0x8] sm:$0xff] %vm3226_vm3, %v3220_v8 }
 0x289   : >> { %v3100_v34 = vpop.f32.mrb[14].mxu0  ;;  %v3205_v9 = vpop.f32.mrb[14].mxu1 }
 0x28a   : >> { %v3221_v13 = vmax.f32 %v3100_v34, %v3205_v9  ;;  %v4147_v1 = vpop.f32.mrb[15].mxu0  ;;  %v4182_v41 = vpop.f32.mrb[15].mxu1 }
 0x28c   : >> { %3229 = vst.msk [vmem:[%s3225_s21 + $0x10] sm:$0xff] %vm3226_vm3, %v3221_v13 }
 0x28d   : >> { %v3105_v50 = vpop.f32.mrb[16].mxu0  ;;  %v3210_v33 = vpop.f32.mrb[16].mxu1 }
 0x28e   : >> { %v3222_v36 = vmax.f32 %v3105_v50, %v3210_v33  ;;  %v4150_v39 = vpop.f32.mrb[17].mxu0  ;;  %v4185_v44 = vpop.f32.mrb[17].mxu1  ;;  %224 = sbr.rel (!%p222_p4) target bundleno = 21 (0x15), region = 82 }
 0x290   : >> { %3230 = vst.msk [vmem:[%s3225_s21 + $0x18] sm:$0xff] %vm3226_vm3, %v3222_v36 }
 0x291   : >> { %v3110_v49 = vpop.f32.mrb[18].mxu0  ;;  %v3215_v51 = vpop.f32.mrb[18].mxu1 }
 0x292   : >> { %v3223_v53 = vmax.f32 %v3110_v49, %v3215_v51  ;;  %v4153_v55 = vpop.f32.mrb[19].mxu0  ;;  %v4188_v57 = vpop.f32.mrb[19].mxu1 }
 0x294   : >> { %3232 = vst.msk [vmem:[%s3225_s21 + $0x20] sm:$0x3f] %vm3231_vm4, %v3223_v53 }
 0x295 PF: > { %s13_s12 = sadd.s32 1, %s4414_s12  }
 0x296   : > { %p10_p5 = scmp.ge.s32.totalorder %s13_s12, 4  }
 0x298   :  { %12 = sbr.rel (!%p10_p5) target bundleno = 1 (0x1), region = 93 }

// kernel: cnn_symbol_grounder.7
= control target key start
LH: loop header
LB: loop body
LE: loop exit
PB: predicated region body
PF: predicated region fallthrough
CT: control target
= control target key end

     0   :  { %v608_v7 = vmov 0.0|0.0   ;;  %vm609_vm0 = vmmov 0   ;;  %v610_v13 = vmov 0.0   ;;  %v611_v20 = vmov 1983009808   ;;  %s880_s0 = inlined_call_operand.vmem [shape: f32[2,384], index: 0, kind: input, shape index: {}]   ;;  %s881_s1 = inlined_call_operand.vmem [shape: f32[384,128], index: 1, kind: input, shape index: {}]   ;;  %s882_s2 = inlined_call_operand.vmem [shape: f32[1,128], index: 2, kind: input, shape index: {}]   ;;  %s883_s3 = inlined_call_operand.vmem [shape: f32[128,2], index: 3, kind: input, shape index: {}]   ;;  %s884_s4 = inlined_call_operand.vmem [shape: f32[1,2], index: 4, kind: input, shape index: {}]   ;;  %s885_s5 = inlined_call_operand.hbm [shape: f32[2,2], index: 5, kind: output, shape index: {}]  }
   0x1   :  { %v38_v0 = vld [vmem:[%s881_s1 + $0x80] sm:$0xff]  ;;  %v39_v1 = vld [vmem:[%s881_s1 + $0x88] sm:$0xff]  ;;  %v40_v5 = vld [vmem:[%s881_s1 + $0x90] sm:$0xff]  ;;  %526 = vmatprep.subr.bf16.mxu1 %v608_v7  ;;  %456 = vmatprep.mubr.msk.f32.mxu1 %vm609_vm0, %v610_v13  ;;  %v80_v21 = vunpack.c.l.s4 %v611_v20  ;;  %v82_v22 = vlaneseq }
   0x2   :  { %v22_v2 = vld [vmem:[%s881_s1] sm:$0xff]  ;;  %v494_v3 = vpack.c.bf16 %v39_v1, %v38_v0  ;;  %v23_v4 = vld [vmem:[%s881_s1 + $0x8] sm:$0xff]  ;;  %v41_v6 = vld [vmem:[%s881_s1 + $0x98] sm:$0xff] }
   0x3   :  { %v496_v8 = vpack.c.bf16 %v23_v4, %v22_v2  ;;  %v498_v9 = vpack.c.bf16 %v41_v6, %v40_v5  ;;  %v24_v10 = vld [vmem:[%s881_s1 + $0x10] sm:$0xff]  ;;  %v25_v11 = vld [vmem:[%s881_s1 + $0x18] sm:$0xff]  ;;  %v54_v12 = vld [vmem:[%s881_s1 + $0x100] sm:$0xff]  ;;  %v81_v33 = vunpack.c.0.s8 %v80_v21  ;;  %v83_v34 = vshrl.u32 %v82_v22, 7 }
   0x4   :  { %495 = vmatprep.subr.bf16.mxu0 %v494_v3  ;;  %v55_v14 = vld [vmem:[%s881_s1 + $0x108] sm:$0xff]  ;;  %v42_v15 = vld [vmem:[%s881_s1 + $0xa0] sm:$0xff]  ;;  %v500_v17 = vpack.c.bf16 %v25_v11, %v24_v10  ;;  %v56_v19 = vld [vmem:[%s881_s1 + $0x110] sm:$0xff] }
   0x5   :  { %v43_v16 = vld [vmem:[%s881_s1 + $0xa8] sm:$0xff]  ;;  %497 = vmatpush3.bf16.msra.mxu0 %v496_v8  ;;  %v527_v18 = vpack.c.bf16 %v55_v14, %v54_v12  ;;  %v26_v24 = vld [vmem:[%s881_s1 + $0x20] sm:$0xff]  ;;  %v57_v26 = vld [vmem:[%s881_s1 + $0x118] sm:$0xff]  ;;  %v726_v44 = vsub.s32 %v81_v33, %v83_v34 }
   0x6   :  { %499 = vmatprep.subr.bf16.mxu0 %v498_v9  ;;  %v502_v23 = vpack.c.bf16 %v43_v16, %v42_v15  ;;  %v27_v25 = vld [vmem:[%s881_s1 + $0x28] sm:$0xff]  ;;  %v530_v27 = vpack.c.bf16 %v57_v26, %v56_v19  ;;  %v44_v28 = vld [vmem:[%s881_s1 + $0xb0] sm:$0xff]  ;;  %v45_v29 = vld [vmem:[%s881_s1 + $0xb8] sm:$0xff] }
   0x7   :  { %528 = vmatpush3.bf16.msra.mxu1 %v527_v18  ;;  %v58_v30 = vld [vmem:[%s881_s1 + $0x120] sm:$0xff]  ;;  %v59_v31 = vld [vmem:[%s881_s1 + $0x128] sm:$0xff]  ;;  %v504_v32 = vpack.c.bf16 %v27_v25, %v26_v24  ;;  %v506_v35 = vpack.c.bf16 %v45_v29, %v44_v28  ;;  %v28_v36 = vld [vmem:[%s881_s1 + $0x30] sm:$0xff] }
   0x8   :  { %529 = vmatprep.subr.bf16.mxu1 %v608_v7  ;;  %v29_v37 = vld [vmem:[%s881_s1 + $0x38] sm:$0xff]  ;;  %v533_v38 = vpack.c.bf16 %v59_v31, %v58_v30  ;;  %v46_v39 = vld [vmem:[%s881_s1 + $0xc0] sm:$0xff]  ;;  %v47_v40 = vld [vmem:[%s881_s1 + $0xc8] sm:$0xff] }
   0x9   :  { %501 = vmatpush3.bf16.msra.mxu0 %v500_v17  ;;  %v60_v41 = vld [vmem:[%s881_s1 + $0x130] sm:$0xff]  ;;  %v61_v42 = vld [vmem:[%s881_s1 + $0x138] sm:$0xff]  ;;  %v508_v43 = vpack.c.bf16 %v29_v37, %v28_v36  ;;  %v510_v45 = vpack.c.bf16 %v47_v40, %v46_v39  ;;  %v30_v46 = vld [vmem:[%s881_s1 + $0x40] sm:$0xff] }
   0xa   :  { %503 = vmatprep.subr.bf16.mxu0 %v502_v23  ;;  %v31_v47 = vld [vmem:[%s881_s1 + $0x48] sm:$0xff]  ;;  %v536_v48 = vpack.c.bf16 %v61_v42, %v60_v41  ;;  %v48_v49 = vld [vmem:[%s881_s1 + $0xd0] sm:$0xff]  ;;  %v49_v50 = vld [vmem:[%s881_s1 + $0xd8] sm:$0xff] }
   0xb   :  { %531 = vmatpush3.bf16.msra.mxu1 %v530_v27  ;;  %v62_v51 = vld [vmem:[%s881_s1 + $0x140] sm:$0xff]  ;;  %v63_v52 = vld [vmem:[%s881_s1 + $0x148] sm:$0xff]  ;;  %v512_v54 = vpack.c.bf16 %v31_v47, %v30_v46  ;;  %v514_v56 = vpack.c.bf16 %v49_v50, %v48_v49  ;;  %v32_v57 = vld [vmem:[%s881_s1 + $0x50] sm:$0xff] }
   0xc   :  { %532 = vmatprep.subr.bf16.mxu1 %v608_v7  ;;  %v21_v53 = vld [vmem:[%s880_s0] sm:$0x3f]  ;;  %v33_v58 = vld [vmem:[%s881_s1 + $0x58] sm:$0xff]  ;;  %v539_v59 = vpack.c.bf16 %v63_v52, %v62_v51  ;;  %v51_v61 = vld [vmem:[%s881_s1 + $0xe8] sm:$0xff] }
   0xd   :  { %505 = vmatpush3.bf16.msra.mxu0 %v504_v32  ;;  %v85_v55 = vrot.slane %v21_v53, %v726_v44  ;;  %v50_v60 = vld [vmem:[%s881_s1 + $0xe0] sm:$0xff]  ;;  %v64_v63 = vld [vmem:[%s881_s1 + $0x150] sm:$0xff]  ;;  %v65_v0 = vld [vmem:[%s881_s1 + $0x158] sm:$0xff]  ;;  %v516_v1 = vpack.c.bf16 %v33_v58, %v32_v57 }
   0xe   :  { %507 = vmatprep.subr.bf16.mxu0 %v506_v35 }
   0xf   :  { %534 = vmatpush3.bf16.msra.mxu1 %v533_v38  ;;  %v93_v62 = vcombine.high %v85_v55, %v85_v55 }
  0x10   :  { %535 = vmatprep.subr.bf16.mxu1 %v608_v7 }
  0x11   :  { %509 = vmatpush3.bf16.msra.mxu0 %v508_v43  ;;  %161 = vmatprep.mubr.f32.mxu0 %v93_v62 }
  0x12   :  { %511 = vmatprep.subr.bf16.mxu0 %v510_v45 }
  0x13   :  { %537 = vmatpush3.bf16.msra.mxu1 %v536_v48 }
  0x14   :  { %538 = vmatprep.subr.bf16.mxu1 %v608_v7 }
  0x15   :  { %513 = vmatpush3.bf16.msra.mxu0 %v512_v54 }
  0x16   :  { %10 = vsyncpa [#allocation3], 0  ;;  %515 = vmatprep.subr.bf16.mxu0 %v514_v56  ;;  %v518_v2 = vpack.c.bf16 %v51_v61, %v50_v60  ;;  %v34_v3 = vld [vmem:[%s881_s1 + $0x60] sm:$0xff]  ;;  %v35_v4 = vld [vmem:[%s881_s1 + $0x68] sm:$0xff]  ;;  %v542_v5 = vpack.c.bf16 %v65_v0, %v64_v63  ;;  %v78_v20 = vcombine.high %v21_v53, %v21_v53  ;;  %vm337_vm1 = vcmask 9216  }
  0x17   :  { %540 = vmatpush3.bf16.msra.mxu1 %v539_v59  ;;  %v52_v6 = vld [vmem:[%s881_s1 + $0xf0] sm:$0xff]  ;;  %v53_v8 = vld [vmem:[%s881_s1 + $0xf8] sm:$0xff]  ;;  %v66_v9 = vld [vmem:[%s881_s1 + $0x160] sm:$0xff]  ;;  %v520_v11 = vpack.c.bf16 %v35_v4, %v34_v3 }
  0x18   :  { %541 = vmatprep.subr.bf16.mxu1 %v608_v7  ;;  %v67_v10 = vld [vmem:[%s881_s1 + $0x168] sm:$0xff]  ;;  %v522_v12 = vpack.c.bf16 %v53_v8, %v52_v6  ;;  %v36_v14 = vld [vmem:[%s881_s1 + $0x70] sm:$0xff]  ;;  %v37_v15 = vld [vmem:[%s881_s1 + $0x78] sm:$0xff]  ;;  %v92_v25 = vrot.slane %v78_v20, %v726_v44 }
  0x19   :  { %517 = vmatpush3.bf16.msra.mxu0 %v516_v1  ;;  %v545_v16 = vpack.c.bf16 %v67_v10, %v66_v9  ;;  %v68_v17 = vld [vmem:[%s881_s1 + $0x170] sm:$0xff]  ;;  %v69_v18 = vld [vmem:[%s881_s1 + $0x178] sm:$0xff]  ;;  %v524_v19 = vpack.c.bf16 %v37_v15, %v36_v14  ;;  %v238_v21 = vld [vmem:[%s883_s3] sm:$0xff] }
  0x1a   :  { %519 = vmatprep.subr.bf16.mxu0 %v518_v2  ;;  %v239_v22 = vld [vmem:[%s883_s3 + $0x8] sm:$0xff]  ;;  %v548_v23 = vpack.c.bf16 %v69_v18, %v68_v17  ;;  %v240_v26 = vld [vmem:[%s883_s3 + $0x10] sm:$0xff]  ;;  %v241_v27 = vld [vmem:[%s883_s3 + $0x18] sm:$0xff] }
  0x1b   :  { %543 = vmatpush3.bf16.msra.mxu1 %v542_v5  ;;  %v551_v24 = vpack.c.bf16 %v239_v22, %v238_v21  ;;  %v554_v28 = vpack.c.bf16 %v241_v27, %v240_v26  ;;  %v242_v29 = vld [vmem:[%s883_s3 + $0x20] sm:$0xff]  ;;  %v243_v30 = vld [vmem:[%s883_s3 + $0x28] sm:$0xff]  ;;  %v244_v32 = vld [vmem:[%s883_s3 + $0x30] sm:$0xff] }
  0x1c   :  { %544 = vmatprep.subr.bf16.mxu1 %v608_v7  ;;  %v557_v31 = vpack.c.bf16 %v243_v30, %v242_v29  ;;  %v246_v34 = vld [vmem:[%s883_s3 + $0x40] sm:$0xff]  ;;  %v247_v35 = vld [vmem:[%s883_s3 + $0x48] sm:$0xff]  ;;  %v248_v37 = vld [vmem:[%s883_s3 + $0x50] sm:$0xff] }
  0x1d   :  { %521 = vmatpush3.bf16.msra.mxu0 %v520_v11  ;;  %v563_v36 = vpack.c.bf16 %v247_v35, %v246_v34  ;;  %v249_v38 = vld [vmem:[%s883_s3 + $0x58] sm:$0xff]  ;;  %v250_v40 = vld [vmem:[%s883_s3 + $0x60] sm:$0xff]  ;;  %v251_v41 = vld [vmem:[%s883_s3 + $0x68] sm:$0xff] }
  0x1e   :  { %523 = vmatprep.subr.bf16.mxu0 %v522_v12  ;;  %v566_v39 = vpack.c.bf16 %v249_v38, %v248_v37  ;;  %v569_v42 = vpack.c.bf16 %v251_v41, %v250_v40  ;;  %v252_v43 = vld [vmem:[%s883_s3 + $0x70] sm:$0xff]  ;;  %v253_v44 = vld [vmem:[%s883_s3 + $0x78] sm:$0xff]  ;;  %v353_v48 = vld [vmem:[%s882_s2] ss:$0 sm:$0xff]  ;;  %s612_s2 = smov [#allocation2]  }
  0x1f   :  { %546 = vmatpush3.bf16.msra.mxu1 %v545_v16  ;;  %v572_v45 = vpack.c.bf16 %v253_v44, %v252_v43  ;;  %v354_v54 = vld [vmem:[%s884_s4] ss:$0 sm:$0xff] }
  0x20   :  { %547 = vmatprep.subr.bf16.mxu1 %v608_v7 }
  0x21   :  { %525 = vmatpush3.bf16.msra.mxu0 %v524_v19 }
  0x22   :  { %550 = vmatprep.subr.bf16.mxu0 %v608_v7 }
  0x23   :  { %549 = vmatpush3.bf16.msra.mxu1 %v548_v23 }
  0x24   :  { %162 = vmatmul.mubr.f32.vlgmr.msra.gmra.mrb[0].mxu0 %v85_v55 }
  0x25   :  { %552 = vmatpush3.bf16.msra.mxu0 %v551_v24  ;;  %491 = vmatprep.mubr.msk.f32.mxu0 %vm609_vm0, %v610_v13  ;;  %v245_v13 = vld [vmem:[%s883_s3 + $0x38] sm:$0xff]  ;;  %s345_s3 = sshll.u32 %s612_s2, 4  ;;  %s346_s3 = int_to_ptr.vmem [resolvable:$true] %s345_s3 }
  0x26   :  { %457 = vmatmul.mubr.f32.vlgmr.msra.gmra.mrb[0].mxu1 %v92_v25  ;;  %553 = vmatprep.subr.bf16.mxu0 %v608_v7  ;;  %v560_v33 = vpack.c.bf16 %v245_v13, %v244_v32  ;;  %s584_s22 = scalar_lea.vmem %s346_s3, 32  ;;  %p589_p1 = scmp.lt.s32.totalorder %s346_s3, %s346_s3 }
  0x27   :  { %p585_p0 = scmp.ne.s32.totalorder %s346_s3, %s584_s22  ;;  %p590_p2 = scmp.lt.s32.totalorder %s584_s22, %s584_s22 }
  0x29   :  { %555 = vmatpush3.bf16.msra.mxu0 %v554_v28  ;;  %p591_p3 = por %p590_p2, %p589_p1 }
  0x2a   :  { %556 = vmatprep.subr.bf16.mxu0 %v608_v7 }
  0x2b   :  { %p592_p4 = pnand %p591_p3, %p585_p0 }
  0x2d   :  { %558 = vmatpush3.bf16.msra.mxu0 %v557_v31 }
  0x2e   :  { %559 = vmatprep.subr.bf16.mxu0 %v608_v7 }
  0x31   :  { %561 = vmatpush3.bf16.msra.mxu0 %v560_v33 }
  0x32   :  { %562 = vmatprep.subr.bf16.mxu0 %v608_v7 }
  0x35   :  { %564 = vmatpush3.bf16.msra.mxu0 %v563_v36 }
  0x36   :  { %565 = vmatprep.subr.bf16.mxu0 %v608_v7 }
  0x39   :  { %567 = vmatpush3.bf16.msra.mxu0 %v566_v39 }
  0x3a   :  { %568 = vmatprep.subr.bf16.mxu0 %v608_v7 }
  0x3d   :  { %570 = vmatpush3.bf16.msra.mxu0 %v569_v42 }
  0x3e   :  { %571 = vmatprep.subr.bf16.mxu0 %v608_v7 }
  0x41   :  { %573 = vmatpush3.bf16.msra.mxu0 %v572_v45 }
  0xf7   :  { %v387_v46 = vpop.f32.mrb[0].mxu0 }
  0xf8   :  { %v388_v47 = vpop.f32.mrb[1].mxu0 }
  0xf9   :  { %v389_v49 = vadd.f32 %v388_v47, %v387_v46  ;;  %v233_v50 = vpop.f32.mrb[0].mxu1 }
  0xfa   :  { %v458_v51 = vpop.f32.mrb[1].mxu1 }
  0xfb   :  { %v164_v7 = vadd.f32 %v389_v49, %v353_v48 }
  0xfd   :  { %v234_v52 = vadd.f32 %v233_v50, %v164_v7 }
  0xff   :  { %v237_v53 = vmax.f32 %v234_v52, 0.0 }
 0x101   :  { %492 = vmatmul.mubr.f32.vlgmr.msra.gmra.mrb[2].mxu0 %v237_v53 }
 0x1d4   :  { %v327_v55 = vpop.f32.mrb[2].mxu0 }
 0x1d5   :  { %v328_v56 = vadd.f32 %v354_v54, %v327_v55  ;;  %v493_v57 = vpop.f32.mrb[3].mxu0 }
 0x1d7   :  { %v331_v58 = vsub.f32 0.0, %v328_v56 }
 0x1d9   :  { %v332_v59 = vmul.f32 1.442695, %v331_v58 }
 0x1db   :  { %580 = vpow2.f32 %v332_v59 }
 0x1e5   :  { %v581_v60 = vpop.eup %580 }
 0x1e6   :  { %v334_v61 = vadd.f32 1.0, %v581_v60 }
 0x1e8   :  { %582 = vrcp.f32 %v334_v61 }
 0x1f2   :  { %v583_v62 = vpop.eup %582 }
 0x1f3   :  { %338 = vst.msk [vmem:[#allocation2] sm:$0x3] %vm337_vm1, %v583_v62 }
 0x1f4   :  { %595 = shalt.err (!%p592_p4)
}
 0x1f5   :  { %s596_s24 = scalar_lea.hbm %s885_s5, 32 }
 0x1f6   :  { %p597_p5 = scmp.ne.s32.totalorder %s885_s5, %s596_s24  ;;  %p600_p6 = scmp.lt.u32.totalorder %s596_s24, %s885_s5 }
 0x1f8   :  { %p602_p7 = pnand %p600_p6, %p597_p5 }
 0x1fa   :  { %605 = shalt.err (!%p602_p7)
}
 0x1fb   :  { %348 = dma.vmem_to_hbm [thread:$0]  %s346_s3, 32, %s885_s5, [#allocation3]  }
 0x1fc   :  { %606 = dma.done.wait [#allocation3], 32  }
 0x1fd   :  { %607 = vsyncadd [#allocation3], 4294967264 }
 0x1fe   :  { %352 = vsyncpa [#allocation3], 1 }

</bundles_post_ra>
